<compile_context>
chip_gen: v7x
topology: tpu7x:2x2x1
jax: 0.10.0
libtpu: 0.0.40
codegen_flags: <defaults>
</compile_context>

<pallas_src>
import jax
import jax.numpy as jnp
from jax.experimental import pallas as pl
from jax.experimental.pallas import tpu as pltpu

STATE_SPACE = 4      # CartPole observation dim
ACTION_SPACE = 2     # CartPole action dim
H1 = 1000
H2 = 100
NEG_SLOPE = 0.01     # nn.LeakyReLU default


def _pad_to(n, m):
    return ((n + m - 1) // m) * m


# Padded sizes. Feature (lane) dims -> multiples of 128. The layer-1
# contraction dim is padded to 16 so the bf16 W1 fills a whole (16,128)
# packed-sublane tile (clean layout on all generations, incl. v5e).
S_P = _pad_to(STATE_SPACE, 16)     # 16
H1_P = _pad_to(H1, 128)            # 1024
H2_P = _pad_to(H2, 128)            # 128
A_P = _pad_to(ACTION_SPACE, 128)   # 128  (== H2_P, shares the small slab width)


def _leaky_relu(x):
    return jnp.where(x >= 0, x, NEG_SLOPE * x)


def critic_kernel(x_ref, wbig_ref, wsmall_ref, bias_ref, o_ref):
    """Whole MLP on one batch tile.

    wbig_ref   : (S_P + H1_P, H1_P) bf16  = [W1 ; W2]
    wsmall_ref : (H1_P + 2*H2_P, H2_P) bf16 = [W3 ; W4 ; W5]
    bias_ref   : (8, H1_P) f32, rows 0..4 = b1..b5 (zero padded)
    """
    def dense(h, w, b):
        # bf16 x bf16 on the MXU, f32 accumulation; bias add stays f32.
        return jnp.dot(h.astype(jnp.bfloat16), w,
                       preferred_element_type=jnp.float32) + b

    x = x_ref[...]                                                   # (Bb, S_P) f32
    h = _leaky_relu(dense(x, wbig_ref[0:S_P, :],           bias_ref[0:1, :]))
    h = _leaky_relu(dense(h, wbig_ref[S_P:S_P + H1_P, :],  bias_ref[1:2, :]))
    h = _leaky_relu(dense(h, wsmall_ref[0:H1_P, :],        bias_ref[2:3, 0:H2_P]))
    h = _leaky_relu(dense(h, wsmall_ref[H1_P:H1_P + H2_P, :],
                          bias_ref[3:4, 0:H2_P]))
    o_ref[...] = dense(h, wsmall_ref[H1_P + H2_P:H1_P + 2 * H2_P, :],
                       bias_ref[4:5, 0:A_P])


def _pad2d(a, rows, cols):
    r, c = a.shape
    return jnp.pad(a, ((0, rows - r), (0, cols - c)))


def prepare_params(params):
    """One-time glue: zero-pad, cast weights to bf16, pack into 3 slabs.

    Weights are (in_features, out_features). Call once after init / each
    optimizer step, NOT per forward.
    """
    (w1, b1), (w2, b2), (w3, b3), (w4, b4), (w5, b5) = params

    def padw(w, rows, cols):
        return _pad2d(w.astype(jnp.float32), rows, cols).astype(jnp.bfloat16)

    def padb(b, cols):
        return _pad2d(b.astype(jnp.float32)[None, :], 1, cols)

    w_big = jnp.concatenate(
        [padw(w1, S_P, H1_P), padw(w2, H1_P, H1_P)], axis=0)        # (1040, 1024) bf16
    w_small = jnp.concatenate(
        [padw(w3, H1_P, H2_P), padw(w4, H2_P, H2_P), padw(w5, H2_P, A_P)],
        axis=0)                                                      # (1280, 128) bf16
    biases = jnp.concatenate(
        [padb(b1, H1_P), padb(b2, H1_P), padb(b3, H1_P),
         padb(b4, H1_P), padb(b5, H1_P),
         jnp.zeros((3, H1_P), jnp.float32)], axis=0)                 # (8, 1024) f32

    return (w_big, w_small, biases)


@jax.jit
def critic_forward(x, prepared):
    """x: (B, STATE_SPACE) f32. Returns (B, ACTION_SPACE) f32.

    Weights DMA once (constant-index BlockSpecs) and stay VMEM-resident;
    the batch is tiled over a parallel grid so large B amortizes the weight
    read and splits across TensorCores on v7x.
    """
    w_big, w_small, biases = prepared
    B = x.shape[0]
    B_BLK = min(256, _pad_to(max(B, 1), 8))
    B_P = _pad_to(B, B_BLK)
    x_p = _pad2d(x.astype(jnp.float32), B_P, S_P)

    out = pl.pallas_call(
        critic_kernel,
        out_shape=jax.ShapeDtypeStruct((B_P, A_P), jnp.float32),
        grid=(B_P // B_BLK,),
        in_specs=[
            pl.BlockSpec((B_BLK, S_P), lambda i: (i, 0)),
            pl.BlockSpec(w_big.shape, lambda i: (0, 0)),
            pl.BlockSpec(w_small.shape, lambda i: (0, 0)),
            pl.BlockSpec(biases.shape, lambda i: (0, 0)),
        ],
        out_specs=pl.BlockSpec((B_BLK, A_P), lambda i: (i, 0)),
        compiler_params=pltpu.CompilerParams(
            dimension_semantics=("parallel",),
            vmem_limit_bytes=32 * 1024 * 1024),
    )(x_p, w_big, w_small, biases)

    return out[:B, :ACTION_SPACE]


def init_params(key):
    """PyTorch Linear defaults: U(-k, k), k = 1/sqrt(fan_in).
    Weights returned as (in_features, out_features)."""
    shapes = [
        (STATE_SPACE, H1),
        (H1, H1),
        (H1, H2),
        (H2, H2),
        (H2, ACTION_SPACE),
    ]
    params = []
    for (fan_in, fan_out) in shapes:
        key, kw, kb = jax.random.split(key, 3)
        k = 1.0 / jnp.sqrt(fan_in)
        w = jax.random.uniform(kw, (fan_in, fan_out), jnp.float32, -k, k)
        b = jax.random.uniform(kb, (fan_out,), jnp.float32, -k, k)
        params.append((w, b))
    return params


def critic_reference(x, params, quantized=True):
    """Reference forward. quantized=True mirrors the kernel's bf16 dot inputs
    with f32 accumulation (for a tight numerical comparison)."""
    h = x
    for i, (w, b) in enumerate(params):
        if quantized:
            h = jnp.dot(h.astype(jnp.bfloat16), w.astype(jnp.bfloat16),
                        preferred_element_type=jnp.float32) + b
        else:
            h = h @ w + b
        if i < len(params) - 1:
            h = _leaky_relu(h)
    return h


if __name__ == "__main__":
    key = jax.random.PRNGKey(0)
    kx, kx2, kp = jax.random.split(key, 3)

    params = init_params(kp)
    prepared = prepare_params(params)   # one-time pad + bf16 cast + pack

    # Small-batch check (module-scale example, batch=2).
    batch = 2
    x = jax.random.normal(kx, (batch, STATE_SPACE), jnp.float32)
    out = jax.block_until_ready(critic_forward(x, prepared))
    ref = critic_reference(x, params, quantized=True)
    assert out.shape == (batch, ACTION_SPACE)
    assert jnp.allclose(out, ref, atol=1e-2, rtol=1e-2), (out, ref)

    # Larger-batch check: exercises the multi-block batch grid (grid > 1),
    # batch padding, and VMEM-resident weights.
    batch2 = 384
    x2 = jax.random.normal(kx2, (batch2, STATE_SPACE), jnp.float32)
    out2 = jax.block_until_ready(critic_forward(x2, prepared))
    ref2 = critic_reference(x2, params, quantized=True)
    assert out2.shape == (batch2, ACTION_SPACE)
    assert jnp.allclose(out2, ref2, atol=1e-2, rtol=1e-2)

    print("KERNEL_OK")
</pallas_src>

<mosaic_0001>
module attributes {stable_mosaic.version = 11 : i64} {
  func.func @critic_kernel(%arg0: i32, %arg1: memref<8x16xf32, #tpu.memory_space<vmem>>, %arg2: memref<1040x1024xbf16, #tpu.memory_space<vmem>>, %arg3: memref<1280x128xbf16, #tpu.memory_space<vmem>>, %arg4: memref<8x1024xf32, #tpu.memory_space<vmem>>, %arg5: memref<8x128xf32, #tpu.memory_space<vmem>>) attributes {dimension_semantics = [#tpu.dimension_semantics<parallel>], iteration_bounds = array<i64: 1>, scalar_prefetch = 0 : i64, scratch_operands = 0 : i64, tpu.core_type = #tpu.core_type<tc>, window_params = [{transform_indices = @transform_0, window_bounds = array<i64: 8, 16>}, {pipeline_mode = #tpu.pipeline_mode<synchronous>, transform_indices = @transform_1, window_bounds = array<i64: 1040, 1024>}, {pipeline_mode = #tpu.pipeline_mode<synchronous>, transform_indices = @transform_2, window_bounds = array<i64: 1280, 128>}, {pipeline_mode = #tpu.pipeline_mode<synchronous>, transform_indices = @transform_3, window_bounds = array<i64: 8, 1024>}, {transform_indices = @transform_4, window_bounds = array<i64: 8, 128>}]} {
    %c0 = arith.constant 0 : index
    %c0_0 = arith.constant 0 : index
    %0 = vector.load %arg1[%c0, %c0_0] : memref<8x16xf32, #tpu.memory_space<vmem>>, vector<8x16xf32>
    %c0_1 = arith.constant 0 : index
    %c0_2 = arith.constant 0 : index
    %1 = vector.load %arg2[%c0_1, %c0_2] : memref<1040x1024xbf16, #tpu.memory_space<vmem>>, vector<16x1024xbf16>
    %c0_3 = arith.constant 0 : index
    %c0_4 = arith.constant 0 : index
    %2 = vector.load %arg4[%c0_3, %c0_4] : memref<8x1024xf32, #tpu.memory_space<vmem>>, vector<1x1024xf32>
    %3 = arith.truncf %0 : vector<8x16xf32> to vector<8x16xbf16>
    %cst = arith.constant dense<0.000000e+00> : vector<8x1024xf32>
    %4 = tpu.matmul %3, %1, %cst {dimension_numbers = #tpu.dot_dimension_numbers<[1], [0], [0], [1], [0, 0, 1, 1], [], []>} : vector<8x16xbf16>, vector<16x1024xbf16>, vector<8x1024xf32> -> vector<8x1024xf32>
    %5 = vector.broadcast %2 : vector<1x1024xf32> to vector<8x1024xf32>
    %6 = arith.addf %4, %5 : vector<8x1024xf32>
    %cst_5 = arith.constant 0.000000e+00 : f32
    %7 = vector.broadcast %cst_5 : f32 to vector<8x1024xf32>
    %8 = arith.cmpf oge, %6, %7 : vector<8x1024xf32>
    %cst_6 = arith.constant 0.00999999977 : f32
    %9 = vector.broadcast %cst_6 : f32 to vector<8x1024xf32>
    %10 = arith.mulf %9, %6 : vector<8x1024xf32>
    %11 = arith.select %8, %6, %10 : vector<8x1024xi1>, vector<8x1024xf32>
    %c16 = arith.constant 16 : index
    %c0_7 = arith.constant 0 : index
    %12 = vector.load %arg2[%c16, %c0_7] : memref<1040x1024xbf16, #tpu.memory_space<vmem>>, vector<1024x1024xbf16>
    %c1 = arith.constant 1 : index
    %c0_8 = arith.constant 0 : index
    %13 = vector.load %arg4[%c1, %c0_8] : memref<8x1024xf32, #tpu.memory_space<vmem>>, vector<1x1024xf32>
    %14 = arith.truncf %11 : vector<8x1024xf32> to vector<8x1024xbf16>
    %cst_9 = arith.constant dense<0.000000e+00> : vector<8x1024xf32>
    %15 = tpu.matmul %14, %12, %cst_9 {dimension_numbers = #tpu.dot_dimension_numbers<[1], [0], [0], [1], [0, 0, 1, 1], [], []>} : vector<8x1024xbf16>, vector<1024x1024xbf16>, vector<8x1024xf32> -> vector<8x1024xf32>
    %16 = vector.broadcast %13 : vector<1x1024xf32> to vector<8x1024xf32>
    %17 = arith.addf %15, %16 : vector<8x1024xf32>
    %cst_10 = arith.constant 0.000000e+00 : f32
    %18 = vector.broadcast %cst_10 : f32 to vector<8x1024xf32>
    %19 = arith.cmpf oge, %17, %18 : vector<8x1024xf32>
    %cst_11 = arith.constant 0.00999999977 : f32
    %20 = vector.broadcast %cst_11 : f32 to vector<8x1024xf32>
    %21 = arith.mulf %20, %17 : vector<8x1024xf32>
    %22 = arith.select %19, %17, %21 : vector<8x1024xi1>, vector<8x1024xf32>
    %c0_12 = arith.constant 0 : index
    %c0_13 = arith.constant 0 : index
    %23 = vector.load %arg3[%c0_12, %c0_13] : memref<1280x128xbf16, #tpu.memory_space<vmem>>, vector<1024x128xbf16>
    %c2 = arith.constant 2 : index
    %c0_14 = arith.constant 0 : index
    %24 = vector.load %arg4[%c2, %c0_14] : memref<8x1024xf32, #tpu.memory_space<vmem>>, vector<1x128xf32>
    %25 = arith.truncf %22 : vector<8x1024xf32> to vector<8x1024xbf16>
    %cst_15 = arith.constant dense<0.000000e+00> : vector<8x128xf32>
    %26 = tpu.matmul %25, %23, %cst_15 {dimension_numbers = #tpu.dot_dimension_numbers<[1], [0], [0], [1], [0, 0, 1, 1], [], []>} : vector<8x1024xbf16>, vector<1024x128xbf16>, vector<8x128xf32> -> vector<8x128xf32>
    %27 = vector.broadcast %24 : vector<1x128xf32> to vector<8x128xf32>
    %28 = arith.addf %26, %27 : vector<8x128xf32>
    %cst_16 = arith.constant 0.000000e+00 : f32
    %29 = vector.broadcast %cst_16 : f32 to vector<8x128xf32>
    %30 = arith.cmpf oge, %28, %29 : vector<8x128xf32>
    %cst_17 = arith.constant 0.00999999977 : f32
    %31 = vector.broadcast %cst_17 : f32 to vector<8x128xf32>
    %32 = arith.mulf %31, %28 : vector<8x128xf32>
    %33 = arith.select %30, %28, %32 : vector<8x128xi1>, vector<8x128xf32>
    %c1024 = arith.constant 1024 : index
    %c0_18 = arith.constant 0 : index
    %34 = vector.load %arg3[%c1024, %c0_18] : memref<1280x128xbf16, #tpu.memory_space<vmem>>, vector<128x128xbf16>
    %c3 = arith.constant 3 : index
    %c0_19 = arith.constant 0 : index
    %35 = vector.load %arg4[%c3, %c0_19] : memref<8x1024xf32, #tpu.memory_space<vmem>>, vector<1x128xf32>
    %36 = arith.truncf %33 : vector<8x128xf32> to vector<8x128xbf16>
    %cst_20 = arith.constant dense<0.000000e+00> : vector<8x128xf32>
    %37 = tpu.matmul %36, %34, %cst_20 {dimension_numbers = #tpu.dot_dimension_numbers<[1], [0], [0], [1], [0, 0, 1, 1], [], []>} : vector<8x128xbf16>, vector<128x128xbf16>, vector<8x128xf32> -> vector<8x128xf32>
    %38 = vector.broadcast %35 : vector<1x128xf32> to vector<8x128xf32>
    %39 = arith.addf %37, %38 : vector<8x128xf32>
    %cst_21 = arith.constant 0.000000e+00 : f32
    %40 = vector.broadcast %cst_21 : f32 to vector<8x128xf32>
    %41 = arith.cmpf oge, %39, %40 : vector<8x128xf32>
    %cst_22 = arith.constant 0.00999999977 : f32
    %42 = vector.broadcast %cst_22 : f32 to vector<8x128xf32>
    %43 = arith.mulf %42, %39 : vector<8x128xf32>
    %44 = arith.select %41, %39, %43 : vector<8x128xi1>, vector<8x128xf32>
    %c1152 = arith.constant 1152 : index
    %c0_23 = arith.constant 0 : index
    %45 = vector.load %arg3[%c1152, %c0_23] : memref<1280x128xbf16, #tpu.memory_space<vmem>>, vector<128x128xbf16>
    %c4 = arith.constant 4 : index
    %c0_24 = arith.constant 0 : index
    %46 = vector.load %arg4[%c4, %c0_24] : memref<8x1024xf32, #tpu.memory_space<vmem>>, vector<1x128xf32>
    %47 = arith.truncf %44 : vector<8x128xf32> to vector<8x128xbf16>
    %cst_25 = arith.constant dense<0.000000e+00> : vector<8x128xf32>
    %48 = tpu.matmul %47, %45, %cst_25 {dimension_numbers = #tpu.dot_dimension_numbers<[1], [0], [0], [1], [0, 0, 1, 1], [], []>} : vector<8x128xbf16>, vector<128x128xbf16>, vector<8x128xf32> -> vector<8x128xf32>
    %49 = vector.broadcast %46 : vector<1x128xf32> to vector<8x128xf32>
    %50 = arith.addf %48, %49 : vector<8x128xf32>
    %c0_26 = arith.constant 0 : index
    %c0_27 = arith.constant 0 : index
    %51 = vector.load %arg5[%c0_26, %c0_27] : memref<8x128xf32, #tpu.memory_space<vmem>>, vector<8x128xf32>
    tpu.vector_store %arg5[%c0_26, %c0_27], %50 {strides = array<i32>} : memref<8x128xf32, #tpu.memory_space<vmem>>, vector<8x128xf32>,
    return
  }
  func.func @transform_0(%arg0: i32) -> (i32, i32) {
    %c0_i32 = arith.constant 0 : i32
    %c0_i32_0 = arith.constant 0 : i32
    return %arg0, %c0_i32 : i32, i32
  }
  func.func @transform_1(%arg0: i32) -> (i32, i32) {
    %c0_i32 = arith.constant 0 : i32
    %c0_i32_0 = arith.constant 0 : i32
    %c0_i32_1 = arith.constant 0 : i32
    return %c0_i32, %c0_i32_0 : i32, i32
  }
  func.func @transform_2(%arg0: i32) -> (i32, i32) {
    %c0_i32 = arith.constant 0 : i32
    %c0_i32_0 = arith.constant 0 : i32
    %c0_i32_1 = arith.constant 0 : i32
    return %c0_i32, %c0_i32_0 : i32, i32
  }
  func.func @transform_3(%arg0: i32) -> (i32, i32) {
    %c0_i32 = arith.constant 0 : i32
    %c0_i32_0 = arith.constant 0 : i32
    %c0_i32_1 = arith.constant 0 : i32
    return %c0_i32, %c0_i32_0 : i32, i32
  }
  func.func @transform_4(%arg0: i32) -> (i32, i32) {
    %c0_i32 = arith.constant 0 : i32
    %c0_i32_0 = arith.constant 0 : i32
    return %arg0, %c0_i32 : i32, i32
  }
}

</mosaic_0001>

<bundles_post_ra>
// kernel: critic_forward.1
= control target key start
LH: loop header
LB: loop body
LE: loop exit
PB: predicated region body
PF: predicated region fallthrough
CT: control target
= control target key end

     0   :  { %9 = vsyncpa [#allocation3], 0  ;;  %s6256_s0 = inlined_call_operand.vmem [shape: f32[8,16], index: 0, kind: input, shape index: {}]   ;;  %s6257_s1 = inlined_call_operand.hbm [shape: bf16[1040,1024], index: 1, kind: input, shape index: {}]   ;;  %s6258_s2 = inlined_call_operand.hbm [shape: bf16[1280,128], index: 2, kind: input, shape index: {}]   ;;  %s6259_s3 = inlined_call_operand.hbm [shape: f32[8,1024], index: 3, kind: input, shape index: {}]   ;;  %s6260_s4 = inlined_call_operand.vmem [shape: f32[8,128], index: 4, kind: output, shape index: {}]  }
   0x1   :  { %10 = vsyncpa [#allocation5], 0  ;;  %s6020_s15 = smov [#allocation4]   ;;  %s5950_s19 = scalar_lea.hbm %s6258_s2, 10240 }
   0x2   :  { %s30_s16 = sshll.u32 %s6020_s15, 4  ;;  %p5951_p0 = scmp.ne.s32.totalorder %s6258_s2, %s5950_s19  ;;  %s31_s16 = int_to_ptr.vmem [resolvable:$true] %s30_s16 }
   0x3   :  { %p5954_p1 = scmp.lt.u32.totalorder %s5950_s19, %s6258_s2 }
   0x5   :  { %p5956_p2 = pnand %p5954_p1, %p5951_p0 }
   0x7   :  { %5959 = shalt.err (!%p5956_p2)
}
   0x8   :  { %s5960_s24 = scalar_lea.vmem %s31_s16, 10240  ;;  %p5965_p4 = scmp.lt.s32.totalorder %s31_s16, %s31_s16 }
   0x9   :  { %p5961_p3 = scmp.ne.s32.totalorder %s31_s16, %s5960_s24  ;;  %p5966_p5 = scmp.lt.s32.totalorder %s5960_s24, %s5960_s24 }
   0xb   :  { %p5967_p6 = por %p5966_p5, %p5965_p4 }
   0xd   :  { %p5968_p7 = pnand %p5967_p6, %p5961_p3 }
   0xf   :  { %5971 = shalt.err (!%p5968_p7)
}
  0x10   :  { %s6021_s25 = smov 64   ;;  %s6022_s26 = smov 4  }
  0x11   :  { %36 = dma.hbm_to_vmem [thread:$0]  %s6258_s2, 10240, %s31_s16, [#allocation5], %s6021_s25, %s6021_s25, %s6022_s26  }
  0x12   :  { %s6023_s29 = smov [#allocation2]   ;;  %s5972_s7 = scalar_lea.hbm %s6257_s1, 66560 }
  0x13   :  { %s18_s30 = sshll.u32 %s6023_s29, 4  ;;  %p5973_p8 = scmp.ne.s32.totalorder %s6257_s1, %s5972_s7  ;;  %s19_s30 = int_to_ptr.vmem [resolvable:$true] %s18_s30 }
  0x14   :  { %p5976_p9 = scmp.lt.u32.totalorder %s5972_s7, %s6257_s1 }
  0x16   :  { %p5978_p10 = pnand %p5976_p9, %p5973_p8 }
  0x18   :  { %5981 = shalt.err (!%p5978_p10)
}
  0x19   :  { %s5982_s12 = scalar_lea.vmem %s19_s30, 66560  ;;  %p5987_p12 = scmp.lt.s32.totalorder %s19_s30, %s19_s30 }
  0x1a   :  { %p5983_p11 = scmp.ne.s32.totalorder %s19_s30, %s5982_s12  ;;  %p5988_p13 = scmp.lt.s32.totalorder %s5982_s12, %s5982_s12 }
  0x1c   :  { %p5989_p0 = por %p5988_p13, %p5987_p12 }
  0x1e   :  { %p5990_p1 = pnand %p5989_p0, %p5983_p11 }
  0x20   :  { %5993 = shalt.err (!%p5990_p1)
}
  0x21   :  { %s6024_s2 = smov 512   ;;  %s6025_s13 = smov 32  }
  0x22   :  { %24 = dma.hbm_to_vmem [thread:$0]  %s6257_s1, 66560, %s19_s30, [#allocation3], %s6024_s2, %s6024_s2, %s6025_s13  }
  0x23   :  { %s6026_s16 = smov [#allocation6]   ;;  %s5994_s20 = scalar_lea.hbm %s6259_s3, 1024 }
  0x24   :  { %s43_s17 = sshll.u32 %s6026_s16, 4  ;;  %p5995_p2 = scmp.ne.s32.totalorder %s6259_s3, %s5994_s20  ;;  %s44_s17 = int_to_ptr.vmem [resolvable:$true] %s43_s17 }
  0x25   :  { %p5998_p3 = scmp.lt.u32.totalorder %s5994_s20, %s6259_s3 }
  0x27   :  { %p6000_p4 = pnand %p5998_p3, %p5995_p2 }
  0x29   :  { %6003 = shalt.err (!%p6000_p4)
}
  0x2a   :  { %s6004_s25 = scalar_lea.vmem %s44_s17, 1024  ;;  %p6009_p6 = scmp.lt.s32.totalorder %s44_s17, %s44_s17 }
  0x2b   :  { %p6005_p5 = scmp.ne.s32.totalorder %s44_s17, %s6004_s25  ;;  %p6010_p7 = scmp.lt.s32.totalorder %s6004_s25, %s6004_s25 }
  0x2d   :  { %p6011_p8 = por %p6010_p7, %p6009_p6 }
  0x2f   :  { %p6012_p9 = pnand %p6011_p8, %p6005_p5 }
  0x31   :  { %6015 = shalt.err (!%p6012_p9)
}
  0x32   :  { %46 = dma.hbm_to_vmem [thread:$0]  %s6259_s3, 1024, %s44_s17, [#allocation5]  }
  0x33   :  { %6016 = dma.done.wait [#allocation3], 66560  }
  0x34   :  { %6017 = vsyncadd [#allocation3], 4294900736 }
  0x35   :  { %6018 = dma.done.wait [#allocation5], 11264  }
  0x36   :  { %6019 = vsyncadd [#allocation5], 4294956032  ;;  %v6027_v0 = vmov 0   ;;  %v58_v1 = vld [vmem:[#allocation2] sm:$0xff]  ;;  %v59_v6 = vld [vmem:[#allocation2 + $0x8] sm:$0xff]  ;;  %vm151_vm0 = vcmask 130048  }
  0x37   :  { %187 = vmatprep.mubr.bf16.mxu0 %v6027_v0  ;;  %228 = vmatprep.mubr.bf16.mxu1 %v6027_v0  ;;  %v62_v2 = vld [vmem:[#allocation2 + $0x20] sm:$0xff]  ;;  %v63_v7 = vld [vmem:[#allocation2 + $0x28] sm:$0xff]  ;;  %v60_v8 = vld [vmem:[#allocation2 + $0x10] sm:$0xff] }
  0x38   :  { %v57_v3 = vld [vmem:[%s6256_s0] sm:$0xff]  ;;  %v5055_v4 = vcombine.high %v58_v1, %v62_v2  ;;  %v5054_v5 = vcombine.low %v58_v1, %v62_v2  ;;  %v5057_v9 = vcombine.high %v59_v6, %v63_v7  ;;  %v5056_v10 = vcombine.low %v59_v6, %v63_v7  ;;  %v64_v11 = vld [vmem:[#allocation2 + $0x30] sm:$0xff]  ;;  %v61_v12 = vld [vmem:[#allocation2 + $0x18] sm:$0xff] }
  0x39   :  { %v65_v13 = vld [vmem:[#allocation2 + $0x38] sm:$0xff]  ;;  %v69_v14 = vpack.c.bf16 %v57_v3, %v57_v3  ;;  %v5059_v15 = vcombine.high %v60_v8, %v64_v11  ;;  %v343_v17 = vld [vmem:[#allocation2 + $0x40] sm:$0xff]  ;;  %v5058_v19 = vcombine.low %v60_v8, %v64_v11  ;;  %v344_v20 = vld [vmem:[#allocation2 + $0x48] sm:$0xff] }
  0x3a   :  { %155 = vmatprep.subr.bf16.mxu0 %v5055_v4  ;;  %v5061_v16 = vcombine.high %v61_v12, %v65_v13  ;;  %v347_v18 = vld [vmem:[#allocation2 + $0x60] sm:$0xff]  ;;  %196 = vmatprep.subr.bf16.mxu1 %v5057_v9  ;;  %v348_v21 = vld [vmem:[#allocation2 + $0x68] sm:$0xff]  ;;  %v5060_v22 = vcombine.low %v61_v12, %v65_v13 }
  0x3b   :  { %156 = vmatpush1.bf16.msra.mxu0 %v5054_v5  ;;  %197 = vmatpush1.bf16.msra.mxu1 %v5056_v10  ;;  %v5067_v23 = vcombine.high %v343_v17, %v347_v18  ;;  %v5069_v24 = vcombine.high %v344_v20, %v348_v21  ;;  %v351_v25 = vld [vmem:[#allocation2 + $0x80] sm:$0xff]  ;;  %v352_v27 = vld [vmem:[#allocation2 + $0x88] sm:$0xff]  ;;  %v5066_v29 = vcombine.low %v343_v17, %v347_v18 }
  0x3c   :  { %237 = vmatprep.subr.bf16.mxu0 %v5059_v15  ;;  %278 = vmatprep.subr.bf16.mxu1 %v5061_v16  ;;  %v355_v26 = vld [vmem:[#allocation2 + $0xa0] sm:$0xff]  ;;  %v356_v28 = vld [vmem:[#allocation2 + $0xa8] sm:$0xff]  ;;  %v5068_v30 = vcombine.low %v344_v20, %v348_v21 }
  0x3d   :  { %v5075_v31 = vcombine.high %v351_v25, %v355_v26  ;;  %v5077_v32 = vcombine.high %v352_v27, %v356_v28  ;;  %v359_v33 = vld [vmem:[#allocation2 + $0xc0] sm:$0xff]  ;;  %v360_v35 = vld [vmem:[#allocation2 + $0xc8] sm:$0xff]  ;;  %v5074_v37 = vcombine.low %v351_v25, %v355_v26  ;;  %v5076_v38 = vcombine.low %v352_v27, %v356_v28 }
  0x3e   :  { %5062 = vmatmul.mubr.msk.bf16.vlgmr.msra.gmra.mrb[0].mxu0 %vm151_vm0, %v69_v14  ;;  %5063 = vmatmul.mubr.msk.bf16.vlgmr.msra.gmra.mrb[0].mxu1 %vm151_vm0, %v69_v14  ;;  %v363_v34 = vld [vmem:[#allocation2 + $0xe0] sm:$0xff]  ;;  %v364_v36 = vld [vmem:[#allocation2 + $0xe8] sm:$0xff] }
  0x3f   :  { %238 = vmatpush1.bf16.msra.mxu0 %v5058_v19  ;;  %269 = vmatprep.mubr.bf16.mxu0 %v6027_v0  ;;  %v5083_v39 = vcombine.high %v359_v33, %v363_v34  ;;  %v5085_v40 = vcombine.high %v360_v35, %v364_v36  ;;  %v367_v41 = vld [vmem:[#allocation2 + $0x100] sm:$0xff]  ;;  %v368_v43 = vld [vmem:[#allocation2 + $0x108] sm:$0xff]  ;;  %v5082_v45 = vcombine.low %v359_v33, %v363_v34 }
  0x40   :  { %279 = vmatpush1.bf16.msra.mxu1 %v5060_v22  ;;  %310 = vmatprep.mubr.bf16.mxu1 %v6027_v0  ;;  %v371_v42 = vld [vmem:[#allocation2 + $0x120] sm:$0xff]  ;;  %v372_v44 = vld [vmem:[#allocation2 + $0x128] sm:$0xff]  ;;  %v5084_v46 = vcombine.low %v360_v35, %v364_v36 }
  0x41   :  { %3468 = vmatprep.subr.bf16.mxu0 %v5067_v23  ;;  %3632 = vmatprep.subr.bf16.mxu1 %v5069_v24  ;;  %v5091_v47 = vcombine.high %v367_v41, %v371_v42  ;;  %v375_v48 = vld [vmem:[#allocation2 + $0x140] sm:$0xff]  ;;  %v5093_v50 = vcombine.high %v368_v43, %v372_v44  ;;  %v376_v51 = vld [vmem:[#allocation2 + $0x148] sm:$0xff]  ;;  %v5090_v53 = vcombine.low %v367_v41, %v371_v42 }
  0x42   :  { %v379_v49 = vld [vmem:[#allocation2 + $0x160] sm:$0xff]  ;;  %v380_v52 = vld [vmem:[#allocation2 + $0x168] sm:$0xff]  ;;  %v5092_v56 = vcombine.low %v368_v43, %v372_v44 }
  0x43   :  { %v383_v54 = vld [vmem:[#allocation2 + $0x180] sm:$0xff]  ;;  %v5099_v57 = vcombine.high %v375_v48, %v379_v49  ;;  %v384_v58 = vld [vmem:[#allocation2 + $0x188] sm:$0xff]  ;;  %v5101_v60 = vcombine.high %v376_v51, %v380_v52  ;;  %v5098_v61 = vcombine.low %v375_v48, %v379_v49  ;;  %v5100_v0 = vcombine.low %v376_v51, %v380_v52 }
  0x44   :  { %v387_v55 = vld [vmem:[#allocation2 + $0x1a0] sm:$0xff]  ;;  %v388_v59 = vld [vmem:[#allocation2 + $0x1a8] sm:$0xff] }
  0x45   :  { %v391_v62 = vld [vmem:[#allocation2 + $0x1c0] sm:$0xff]  ;;  %v5107_v1 = vcombine.high %v383_v54, %v387_v55  ;;  %v392_v2 = vld [vmem:[#allocation2 + $0x1c8] sm:$0xff]  ;;  %v5109_v4 = vcombine.high %v384_v58, %v388_v59  ;;  %v5106_v5 = vcombine.low %v383_v54, %v387_v55  ;;  %v5108_v8 = vcombine.low %v384_v58, %v388_v59 }
  0x46   :  { %5064 = vmatmul.mubr.msk.bf16.vlgmr.msra.gmra.mrb[4].mxu0 %vm151_vm0, %v69_v14  ;;  %5065 = vmatmul.mubr.msk.bf16.vlgmr.msra.gmra.mrb[4].mxu1 %vm151_vm0, %v69_v14  ;;  %v395_v63 = vld [vmem:[#allocation2 + $0x1e0] sm:$0xff]  ;;  %v396_v3 = vld [vmem:[#allocation2 + $0x1e8] sm:$0xff] }
  0x47   :  { %3469 = vmatpush1.bf16.msra.mxu0 %v5066_v29  ;;  %3633 = vmatpush1.bf16.msra.mxu1 %v5068_v30  ;;  %v399_v6 = vld [vmem:[#allocation2 + $0x200] sm:$0xff]  ;;  %v5115_v9 = vcombine.high %v391_v62, %v395_v63  ;;  %v400_v10 = vld [vmem:[#allocation2 + $0x208] sm:$0xff]  ;;  %v5117_v12 = vcombine.high %v392_v2, %v396_v3  ;;  %v5114_v13 = vcombine.low %v391_v62, %v395_v63 }
  0x48   :  { %3470 = vmatprep.subr.bf16.mxu0 %v5075_v31  ;;  %3634 = vmatprep.subr.bf16.mxu1 %v5077_v32  ;;  %v403_v7 = vld [vmem:[#allocation2 + $0x220] sm:$0xff]  ;;  %v404_v11 = vld [vmem:[#allocation2 + $0x228] sm:$0xff]  ;;  %v5116_v16 = vcombine.low %v392_v2, %v396_v3 }
  0x49   :  { %v407_v14 = vld [vmem:[#allocation2 + $0x240] sm:$0xff]  ;;  %v5123_v17 = vcombine.high %v399_v6, %v403_v7  ;;  %v408_v18 = vld [vmem:[#allocation2 + $0x248] sm:$0xff]  ;;  %v5125_v20 = vcombine.high %v400_v10, %v404_v11  ;;  %v5122_v21 = vcombine.low %v399_v6, %v403_v7  ;;  %v5124_v24 = vcombine.low %v400_v10, %v404_v11 }
  0x4a   :  { %v411_v15 = vld [vmem:[#allocation2 + $0x260] sm:$0xff]  ;;  %v412_v19 = vld [vmem:[#allocation2 + $0x268] sm:$0xff] }
  0x4b   :  { %3471 = vmatpush1.bf16.msra.mxu0 %v5074_v37  ;;  %3635 = vmatpush1.bf16.msra.mxu1 %v5076_v38  ;;  %v415_v22 = vld [vmem:[#allocation2 + $0x280] sm:$0xff]  ;;  %v5131_v25 = vcombine.high %v407_v14, %v411_v15  ;;  %v416_v26 = vld [vmem:[#allocation2 + $0x288] sm:$0xff]  ;;  %v5133_v28 = vcombine.high %v408_v18, %v412_v19  ;;  %v5130_v29 = vcombine.low %v407_v14, %v411_v15 }
  0x4c   :  { %3472 = vmatprep.subr.bf16.mxu0 %v5083_v39  ;;  %3636 = vmatprep.subr.bf16.mxu1 %v5085_v40  ;;  %v419_v23 = vld [vmem:[#allocation2 + $0x2a0] sm:$0xff]  ;;  %v420_v27 = vld [vmem:[#allocation2 + $0x2a8] sm:$0xff]  ;;  %v5132_v32 = vcombine.low %v408_v18, %v412_v19 }
  0x4d   :  { %v423_v30 = vld [vmem:[#allocation2 + $0x2c0] sm:$0xff]  ;;  %v5139_v33 = vcombine.high %v415_v22, %v419_v23  ;;  %v424_v34 = vld [vmem:[#allocation2 + $0x2c8] sm:$0xff]  ;;  %v5141_v36 = vcombine.high %v416_v26, %v420_v27  ;;  %v5138_v37 = vcombine.low %v415_v22, %v419_v23  ;;  %v5140_v40 = vcombine.low %v416_v26, %v420_v27 }
  0x4e   :  { %v427_v31 = vld [vmem:[#allocation2 + $0x2e0] sm:$0xff]  ;;  %v428_v35 = vld [vmem:[#allocation2 + $0x2e8] sm:$0xff]  ;;  %v71_v27 = vlaneseq }
  0x4f   :  { %3473 = vmatpush1.bf16.msra.mxu0 %v5082_v45  ;;  %3637 = vmatpush1.bf16.msra.mxu1 %v5084_v46  ;;  %v431_v38 = vld [vmem:[#allocation2 + $0x300] sm:$0xff]  ;;  %v5147_v41 = vcombine.high %v423_v30, %v427_v31  ;;  %v432_v42 = vld [vmem:[#allocation2 + $0x308] sm:$0xff]  ;;  %v5149_v44 = vcombine.high %v424_v34, %v428_v35  ;;  %v5146_v45 = vcombine.low %v423_v30, %v427_v31 }
  0x50   :  { %3474 = vmatprep.subr.bf16.mxu0 %v5091_v47  ;;  %3638 = vmatprep.subr.bf16.mxu1 %v5093_v50  ;;  %v435_v39 = vld [vmem:[#allocation2 + $0x320] sm:$0xff]  ;;  %v436_v43 = vld [vmem:[#allocation2 + $0x328] sm:$0xff]  ;;  %v5148_v48 = vcombine.low %v424_v34, %v428_v35 }
  0x51   :  { %v439_v46 = vld [vmem:[#allocation2 + $0x340] sm:$0xff]  ;;  %v5155_v49 = vcombine.high %v431_v38, %v435_v39  ;;  %v440_v50 = vld [vmem:[#allocation2 + $0x348] sm:$0xff]  ;;  %v5157_v52 = vcombine.high %v432_v42, %v436_v43 }
  0x52   :  { %v443_v47 = vld [vmem:[#allocation2 + $0x360] sm:$0xff]  ;;  %v444_v51 = vld [vmem:[#allocation2 + $0x368] sm:$0xff] }
  0x53   :  { %3475 = vmatpush1.bf16.msra.mxu0 %v5090_v53  ;;  %3639 = vmatpush1.bf16.msra.mxu1 %v5092_v56  ;;  %v5154_v53 = vcombine.low %v431_v38, %v435_v39  ;;  %v447_v54 = vld [vmem:[#allocation2 + $0x380] sm:$0xff]  ;;  %v5156_v56 = vcombine.low %v432_v42, %v436_v43  ;;  %v448_v58 = vld [vmem:[#allocation2 + $0x388] sm:$0xff]  ;;  %v5164_v62 = vcombine.low %v440_v50, %v444_v51 }
  0x54   :  { %3476 = vmatprep.subr.bf16.mxu0 %v5099_v57  ;;  %3640 = vmatprep.subr.bf16.mxu1 %v5101_v60  ;;  %v451_v55 = vld [vmem:[#allocation2 + $0x3a0] sm:$0xff]  ;;  %v5163_v57 = vcombine.high %v439_v46, %v443_v47  ;;  %v452_v59 = vld [vmem:[#allocation2 + $0x3a8] sm:$0xff]  ;;  %v5165_v60 = vcombine.high %v440_v50, %v444_v51 }
  0x55   :  { %v5171_v63 = vcombine.high %v447_v54, %v451_v55  ;;  %v5172_v2 = vcombine.low %v448_v58, %v452_v59  ;;  %v455_v3 = vld [vmem:[#allocation2 + $0x3c0] sm:$0xff]  ;;  %v460_v7 = vld [vmem:[#allocation2 + $0x3e8] sm:$0xff] }
  0x56   :  { %v463_v11 = vld [vmem:[#allocation2 + $0x400] sm:$0xff]  ;;  %v468_v15 = vld [vmem:[#allocation2 + $0x428] sm:$0xff] }
  0x57   :  { %3477 = vmatpush1.bf16.msra.mxu0 %v5098_v61  ;;  %3641 = vmatpush1.bf16.msra.mxu1 %v5100_v0  ;;  %v5162_v61 = vcombine.low %v439_v46, %v443_v47  ;;  %v5173_v0 = vcombine.high %v448_v58, %v452_v59  ;;  %v471_v19 = vld [vmem:[#allocation2 + $0x440] sm:$0xff]  ;;  %v476_v23 = vld [vmem:[#allocation2 + $0x468] sm:$0xff] }
  0x58   :  { %3478 = vmatprep.subr.bf16.mxu0 %v5107_v1  ;;  %3642 = vmatprep.subr.bf16.mxu1 %v5109_v4  ;;  %v5170_v1 = vcombine.low %v447_v54, %v451_v55  ;;  %v459_v4 = vld [vmem:[#allocation2 + $0x3e0] sm:$0xff]  ;;  %v484_v54 = vld [vmem:[#allocation2 + $0x4a8] sm:$0xff] }
  0x59   :  { %v5179_v6 = vcombine.high %v455_v3, %v459_v4  ;;  %v67_v30 = vld [vmem:[#allocation6] ss:$8 sm:$0xf0] }
  0x5a   :  { %v479_v50 = vld [vmem:[#allocation2 + $0x480] sm:$0xff] }
  0x5b   :  { %3479 = vmatpush1.bf16.msra.mxu0 %v5106_v5  ;;  %3643 = vmatpush1.bf16.msra.mxu1 %v5108_v8  ;;  %v456_v5 = vld [vmem:[#allocation2 + $0x3c8] sm:$0xff]  ;;  %v5178_v8 = vcombine.low %v455_v3, %v459_v4  ;;  %v483_v51 = vld [vmem:[#allocation2 + $0x4a0] sm:$0xff] }
  0x5c   :  { %3480 = vmatprep.subr.bf16.mxu0 %v5115_v9  ;;  %3644 = vmatprep.subr.bf16.mxu1 %v5117_v12  ;;  %v5180_v9 = vcombine.low %v456_v5, %v460_v7  ;;  %v5181_v10 = vcombine.high %v456_v5, %v460_v7  ;;  %v467_v12 = vld [vmem:[#allocation2 + $0x420] sm:$0xff]  ;;  %v492_v3 = vld [vmem:[#allocation2 + $0x4e8] sm:$0xff]  ;;  %v5202_v7 = vcombine.low %v479_v50, %v483_v51 }
  0x5d   :  { %v5187_v14 = vcombine.high %v463_v11, %v467_v12 }
  0x5f   :  { %3481 = vmatpush1.bf16.msra.mxu0 %v5114_v13  ;;  %3645 = vmatpush1.bf16.msra.mxu1 %v5116_v16  ;;  %v464_v13 = vld [vmem:[#allocation2 + $0x408] sm:$0xff]  ;;  %v5186_v16 = vcombine.low %v463_v11, %v467_v12  ;;  %v495_v12 = vld [vmem:[#allocation2 + $0x500] sm:$0xff] }
  0x60   :  { %3482 = vmatprep.subr.bf16.mxu0 %v5123_v17  ;;  %3646 = vmatprep.subr.bf16.mxu1 %v5125_v20  ;;  %v5188_v17 = vcombine.low %v464_v13, %v468_v15  ;;  %v5189_v18 = vcombine.high %v464_v13, %v468_v15  ;;  %v475_v20 = vld [vmem:[#allocation2 + $0x460] sm:$0xff]  ;;  %v500_v15 = vld [vmem:[#allocation2 + $0x528] sm:$0xff] }
  0x61   :  { %v5195_v22 = vcombine.high %v471_v19, %v475_v20  ;;  %v499_v13 = vld [vmem:[#allocation2 + $0x520] sm:$0xff] }
  0x63   :  { %3483 = vmatpush1.bf16.msra.mxu0 %v5122_v21  ;;  %3647 = vmatpush1.bf16.msra.mxu1 %v5124_v24  ;;  %v472_v21 = vld [vmem:[#allocation2 + $0x448] sm:$0xff]  ;;  %v5194_v24 = vcombine.low %v471_v19, %v475_v20  ;;  %v503_v20 = vld [vmem:[#allocation2 + $0x540] sm:$0xff] }
  0x64   :  { %3484 = vmatprep.subr.bf16.mxu0 %v5131_v25  ;;  %3648 = vmatprep.subr.bf16.mxu1 %v5133_v28  ;;  %v5196_v25 = vcombine.low %v472_v21, %v476_v23  ;;  %v5197_v26 = vcombine.high %v472_v21, %v476_v23  ;;  %v6098_v28 = vshrl.u32 %v71_v27, 7  ;;  %v507_v21 = vld [vmem:[#allocation2 + $0x560] sm:$0xff]  ;;  %v508_v23 = vld [vmem:[#allocation2 + $0x568] sm:$0xff] }
  0x66   :  { %v85_v34 = vsub.s32 3, %v6098_v28 }
  0x67   :  { %3485 = vmatpush1.bf16.msra.mxu0 %v5130_v29  ;;  %3649 = vmatpush1.bf16.msra.mxu1 %v5132_v32  ;;  %v66_v29 = vld [vmem:[#allocation6] ss:$8 sm:$0xf]  ;;  %v73_v32 = vsub.s32 0, %v6098_v28 }
  0x68   :  { %3486 = vmatprep.subr.bf16.mxu0 %v5139_v33  ;;  %3650 = vmatprep.subr.bf16.mxu1 %v5141_v36  ;;  %v6100_v31 = vor.u32 %v67_v30, %v66_v29  ;;  %v77_v33 = vsub.s32 1, %v6098_v28  ;;  %v511_v29 = vld [vmem:[#allocation2 + $0x580] sm:$0xff] }
  0x69   :  { %v515_v30 = vld [vmem:[#allocation2 + $0x5a0] sm:$0xff] }
  0x6a   :  { %v74_v35 = vrot.slane %v6100_v31, %v73_v32  ;;  %v78_v36 = vrot.slane %v6100_v31, %v77_v33 }
  0x6b   :  { %3487 = vmatpush1.bf16.msra.mxu0 %v5138_v37  ;;  %3651 = vmatpush1.bf16.msra.mxu1 %v5140_v40  ;;  %v86_v37 = vrot.slane %v6100_v31, %v85_v34 }
  0x6c   :  { %3488 = vmatprep.subr.bf16.mxu0 %v5147_v41  ;;  %3652 = vmatprep.subr.bf16.mxu1 %v5149_v44 }
  0x6f   :  { %3489 = vmatpush1.bf16.msra.mxu0 %v5146_v45  ;;  %3653 = vmatpush1.bf16.msra.mxu1 %v5148_v48 }
  0x70   :  { %3490 = vmatprep.subr.bf16.mxu0 %v5155_v49  ;;  %3654 = vmatprep.subr.bf16.mxu1 %v5157_v52 }
  0x73   :  { %3491 = vmatpush1.bf16.msra.mxu0 %v5154_v53  ;;  %3655 = vmatpush1.bf16.msra.mxu1 %v5156_v56  ;;  %v480_v53 = vld [vmem:[#allocation2 + $0x488] sm:$0xff] }
  0x74   :  { %3492 = vmatprep.subr.bf16.mxu0 %v5163_v57  ;;  %3656 = vmatprep.subr.bf16.mxu1 %v5165_v60 }
  0x77   :  { %3493 = vmatpush1.bf16.msra.mxu0 %v5162_v61  ;;  %3657 = vmatpush1.bf16.msra.mxu1 %v5164_v62  ;;  %v5203_v61 = vcombine.high %v479_v50, %v483_v51  ;;  %v5205_v62 = vcombine.high %v480_v53, %v484_v54  ;;  %v527_v51 = vld [vmem:[#allocation2 + $0x600] sm:$0xff] }
  0x78   :  { %3494 = vmatprep.subr.bf16.mxu0 %v5171_v63  ;;  %3658 = vmatprep.subr.bf16.mxu1 %v5173_v0  ;;  %v487_v63 = vld [vmem:[#allocation2 + $0x4c0] sm:$0xff] }
  0x7b   :  { %3495 = vmatpush1.bf16.msra.mxu0 %v5170_v1  ;;  %3659 = vmatpush1.bf16.msra.mxu1 %v5172_v2  ;;  %v491_v1 = vld [vmem:[#allocation2 + $0x4e0] sm:$0xff]  ;;  %v488_v2 = vld [vmem:[#allocation2 + $0x4c8] sm:$0xff] }
  0x7c   :  { %3496 = vmatprep.subr.bf16.mxu0 %v5179_v6  ;;  %3660 = vmatprep.subr.bf16.mxu1 %v5181_v10  ;;  %v5211_v10 = vcombine.high %v487_v63, %v491_v1  ;;  %v5213_v11 = vcombine.high %v488_v2, %v492_v3 }
  0x7f   :  { %3497 = vmatpush1.bf16.msra.mxu0 %v5178_v8  ;;  %3661 = vmatpush1.bf16.msra.mxu1 %v5180_v9  ;;  %v5204_v8 = vcombine.low %v480_v53, %v484_v54  ;;  %v531_v53 = vld [vmem:[#allocation2 + $0x620] sm:$0xff]  ;;  %v528_v54 = vld [vmem:[#allocation2 + $0x608] sm:$0xff] }
  0x80   :  { %3498 = vmatprep.subr.bf16.mxu0 %v5187_v14  ;;  %3662 = vmatprep.subr.bf16.mxu1 %v5189_v18  ;;  %v496_v14 = vld [vmem:[#allocation2 + $0x508] sm:$0xff]  ;;  %v5219_v18 = vcombine.high %v495_v12, %v499_v13 }
  0x81   :  { %v5221_v19 = vcombine.high %v496_v14, %v500_v15 }
  0x83   :  { %3499 = vmatpush1.bf16.msra.mxu0 %v5186_v16  ;;  %3663 = vmatpush1.bf16.msra.mxu1 %v5188_v17  ;;  %v5210_v16 = vcombine.low %v487_v63, %v491_v1  ;;  %v5212_v17 = vcombine.low %v488_v2, %v492_v3  ;;  %v535_v1 = vld [vmem:[#allocation2 + $0x640] sm:$0xff]  ;;  %v536_v3 = vld [vmem:[#allocation2 + $0x648] sm:$0xff] }
  0x84   :  { %3509 = vmatprep.subr.bf16.mxu0 %v5195_v22  ;;  %3673 = vmatprep.subr.bf16.mxu1 %v5197_v26  ;;  %v504_v22 = vld [vmem:[#allocation2 + $0x548] sm:$0xff]  ;;  %v5227_v26 = vcombine.high %v503_v20, %v507_v21  ;;  %v539_v2 = vld [vmem:[#allocation2 + $0x660] sm:$0xff] }
  0x85   :  { %v5229_v27 = vcombine.high %v504_v22, %v508_v23 }
 0x111   :  { %v189_v38 = vpop.f32.mrb[0].mxu0  ;;  %v6114_v41 = vpop.f32.mrb[0].mxu1 }
 0x112   :  { %v190_v39 = vadd.f32 %v189_v38, %v74_v35  ;;  %v191_v40 = vpop.f32.mrb[1].mxu0  ;;  %v232_v44 = vpop.f32.mrb[1].mxu1  ;;  %v512_v35 = vld [vmem:[#allocation2 + $0x588] sm:$0xff]  ;;  %v5228_v38 = vcombine.low %v504_v22, %v508_v23 }
 0x113   :  { %v192_v42 = vadd.f32 %v191_v40, %v78_v36  ;;  %v193_v43 = vpop.f32.mrb[2].mxu0  ;;  %v233_v47 = vadd.f32 %v232_v44, %v86_v37  ;;  %v234_v48 = vpop.f32.mrb[2].mxu1  ;;  %v516_v36 = vld [vmem:[#allocation2 + $0x5a8] sm:$0xff]  ;;  %v5226_v37 = vcombine.low %v503_v20, %v507_v21  ;;  %v555_v20 = vld [vmem:[#allocation2 + $0x6e0] sm:$0xff] }
 0x114   :  { %vm319_vm1 = vcmp.ge.f32.partialorder %v190_v39, 0.0  ;;  %v327_v45 = vmul.f32 0.01, %v190_v39  ;;  %v194_v46 = vpop.f32.mrb[3].mxu0  ;;  %v235_v56 = vpop.f32.mrb[3].mxu1  ;;  %v5237_v40 = vcombine.high %v512_v35, %v516_v36  ;;  %v523_v43 = vld [vmem:[#allocation2 + $0x5e0] sm:$0xff] }
 0x115   :  { %vm320_vm2 = vcmp.ge.f32.partialorder %v192_v42, 0.0  ;;  %v328_v49 = vmul.f32 0.01, %v192_v42  ;;  %vm322_vm3 = vcmp.ge.f32.partialorder %v233_v47, 0.0  ;;  %v330_v55 = vmul.f32 0.01, %v233_v47 }
 0x116   :  { %v335_v52 = vsel %vm319_vm1, %v190_v39, %v327_v45  ;;  %v5235_v39 = vcombine.high %v511_v29, %v515_v30  ;;  %v520_v44 = vld [vmem:[#allocation2 + $0x5c8] sm:$0xff]  ;;  %v5234_v46 = vcombine.low %v511_v29, %v515_v30  ;;  %v563_v29 = vld [vmem:[#allocation2 + $0x720] sm:$0xff]  ;;  %vm6029_vm1 = vmmov 0  }
 0x117   :  { %v336_v57 = vsel %vm320_vm2, %v192_v42, %v328_v49  ;;  %v338_v59 = vsel %vm322_vm3, %v233_v47, %v330_v55  ;;  %v6118_v60 = vpack.c.bf16 %v335_v52, %v335_v52  ;;  %v519_v42 = vld [vmem:[#allocation2 + $0x5c0] sm:$0xff]  ;;  %v524_v45 = vld [vmem:[#allocation2 + $0x5e8] sm:$0xff]  ;;  %v5236_v47 = vcombine.low %v512_v35, %v516_v36 }
 0x118   :  { %v6116_v58 = vpack.c.bf16 %v336_v57, %v336_v57  ;;  %v6124_v4 = vpack.c.bf16 %v338_v59, %v338_v59  ;;  %v5243_v49 = vcombine.high %v519_v42, %v523_v43  ;;  %v5245_v50 = vcombine.high %v520_v44, %v524_v45  ;;  %v532_v55 = vld [vmem:[#allocation2 + $0x628] sm:$0xff] }
 0x119   :  { %v6120_v0 = vpop.f32.mrb[4].mxu0  ;;  %v6132_v48 = vpop.f32.mrb[4].mxu1  ;;  %v5242_v59 = vcombine.low %v519_v42, %v523_v43  ;;  %v5253_v63 = vcombine.high %v528_v54, %v532_v55  ;;  %v552_v21 = vld [vmem:[#allocation2 + $0x6c8] sm:$0xff]  ;;  %v571_v42 = vld [vmem:[#allocation2 + $0x760] sm:$0xff] }
 0x11a   :  { %3500 = vmatprep.mubr.bf16.mxu0 %v6116_v58  ;;  %3664 = vmatprep.mubr.bf16.mxu1 %v6116_v58  ;;  %v6126_v5 = vpop.f32.mrb[5].mxu0  ;;  %v6134_v52 = vpop.f32.mrb[5].mxu1  ;;  %v556_v22 = vld [vmem:[#allocation2 + $0x6e8] sm:$0xff] }
 0x11b   :  { %3501 = vmatmul.mubr.bf16.vlgmr.msra.gmra.mrb[8].mxu0 %v6118_v60  ;;  %3665 = vmatmul.mubr.bf16.vlgmr.msra.gmra.mrb[8].mxu1 %v6118_v60  ;;  %v275_v6 = vpop.f32.mrb[6].mxu0  ;;  %v316_v56 = vpop.f32.mrb[6].mxu1  ;;  %v560_v30 = vld [vmem:[#allocation2 + $0x708] sm:$0xff] }
 0x11c   :  { %3510 = vmatpush1.bf16.msra.mxu0 %v5194_v24  ;;  %3674 = vmatpush1.bf16.msra.mxu1 %v5196_v25  ;;  %v276_v9 = vpop.f32.mrb[7].mxu0  ;;  %v5218_v24 = vcombine.low %v495_v12, %v499_v13  ;;  %v5220_v25 = vcombine.low %v496_v14, %v500_v15  ;;  %v317_v57 = vpop.f32.mrb[7].mxu1  ;;  %v540_v6 = vld [vmem:[#allocation2 + $0x668] sm:$0xff]  ;;  %v547_v12 = vld [vmem:[#allocation2 + $0x6a0] sm:$0xff]  ;;  %v5258_v15 = vcombine.low %v535_v1, %v539_v2  ;;  %v93_v56 = vsub.s32 5, %v6098_v28 }
 0x11d   :  { %3511 = vmatprep.subr.bf16.mxu0 %v5203_v61  ;;  %3675 = vmatprep.subr.bf16.mxu1 %v5205_v62  ;;  %v5244_v61 = vcombine.low %v520_v44, %v524_v45  ;;  %v5251_v62 = vcombine.high %v527_v51, %v531_v53  ;;  %v5259_v9 = vcombine.high %v535_v1, %v539_v2  ;;  %v544_v13 = vld [vmem:[#allocation2 + $0x688] sm:$0xff]  ;;  %v587_v2 = vld [vmem:[#allocation2 + $0x7e0] sm:$0xff] }
 0x11e   :  { %3541 = vmatprep.mubr.bf16.mxu0 %v6124_v4  ;;  %3705 = vmatprep.mubr.bf16.mxu1 %v6124_v4  ;;  %v548_v14 = vld [vmem:[#allocation2 + $0x6a8] sm:$0xff] }
 0x11f   :  { %v564_v35 = vld [vmem:[#allocation2 + $0x728] sm:$0xff] }
 0x120   :  { %3512 = vmatpush1.bf16.msra.mxu0 %v5202_v7  ;;  %3676 = vmatpush1.bf16.msra.mxu1 %v5204_v8  ;;  %v5250_v7 = vcombine.low %v527_v51, %v531_v53  ;;  %v5252_v8 = vcombine.low %v528_v54, %v532_v55  ;;  %v568_v43 = vld [vmem:[#allocation2 + $0x748] sm:$0xff]  ;;  %v81_v51 = vsub.s32 2, %v6098_v28  ;;  %v579_v53 = vld [vmem:[#allocation2 + $0x7a0] sm:$0xff] }
 0x121   :  { %3513 = vmatprep.subr.bf16.mxu0 %v5211_v10  ;;  %3677 = vmatprep.subr.bf16.mxu1 %v5213_v11  ;;  %v5261_v10 = vcombine.high %v536_v3, %v540_v6  ;;  %v543_v11 = vld [vmem:[#allocation2 + $0x680] sm:$0xff]  ;;  %v572_v44 = vld [vmem:[#allocation2 + $0x768] sm:$0xff] }
 0x122   :  { %v5266_v23 = vcombine.low %v543_v11, %v547_v12  ;;  %v576_v54 = vld [vmem:[#allocation2 + $0x788] sm:$0xff]  ;;  %v82_v1 = vrot.slane %v6100_v31, %v81_v51 }
 0x123   :  { %v580_v55 = vld [vmem:[#allocation2 + $0x7a8] sm:$0xff] }
 0x124   :  { %3514 = vmatpush1.bf16.msra.mxu0 %v5210_v16  ;;  %3678 = vmatpush1.bf16.msra.mxu1 %v5212_v17  ;;  %v5260_v16 = vcombine.low %v536_v3, %v540_v6  ;;  %v5267_v17 = vcombine.high %v543_v11, %v547_v12  ;;  %v584_v3 = vld [vmem:[#allocation2 + $0x7c8] sm:$0xff]  ;;  %v591_v12 = vld [vmem:[#allocation2 + $0x800] sm:$0xff] }
 0x125   :  { %3515 = vmatprep.subr.bf16.mxu0 %v5219_v18  ;;  %3679 = vmatprep.subr.bf16.mxu1 %v5221_v19  ;;  %v5269_v18 = vcombine.high %v544_v13, %v548_v14  ;;  %v551_v19 = vld [vmem:[#allocation2 + $0x6c0] sm:$0xff]  ;;  %v588_v6 = vld [vmem:[#allocation2 + $0x7e8] sm:$0xff] }
 0x126   :  { %v5274_v36 = vcombine.low %v551_v19, %v555_v20  ;;  %v5309_v11 = vcombine.high %v584_v3, %v588_v6 }
 0x128   :  { %3516 = vmatpush1.bf16.msra.mxu0 %v5218_v24  ;;  %3680 = vmatpush1.bf16.msra.mxu1 %v5220_v25  ;;  %v5268_v24 = vcombine.low %v544_v13, %v548_v14  ;;  %v5275_v25 = vcombine.high %v551_v19, %v555_v20  ;;  %v231_v13 = vadd.f32 %v6114_v41, %v82_v1  ;;  %v595_v14 = vld [vmem:[#allocation2 + $0x820] sm:$0xff]  ;;  %v624_v1 = vld [vmem:[#allocation2 + $0x908] sm:$0xff] }
 0x129   :  { %3517 = vmatprep.subr.bf16.mxu0 %v5227_v26  ;;  %3681 = vmatprep.subr.bf16.mxu1 %v5229_v27  ;;  %v5277_v26 = vcombine.high %v552_v21, %v556_v22  ;;  %v559_v27 = vld [vmem:[#allocation2 + $0x700] sm:$0xff]  ;;  %v5308_v19 = vcombine.low %v584_v3, %v588_v6  ;;  %v5315_v20 = vcombine.high %v591_v12, %v595_v14 }
 0x12a   :  { %v5282_v45 = vcombine.low %v559_v27, %v563_v29  ;;  %vm321_vm4 = vcmp.ge.f32.partialorder %v231_v13, 0.0 }
 0x12c   :  { %3518 = vmatpush1.bf16.msra.mxu0 %v5226_v37  ;;  %3682 = vmatpush1.bf16.msra.mxu1 %v5228_v38  ;;  %v5276_v37 = vcombine.low %v552_v21, %v556_v22  ;;  %v5283_v38 = vcombine.high %v559_v27, %v563_v29  ;;  %v599_v22 = vld [vmem:[#allocation2 + $0x840] sm:$0xff]  ;;  %v5314_v27 = vcombine.low %v591_v12, %v595_v14  ;;  %v636_v12 = vld [vmem:[#allocation2 + $0x968] sm:$0xff] }
 0x12d   :  { %3519 = vmatprep.subr.bf16.mxu0 %v5235_v39  ;;  %3683 = vmatprep.subr.bf16.mxu1 %v5237_v40  ;;  %v5285_v39 = vcombine.high %v560_v30, %v564_v35  ;;  %v567_v40 = vld [vmem:[#allocation2 + $0x740] sm:$0xff] }
 0x12e   :  { %v5290_v57 = vcombine.low %v567_v40, %v571_v42 }
 0x130   :  { %3520 = vmatpush1.bf16.msra.mxu0 %v5234_v46  ;;  %3684 = vmatpush1.bf16.msra.mxu1 %v5236_v47  ;;  %v5284_v46 = vcombine.low %v560_v30, %v564_v35  ;;  %v5291_v47 = vcombine.high %v567_v40, %v571_v42  ;;  %v607_v35 = vld [vmem:[#allocation2 + $0x880] sm:$0xff] }
 0x131   :  { %3521 = vmatprep.subr.bf16.mxu0 %v5243_v49  ;;  %3685 = vmatprep.subr.bf16.mxu1 %v5245_v50  ;;  %v5293_v49 = vcombine.high %v568_v43, %v572_v44  ;;  %v575_v50 = vld [vmem:[#allocation2 + $0x780] sm:$0xff] }
 0x134   :  { %3522 = vmatpush1.bf16.msra.mxu0 %v5242_v59  ;;  %3686 = vmatpush1.bf16.msra.mxu1 %v5244_v61  ;;  %v5292_v59 = vcombine.low %v568_v43, %v572_v44  ;;  %v5299_v61 = vcombine.high %v575_v50, %v579_v53 }
 0x135   :  { %3523 = vmatprep.subr.bf16.mxu0 %v5251_v62  ;;  %3687 = vmatprep.subr.bf16.mxu1 %v5253_v63  ;;  %v5301_v62 = vcombine.high %v576_v54, %v580_v55  ;;  %v583_v63 = vld [vmem:[#allocation2 + $0x7c0] sm:$0xff] }
 0x138   :  { %3524 = vmatpush1.bf16.msra.mxu0 %v5250_v7  ;;  %3688 = vmatpush1.bf16.msra.mxu1 %v5252_v8  ;;  %v94_v7 = vrot.slane %v6100_v31, %v93_v56  ;;  %v5298_v8 = vcombine.low %v575_v50, %v579_v53  ;;  %v616_v50 = vld [vmem:[#allocation2 + $0x8c8] sm:$0xff] }
 0x139   :  { %3525 = vmatprep.subr.bf16.mxu0 %v5259_v9  ;;  %3689 = vmatprep.subr.bf16.mxu1 %v5261_v10  ;;  %v5300_v9 = vcombine.low %v576_v54, %v580_v55  ;;  %v5307_v10 = vcombine.high %v583_v63, %v587_v2  ;;  %v620_v53 = vld [vmem:[#allocation2 + $0x8e8] sm:$0xff] }
 0x13a   :  { %v5340_v6 = vcombine.low %v616_v50, %v620_v53 }
 0x13c   :  { %3526 = vmatpush1.bf16.msra.mxu0 %v5258_v15  ;;  %3690 = vmatpush1.bf16.msra.mxu1 %v5260_v16  ;;  %v592_v15 = vld [vmem:[#allocation2 + $0x808] sm:$0xff] }
 0x13d   :  { %3527 = vmatprep.subr.bf16.mxu0 %v5267_v17  ;;  %3691 = vmatprep.subr.bf16.mxu1 %v5269_v18  ;;  %v596_v16 = vld [vmem:[#allocation2 + $0x828] sm:$0xff]  ;;  %v274_v17 = vadd.f32 %v6126_v5, %v94_v7  ;;  %v5306_v18 = vcombine.low %v583_v63, %v587_v2  ;;  %v627_v63 = vld [vmem:[#allocation2 + $0x920] sm:$0xff] }
 0x13e   :  { %v5317_v21 = vcombine.high %v592_v15, %v596_v16  ;;  %v5316_v29 = vcombine.low %v592_v15, %v596_v16  ;;  %v628_v2 = vld [vmem:[#allocation2 + $0x928] sm:$0xff] }
 0x13f   :  { %v332_v41 = vmul.f32 0.01, %v274_v17  ;;  %vm324_vm5 = vcmp.ge.f32.partialorder %v274_v17, 0.0  ;;  %v5348_v14 = vcombine.low %v624_v1, %v628_v2 }
 0x140   :  { %3528 = vmatpush1.bf16.msra.mxu0 %v5266_v23  ;;  %3692 = vmatpush1.bf16.msra.mxu1 %v5268_v24  ;;  %v329_v23 = vmul.f32 0.01, %v231_v13  ;;  %v603_v24 = vld [vmem:[#allocation2 + $0x860] sm:$0xff] }
 0x141   :  { %3529 = vmatprep.subr.bf16.mxu0 %v5275_v25  ;;  %3693 = vmatprep.subr.bf16.mxu1 %v5277_v26  ;;  %v600_v25 = vld [vmem:[#allocation2 + $0x848] sm:$0xff]  ;;  %v5323_v5 = vcombine.high %v599_v22, %v603_v24  ;;  %v340_v40 = vsel %vm324_vm5, %v274_v17, %v332_v41  ;;  %v5322_v42 = vcombine.low %v599_v22, %v603_v24  ;;  %v639_v17 = vld [vmem:[#allocation2 + $0x980] sm:$0xff] }
 0x142   :  { %v604_v26 = vld [vmem:[#allocation2 + $0x868] sm:$0xff]  ;;  %v6148_v54 = vpack.c.bf16 %v340_v40, %v340_v40 }
 0x143   :  { %v5325_v30 = vcombine.high %v600_v25, %v604_v26  ;;  %v5324_v43 = vcombine.low %v600_v25, %v604_v26  ;;  %v647_v25 = vld [vmem:[#allocation2 + $0x9c0] sm:$0xff]  ;;  %v648_v41 = vld [vmem:[#allocation2 + $0x9c8] sm:$0xff] }
 0x144   :  { %3530 = vmatpush1.bf16.msra.mxu0 %v5274_v36  ;;  %3694 = vmatpush1.bf16.msra.mxu1 %v5276_v37  ;;  %v337_v36 = vsel %vm321_vm4, %v231_v13, %v329_v23  ;;  %v611_v37 = vld [vmem:[#allocation2 + $0x8a0] sm:$0xff] }
 0x145   :  { %3531 = vmatprep.subr.bf16.mxu0 %v5283_v38  ;;  %3695 = vmatprep.subr.bf16.mxu1 %v5285_v39  ;;  %v608_v38 = vld [vmem:[#allocation2 + $0x888] sm:$0xff]  ;;  %v6146_v44 = vpack.c.bf16 %v337_v36, %v337_v36  ;;  %v5330_v55 = vcombine.low %v607_v35, %v611_v37  ;;  %v651_v26 = vld [vmem:[#allocation2 + $0x9e0] sm:$0xff] }
 0x146   :  { %v612_v39 = vld [vmem:[#allocation2 + $0x8a8] sm:$0xff]  ;;  %v655_v36 = vld [vmem:[#allocation2 + $0xa00] sm:$0xff]  ;;  %v5370_v40 = vcombine.low %v647_v25, %v651_v26 }
 0x148   :  { %3532 = vmatpush1.bf16.msra.mxu0 %v5282_v45  ;;  %3696 = vmatpush1.bf16.msra.mxu1 %v5284_v46  ;;  %v5331_v45 = vcombine.high %v607_v35, %v611_v37  ;;  %v5333_v46 = vcombine.high %v608_v38, %v612_v39  ;;  %v659_v37 = vld [vmem:[#allocation2 + $0xa20] sm:$0xff] }
 0x149   :  { %3533 = vmatprep.subr.bf16.mxu0 %v5291_v47  ;;  %3697 = vmatprep.subr.bf16.mxu1 %v5293_v49  ;;  %v615_v47 = vld [vmem:[#allocation2 + $0x8c0] sm:$0xff] }
 0x14a   :  { %v619_v49 = vld [vmem:[#allocation2 + $0x8e0] sm:$0xff] }
 0x14b   :  { %v5338_v3 = vcombine.low %v615_v47, %v619_v49 }
 0x14c   :  { %3534 = vmatpush1.bf16.msra.mxu0 %v5290_v57  ;;  %3698 = vmatpush1.bf16.msra.mxu1 %v5292_v59  ;;  %v5332_v57 = vcombine.low %v608_v38, %v612_v39  ;;  %v5339_v59 = vcombine.high %v615_v47, %v619_v49  ;;  %v656_v38 = vld [vmem:[#allocation2 + $0xa08] sm:$0xff]  ;;  %v667_v47 = vld [vmem:[#allocation2 + $0xa60] sm:$0xff] }
 0x14d   :  { %3535 = vmatprep.subr.bf16.mxu0 %v5299_v61  ;;  %3699 = vmatprep.subr.bf16.mxu1 %v5301_v62  ;;  %v5341_v61 = vcombine.high %v616_v50, %v620_v53  ;;  %v623_v62 = vld [vmem:[#allocation2 + $0x900] sm:$0xff]  ;;  %v660_v39 = vld [vmem:[#allocation2 + $0xa28] sm:$0xff]  ;;  %v5378_v53 = vcombine.low %v655_v36, %v659_v37 }
 0x14e   :  { %v5347_v7 = vcombine.high %v623_v62, %v627_v63  ;;  %v5346_v13 = vcombine.low %v623_v62, %v627_v63  ;;  %v664_v49 = vld [vmem:[#allocation2 + $0xa48] sm:$0xff]  ;;  %v675_v62 = vld [vmem:[#allocation2 + $0xaa0] sm:$0xff] }
 0x14f   :  { %v668_v50 = vld [vmem:[#allocation2 + $0xa68] sm:$0xff] }
 0x150   :  { %3536 = vmatpush1.bf16.msra.mxu0 %v5298_v8  ;;  %3700 = vmatpush1.bf16.msra.mxu1 %v5300_v9  ;;  %v5349_v8 = vcombine.high %v624_v1, %v628_v2  ;;  %v631_v9 = vld [vmem:[#allocation2 + $0x940] sm:$0xff]  ;;  %v672_v63 = vld [vmem:[#allocation2 + $0xa88] sm:$0xff] }
 0x151   :  { %3537 = vmatprep.subr.bf16.mxu0 %v5307_v10  ;;  %3701 = vmatprep.subr.bf16.mxu1 %v5309_v11  ;;  %v635_v10 = vld [vmem:[#allocation2 + $0x960] sm:$0xff]  ;;  %v632_v11 = vld [vmem:[#allocation2 + $0x948] sm:$0xff] }
 0x152   :  { %v5355_v15 = vcombine.high %v631_v9, %v635_v10  ;;  %v5357_v16 = vcombine.high %v632_v11, %v636_v12  ;;  %v5356_v22 = vcombine.low %v632_v11, %v636_v12  ;;  %v676_v1 = vld [vmem:[#allocation2 + $0xaa8] sm:$0xff] }
 0x153   :  { %v684_v11 = vld [vmem:[#allocation2 + $0xae8] sm:$0xff] }
 0x154   :  { %3538 = vmatpush1.bf16.msra.mxu0 %v5306_v18  ;;  %3702 = vmatpush1.bf16.msra.mxu1 %v5308_v19  ;;  %v643_v18 = vld [vmem:[#allocation2 + $0x9a0] sm:$0xff]  ;;  %v640_v19 = vld [vmem:[#allocation2 + $0x988] sm:$0xff] }
 0x155   :  { %3539 = vmatprep.subr.bf16.mxu0 %v5315_v20  ;;  %3703 = vmatprep.subr.bf16.mxu1 %v5317_v21  ;;  %v644_v20 = vld [vmem:[#allocation2 + $0x9a8] sm:$0xff]  ;;  %v5354_v21 = vcombine.low %v631_v9, %v635_v10  ;;  %v5363_v23 = vcombine.high %v639_v17, %v643_v18  ;;  %v683_v9 = vld [vmem:[#allocation2 + $0xae0] sm:$0xff] }
 0x156   :  { %v5365_v24 = vcombine.high %v640_v19, %v644_v20  ;;  %v680_v10 = vld [vmem:[#allocation2 + $0xac8] sm:$0xff] }
 0x158   :  { %3540 = vmatpush1.bf16.msra.mxu0 %v5314_v27  ;;  %3704 = vmatpush1.bf16.msra.mxu1 %v5316_v29  ;;  %v652_v27 = vld [vmem:[#allocation2 + $0x9e8] sm:$0xff]  ;;  %v5362_v29 = vcombine.low %v639_v17, %v643_v18  ;;  %v691_v17 = vld [vmem:[#allocation2 + $0xb20] sm:$0xff] }
 0x159   :  { %3550 = vmatprep.subr.bf16.mxu0 %v5323_v5  ;;  %3714 = vmatprep.subr.bf16.mxu1 %v5325_v30  ;;  %v5364_v5 = vcombine.low %v640_v19, %v644_v20  ;;  %v5371_v30 = vcombine.high %v647_v25, %v651_v26  ;;  %v5373_v35 = vcombine.high %v648_v41, %v652_v27  ;;  %v688_v18 = vld [vmem:[#allocation2 + $0xb08] sm:$0xff]  ;;  %v699_v25 = vld [vmem:[#allocation2 + $0xb60] sm:$0xff] }
 0x15a   :  { %v692_v19 = vld [vmem:[#allocation2 + $0xb28] sm:$0xff] }
 0x15b   :  { %3542 = vmatmul.mubr.bf16.vlgmr.msra.gmra.mrb[8].mxu0 %v6146_v44  ;;  %3706 = vmatmul.mubr.bf16.vlgmr.msra.gmra.mrb[8].mxu1 %v6146_v44  ;;  %v696_v26 = vld [vmem:[#allocation2 + $0xb48] sm:$0xff] }
 0x15c   :  { %3551 = vmatpush1.bf16.msra.mxu0 %v5322_v42  ;;  %3715 = vmatpush1.bf16.msra.mxu1 %v5324_v43  ;;  %v5372_v42 = vcombine.low %v648_v41, %v652_v27  ;;  %v5379_v43 = vcombine.high %v655_v36, %v659_v37  ;;  %v700_v41 = vld [vmem:[#allocation2 + $0xb68] sm:$0xff]  ;;  %v89_v36 = vsub.s32 4, %v6098_v28  ;;  %v707_v37 = vld [vmem:[#allocation2 + $0xba0] sm:$0xff] }
 0x15d   :  { %3552 = vmatprep.subr.bf16.mxu0 %v5331_v45  ;;  %3716 = vmatprep.subr.bf16.mxu1 %v5333_v46  ;;  %v5381_v45 = vcombine.high %v656_v38, %v660_v39  ;;  %v663_v46 = vld [vmem:[#allocation2 + $0xa40] sm:$0xff] }
 0x15e   :  { %3582 = vmatprep.mubr.bf16.mxu0 %v6148_v54  ;;  %3746 = vmatprep.mubr.bf16.mxu1 %v6148_v54  ;;  %v5386_v2 = vcombine.low %v663_v46, %v667_v47 }
 0x160   :  { %3553 = vmatpush1.bf16.msra.mxu0 %v5330_v55  ;;  %3717 = vmatpush1.bf16.msra.mxu1 %v5332_v57  ;;  %v5380_v55 = vcombine.low %v656_v38, %v660_v39  ;;  %v5387_v57 = vcombine.high %v663_v46, %v667_v47  ;;  %v704_v38 = vld [vmem:[#allocation2 + $0xb88] sm:$0xff]  ;;  %v711_v47 = vld [vmem:[#allocation2 + $0xbc0] sm:$0xff] }
 0x161   :  { %3554 = vmatprep.subr.bf16.mxu0 %v5339_v59  ;;  %3718 = vmatprep.subr.bf16.mxu1 %v5341_v61  ;;  %v5389_v59 = vcombine.high %v664_v49, %v668_v50  ;;  %v671_v61 = vld [vmem:[#allocation2 + $0xa80] sm:$0xff]  ;;  %v708_v39 = vld [vmem:[#allocation2 + $0xba8] sm:$0xff] }
 0x162   :  { %v5394_v12 = vcombine.low %v671_v61, %v675_v62  ;;  %v5429_v46 = vcombine.high %v704_v38, %v708_v39 }
 0x164   :  { %3555 = vmatpush1.bf16.msra.mxu0 %v5338_v3  ;;  %3719 = vmatpush1.bf16.msra.mxu1 %v5340_v6  ;;  %v5388_v3 = vcombine.low %v664_v49, %v668_v50  ;;  %v5395_v6 = vcombine.high %v671_v61, %v675_v62  ;;  %v90_v49 = vrot.slane %v6100_v31, %v89_v36  ;;  %v715_v50 = vld [vmem:[#allocation2 + $0xbe0] sm:$0xff] }
 0x165   :  { %3556 = vmatprep.subr.bf16.mxu0 %v5347_v7  ;;  %3720 = vmatprep.subr.bf16.mxu1 %v5349_v8  ;;  %v5397_v7 = vcombine.high %v672_v63, %v676_v1  ;;  %v679_v8 = vld [vmem:[#allocation2 + $0xac0] sm:$0xff]  ;;  %v5428_v61 = vcombine.low %v704_v38, %v708_v39  ;;  %v5435_v62 = vcombine.high %v711_v47, %v715_v50  ;;  %v744_v38 = vld [vmem:[#allocation2 + $0xcc8] sm:$0xff] }
 0x166   :  { %v5402_v20 = vcombine.low %v679_v8, %v683_v9  ;;  %v748_v39 = vld [vmem:[#allocation2 + $0xce8] sm:$0xff] }
 0x168   :  { %3557 = vmatpush1.bf16.msra.mxu0 %v5346_v13  ;;  %3721 = vmatpush1.bf16.msra.mxu1 %v5348_v14  ;;  %v5396_v13 = vcombine.low %v672_v63, %v676_v1  ;;  %v5403_v14 = vcombine.high %v679_v8, %v683_v9  ;;  %v719_v1 = vld [vmem:[#allocation2 + $0xc00] sm:$0xff]  ;;  %v5434_v9 = vcombine.low %v711_v47, %v715_v50 }
 0x169   :  { %3558 = vmatprep.subr.bf16.mxu0 %v5355_v15  ;;  %3722 = vmatprep.subr.bf16.mxu1 %v5357_v16  ;;  %v5405_v15 = vcombine.high %v680_v10, %v684_v11  ;;  %v687_v16 = vld [vmem:[#allocation2 + $0xb00] sm:$0xff]  ;;  %v5469_v47 = vcombine.high %v744_v38, %v748_v39 }
 0x16a   :  { %v5410_v27 = vcombine.low %v687_v16, %v691_v17  ;;  %v755_v50 = vld [vmem:[#allocation2 + $0xd20] sm:$0xff] }
 0x16c   :  { %3559 = vmatpush1.bf16.msra.mxu0 %v5354_v21  ;;  %3723 = vmatpush1.bf16.msra.mxu1 %v5356_v22  ;;  %v5404_v21 = vcombine.low %v680_v10, %v684_v11  ;;  %v5411_v22 = vcombine.high %v687_v16, %v691_v17  ;;  %v728_v16 = vld [vmem:[#allocation2 + $0xc48] sm:$0xff] }
 0x16d   :  { %3560 = vmatprep.subr.bf16.mxu0 %v5363_v23  ;;  %3724 = vmatprep.subr.bf16.mxu1 %v5365_v24  ;;  %v5413_v23 = vcombine.high %v688_v18, %v692_v19  ;;  %v695_v24 = vld [vmem:[#allocation2 + $0xb40] sm:$0xff]  ;;  %v732_v17 = vld [vmem:[#allocation2 + $0xc68] sm:$0xff] }
 0x170   :  { %3561 = vmatpush1.bf16.msra.mxu0 %v5362_v29  ;;  %3725 = vmatpush1.bf16.msra.mxu1 %v5364_v5  ;;  %v5412_v29 = vcombine.low %v688_v18, %v692_v19  ;;  %v5419_v5 = vcombine.high %v695_v24, %v699_v25 }
 0x171   :  { %3562 = vmatprep.subr.bf16.mxu0 %v5371_v30  ;;  %3726 = vmatprep.subr.bf16.mxu1 %v5373_v35  ;;  %v5421_v30 = vcombine.high %v696_v26, %v700_v41  ;;  %v703_v35 = vld [vmem:[#allocation2 + $0xb80] sm:$0xff] }
 0x174   :  { %3563 = vmatpush1.bf16.msra.mxu0 %v5370_v40  ;;  %3727 = vmatpush1.bf16.msra.mxu1 %v5372_v42  ;;  %v101_v40 = vsub.s32 7, %v6098_v28  ;;  %v5418_v42 = vcombine.low %v695_v24, %v699_v25  ;;  %v736_v24 = vld [vmem:[#allocation2 + $0xc88] sm:$0xff] }
 0x175   :  { %3564 = vmatprep.subr.bf16.mxu0 %v5379_v43  ;;  %3728 = vmatprep.subr.bf16.mxu1 %v5381_v45  ;;  %v5420_v43 = vcombine.low %v696_v26, %v700_v41  ;;  %v5427_v45 = vcombine.high %v703_v35, %v707_v37  ;;  %v740_v25 = vld [vmem:[#allocation2 + $0xca8] sm:$0xff] }
 0x178   :  { %3565 = vmatpush1.bf16.msra.mxu0 %v5378_v53  ;;  %3729 = vmatpush1.bf16.msra.mxu1 %v5380_v55  ;;  %v712_v53 = vld [vmem:[#allocation2 + $0xbc8] sm:$0xff] }
 0x179   :  { %3566 = vmatprep.subr.bf16.mxu0 %v5387_v57  ;;  %3730 = vmatprep.subr.bf16.mxu1 %v5389_v59  ;;  %v716_v55 = vld [vmem:[#allocation2 + $0xbe8] sm:$0xff]  ;;  %v102_v57 = vrot.slane %v6100_v31, %v101_v40  ;;  %v5426_v59 = vcombine.low %v703_v35, %v707_v37  ;;  %v743_v35 = vld [vmem:[#allocation2 + $0xcc0] sm:$0xff] }
 0x17a   :  { %v5437_v63 = vcombine.high %v712_v53, %v716_v55  ;;  %v5436_v10 = vcombine.low %v712_v53, %v716_v55  ;;  %v747_v37 = vld [vmem:[#allocation2 + $0xce0] sm:$0xff]  ;;  %v752_v53 = vld [vmem:[#allocation2 + $0xd08] sm:$0xff] }
 0x17b   :  { %v315_v8 = vadd.f32 %v6134_v52, %v102_v57  ;;  %v756_v55 = vld [vmem:[#allocation2 + $0xd28] sm:$0xff]  ;;  %v5466_v57 = vcombine.low %v743_v35, %v747_v37 }
 0x17c   :  { %3567 = vmatpush1.bf16.msra.mxu0 %v5386_v2  ;;  %3731 = vmatpush1.bf16.msra.mxu1 %v5388_v3  ;;  %v272_v2 = vadd.f32 %v6120_v0, %v90_v49  ;;  %v723_v3 = vld [vmem:[#allocation2 + $0xc20] sm:$0xff] }
 0x17d   :  { %3568 = vmatprep.subr.bf16.mxu0 %v5395_v6  ;;  %3732 = vmatprep.subr.bf16.mxu1 %v5397_v7  ;;  %v720_v6 = vld [vmem:[#allocation2 + $0xc08] sm:$0xff]  ;;  %v5443_v11 = vcombine.high %v719_v1, %v723_v3  ;;  %v334_v0 = vmul.f32 0.01, %v315_v8  ;;  %v5442_v18 = vcombine.low %v719_v1, %v723_v3  ;;  %vm326_vm7 = vcmp.ge.f32.partialorder %v315_v8, 0.0  ;;  %v751_v49 = vld [vmem:[#allocation2 + $0xd00] sm:$0xff] }
 0x17e   :  { %v724_v7 = vld [vmem:[#allocation2 + $0xc28] sm:$0xff]  ;;  %vm323_vm6 = vcmp.ge.f32.partialorder %v272_v2, 0.0  ;;  %v763_v1 = vld [vmem:[#allocation2 + $0xd60] sm:$0xff] }
 0x17f   :  { %v5444_v19 = vcombine.low %v720_v6, %v724_v7  ;;  %v342_v26 = vsel %vm326_vm7, %v315_v8, %v334_v0  ;;  %v764_v3 = vld [vmem:[#allocation2 + $0xd68] sm:$0xff]  ;;  %v775_v0 = vld [vmem:[#allocation2 + $0xdc0] sm:$0xff] }
 0x180   :  { %3569 = vmatpush1.bf16.msra.mxu0 %v5394_v12  ;;  %3733 = vmatpush1.bf16.msra.mxu1 %v5396_v13  ;;  %v5445_v12 = vcombine.high %v720_v6, %v724_v7  ;;  %v727_v13 = vld [vmem:[#allocation2 + $0xc40] sm:$0xff]  ;;  %v5474_v6 = vcombine.low %v751_v49, %v755_v50  ;;  %v5476_v7 = vcombine.low %v752_v53, %v756_v55 }
 0x181   :  { %3570 = vmatprep.subr.bf16.mxu0 %v5403_v14  ;;  %3734 = vmatprep.subr.bf16.mxu1 %v5405_v15  ;;  %v331_v14 = vmul.f32 0.01, %v272_v2  ;;  %v731_v15 = vld [vmem:[#allocation2 + $0xc60] sm:$0xff] }
 0x182   :  { %v5451_v52 = vcombine.high %v727_v13, %v731_v15  ;;  %v5450_v41 = vcombine.low %v727_v13, %v731_v15  ;;  %v772_v13 = vld [vmem:[#allocation2 + $0xda8] sm:$0xff] }
 0x184   :  { %3571 = vmatpush1.bf16.msra.mxu0 %v5402_v20  ;;  %3735 = vmatpush1.bf16.msra.mxu1 %v5404_v21  ;;  %v5453_v20 = vcombine.high %v728_v16, %v732_v17  ;;  %v735_v21 = vld [vmem:[#allocation2 + $0xc80] sm:$0xff] }
 0x185   :  { %3572 = vmatprep.subr.bf16.mxu0 %v5411_v22  ;;  %3736 = vmatprep.subr.bf16.mxu1 %v5413_v23  ;;  %v339_v22 = vsel %vm323_vm6, %v272_v2, %v331_v14  ;;  %v739_v23 = vld [vmem:[#allocation2 + $0xca0] sm:$0xff]  ;;  %v760_v2 = vld [vmem:[#allocation2 + $0xd48] sm:$0xff] }
 0x186   :  { %v5484_v15 = vcombine.low %v760_v2, %v764_v3 }
 0x188   :  { %3573 = vmatpush1.bf16.msra.mxu0 %v5410_v27  ;;  %3737 = vmatpush1.bf16.msra.mxu1 %v5412_v29  ;;  %v5452_v27 = vcombine.low %v728_v16, %v732_v17  ;;  %v6164_v29 = vpack.c.bf16 %v339_v22, %v339_v22 }
 0x189   :  { %3574 = vmatprep.subr.bf16.mxu0 %v5419_v5  ;;  %3738 = vmatprep.subr.bf16.mxu1 %v5421_v30  ;;  %v5459_v5 = vcombine.high %v735_v21, %v739_v23  ;;  %v5461_v30 = vcombine.high %v736_v24, %v740_v25 }
 0x18c   :  { %3575 = vmatpush1.bf16.msra.mxu0 %v5418_v42  ;;  %3739 = vmatpush1.bf16.msra.mxu1 %v5420_v43  ;;  %v6166_v42 = vpack.c.bf16 %v342_v26, %v342_v26  ;;  %v5458_v43 = vcombine.low %v735_v21, %v739_v23  ;;  %v784_v26 = vld [vmem:[#allocation2 + $0xe08] sm:$0xff] }
 0x18d   :  { %3576 = vmatprep.subr.bf16.mxu0 %v5427_v45  ;;  %3740 = vmatprep.subr.bf16.mxu1 %v5429_v46  ;;  %v5460_v45 = vcombine.low %v736_v24, %v740_v25  ;;  %v5467_v46 = vcombine.high %v743_v35, %v747_v37  ;;  %v783_v24 = vld [vmem:[#allocation2 + $0xe00] sm:$0xff] }
 0x18e   :  { %v787_v25 = vld [vmem:[#allocation2 + $0xe20] sm:$0xff] }
 0x18f   :  { %v791_v37 = vld [vmem:[#allocation2 + $0xe40] sm:$0xff] }
 0x190   :  { %3577 = vmatpush1.bf16.msra.mxu0 %v5426_v59  ;;  %3741 = vmatpush1.bf16.msra.mxu1 %v5428_v61  ;;  %v5468_v59 = vcombine.low %v744_v38, %v748_v39  ;;  %v5475_v61 = vcombine.high %v751_v49, %v755_v50  ;;  %v795_v38 = vld [vmem:[#allocation2 + $0xe60] sm:$0xff]  ;;  %v792_v39 = vld [vmem:[#allocation2 + $0xe48] sm:$0xff] }
 0x191   :  { %3578 = vmatprep.subr.bf16.mxu0 %v5435_v62  ;;  %3742 = vmatprep.subr.bf16.mxu1 %v5437_v63  ;;  %v5477_v62 = vcombine.high %v752_v53, %v756_v55  ;;  %v759_v63 = vld [vmem:[#allocation2 + $0xd40] sm:$0xff]  ;;  %v800_v55 = vld [vmem:[#allocation2 + $0xe88] sm:$0xff] }
 0x192   :  { %v5483_v8 = vcombine.high %v759_v63, %v763_v1  ;;  %v5482_v14 = vcombine.low %v759_v63, %v763_v1  ;;  %v799_v50 = vld [vmem:[#allocation2 + $0xe80] sm:$0xff] }
 0x193   :  { %v803_v53 = vld [vmem:[#allocation2 + $0xea0] sm:$0xff] }
 0x194   :  { %3579 = vmatpush1.bf16.msra.mxu0 %v5434_v9  ;;  %3743 = vmatpush1.bf16.msra.mxu1 %v5436_v10  ;;  %v5485_v9 = vcombine.high %v760_v2, %v764_v3  ;;  %v767_v10 = vld [vmem:[#allocation2 + $0xd80] sm:$0xff]  ;;  %v808_v3 = vld [vmem:[#allocation2 + $0xec8] sm:$0xff] }
 0x195   :  { %3580 = vmatprep.subr.bf16.mxu0 %v5443_v11  ;;  %3744 = vmatprep.subr.bf16.mxu1 %v5445_v12  ;;  %v771_v11 = vld [vmem:[#allocation2 + $0xda0] sm:$0xff]  ;;  %v768_v12 = vld [vmem:[#allocation2 + $0xd88] sm:$0xff] }
 0x196   :  { %v5491_v16 = vcombine.high %v767_v10, %v771_v11  ;;  %v5493_v17 = vcombine.high %v768_v12, %v772_v13  ;;  %v5492_v21 = vcombine.low %v768_v12, %v772_v13  ;;  %v807_v1 = vld [vmem:[#allocation2 + $0xec0] sm:$0xff]  ;;  %v816_v13 = vld [vmem:[#allocation2 + $0xf08] sm:$0xff] }
 0x197   :  { %v811_v2 = vld [vmem:[#allocation2 + $0xee0] sm:$0xff] }
 0x198   :  { %3581 = vmatpush1.bf16.msra.mxu0 %v5442_v18  ;;  %3745 = vmatpush1.bf16.msra.mxu1 %v5444_v19  ;;  %v779_v18 = vld [vmem:[#allocation2 + $0xde0] sm:$0xff]  ;;  %v776_v19 = vld [vmem:[#allocation2 + $0xdc8] sm:$0xff] }
 0x199   :  { %3591 = vmatprep.subr.bf16.mxu0 %v5451_v52  ;;  %3755 = vmatprep.subr.bf16.mxu1 %v5453_v20  ;;  %v780_v52 = vld [vmem:[#allocation2 + $0xde8] sm:$0xff]  ;;  %v5490_v20 = vcombine.low %v767_v10, %v771_v11  ;;  %v5499_v22 = vcombine.high %v775_v0, %v779_v18  ;;  %v815_v11 = vld [vmem:[#allocation2 + $0xf00] sm:$0xff] }
 0x19a   :  { %v5501_v23 = vcombine.high %v776_v19, %v780_v52  ;;  %v819_v12 = vld [vmem:[#allocation2 + $0xf20] sm:$0xff] }
 0x19b   :  { %3583 = vmatmul.mubr.bf16.vlgmr.msra.gmra.mrb[8].mxu0 %v6164_v29  ;;  %3747 = vmatmul.mubr.bf16.vlgmr.msra.gmra.mrb[8].mxu1 %v6164_v29 }
 0x19c   :  { %3592 = vmatpush1.bf16.msra.mxu0 %v5450_v41  ;;  %3756 = vmatpush1.bf16.msra.mxu1 %v5452_v27  ;;  %v788_v41 = vld [vmem:[#allocation2 + $0xe28] sm:$0xff]  ;;  %v5498_v27 = vcombine.low %v775_v0, %v779_v18  ;;  %v823_v18 = vld [vmem:[#allocation2 + $0xf40] sm:$0xff] }
 0x19d   :  { %3593 = vmatprep.subr.bf16.mxu0 %v5459_v5  ;;  %3757 = vmatprep.subr.bf16.mxu1 %v5461_v30  ;;  %v5500_v5 = vcombine.low %v776_v19, %v780_v52  ;;  %v5507_v30 = vcombine.high %v783_v24, %v787_v25  ;;  %v5509_v35 = vcombine.high %v784_v26, %v788_v41  ;;  %v827_v19 = vld [vmem:[#allocation2 + $0xf60] sm:$0xff]  ;;  %v824_v52 = vld [vmem:[#allocation2 + $0xf48] sm:$0xff] }
 0x19e   :  { %3623 = vmatprep.mubr.bf16.mxu0 %v6166_v42  ;;  %3787 = vmatprep.mubr.bf16.mxu1 %v6166_v42 }
 0x1a0   :  { %3594 = vmatpush1.bf16.msra.mxu0 %v5458_v43  ;;  %3758 = vmatpush1.bf16.msra.mxu1 %v5460_v45  ;;  %v796_v43 = vld [vmem:[#allocation2 + $0xe68] sm:$0xff]  ;;  %v5506_v45 = vcombine.low %v783_v24, %v787_v25  ;;  %v831_v25 = vld [vmem:[#allocation2 + $0xf80] sm:$0xff] }
 0x1a1   :  { %3595 = vmatprep.subr.bf16.mxu0 %v5467_v46  ;;  %3759 = vmatprep.subr.bf16.mxu1 %v5469_v47  ;;  %v5508_v46 = vcombine.low %v784_v26, %v788_v41  ;;  %v5515_v47 = vcombine.high %v791_v37, %v795_v38  ;;  %v5517_v49 = vcombine.high %v792_v39, %v796_v43  ;;  %v97_v26 = vsub.s32 6, %v6098_v28  ;;  %v835_v41 = vld [vmem:[#allocation2 + $0xfa0] sm:$0xff] }
 0x1a4   :  { %3596 = vmatpush1.bf16.msra.mxu0 %v5466_v57  ;;  %3760 = vmatpush1.bf16.msra.mxu1 %v5468_v59  ;;  %v804_v57 = vld [vmem:[#allocation2 + $0xea8] sm:$0xff]  ;;  %v5514_v59 = vcombine.low %v791_v37, %v795_v38  ;;  %v5555_v37 = vcombine.high %v831_v25, %v835_v41 }
 0x1a5   :  { %3597 = vmatprep.subr.bf16.mxu0 %v5475_v61  ;;  %3761 = vmatprep.subr.bf16.mxu1 %v5477_v62  ;;  %v5516_v61 = vcombine.low %v792_v39, %v796_v43  ;;  %v5523_v62 = vcombine.high %v799_v50, %v803_v53  ;;  %v5525_v63 = vcombine.high %v800_v55, %v804_v57  ;;  %v839_v39 = vld [vmem:[#allocation2 + $0xfc0] sm:$0xff] }
 0x1a6   :  { %v98_v43 = vrot.slane %v6100_v31, %v97_v26 }
 0x1a8   :  { %3598 = vmatpush1.bf16.msra.mxu0 %v5474_v6  ;;  %3762 = vmatpush1.bf16.msra.mxu1 %v5476_v7  ;;  %v812_v6 = vld [vmem:[#allocation2 + $0xee8] sm:$0xff]  ;;  %v5522_v7 = vcombine.low %v799_v50, %v803_v53 }
 0x1a9   :  { %3599 = vmatprep.subr.bf16.mxu0 %v5483_v8  ;;  %3763 = vmatprep.subr.bf16.mxu1 %v5485_v9  ;;  %v5524_v8 = vcombine.low %v800_v55, %v804_v57  ;;  %v5531_v9 = vcombine.high %v807_v1, %v811_v2  ;;  %v5533_v10 = vcombine.high %v808_v3, %v812_v6  ;;  %v847_v57 = vld [vmem:[#allocation2 + $0x1000] sm:$0xff] }
 0x1ac   :  { %3600 = vmatpush1.bf16.msra.mxu0 %v5482_v14  ;;  %3764 = vmatpush1.bf16.msra.mxu1 %v5484_v15  ;;  %v820_v14 = vld [vmem:[#allocation2 + $0xf28] sm:$0xff]  ;;  %v5530_v15 = vcombine.low %v807_v1, %v811_v2 }
 0x1ad   :  { %3601 = vmatprep.subr.bf16.mxu0 %v5491_v16  ;;  %3765 = vmatprep.subr.bf16.mxu1 %v5493_v17  ;;  %v5532_v16 = vcombine.low %v808_v3, %v812_v6  ;;  %v5539_v17 = vcombine.high %v815_v11, %v819_v12  ;;  %v5541_v0 = vcombine.high %v816_v13, %v820_v14  ;;  %v345_v6 = vld [vmem:[#allocation2 + $0x50] sm:$0xff] }
 0x1b0   :  { %3602 = vmatpush1.bf16.msra.mxu0 %v5490_v20  ;;  %3766 = vmatpush1.bf16.msra.mxu1 %v5492_v21  ;;  %v828_v20 = vld [vmem:[#allocation2 + $0xf68] sm:$0xff]  ;;  %v5538_v21 = vcombine.low %v815_v11, %v819_v12 }
 0x1b1   :  { %3603 = vmatprep.subr.bf16.mxu0 %v5499_v22  ;;  %3767 = vmatprep.subr.bf16.mxu1 %v5501_v23  ;;  %v5540_v22 = vcombine.low %v816_v13, %v820_v14  ;;  %v5547_v23 = vcombine.high %v823_v18, %v827_v19  ;;  %v5549_v24 = vcombine.high %v824_v52, %v828_v20 }
 0x1b4   :  { %3604 = vmatpush1.bf16.msra.mxu0 %v5498_v27  ;;  %3768 = vmatpush1.bf16.msra.mxu1 %v5500_v5  ;;  %v832_v27 = vld [vmem:[#allocation2 + $0xf88] sm:$0xff] }
 0x1b5   :  { %3605 = vmatprep.subr.bf16.mxu0 %v5507_v30  ;;  %3769 = vmatprep.subr.bf16.mxu1 %v5509_v35  ;;  %v836_v5 = vld [vmem:[#allocation2 + $0xfa8] sm:$0xff]  ;;  %v5546_v30 = vcombine.low %v823_v18, %v827_v19  ;;  %v5548_v35 = vcombine.low %v824_v52, %v828_v20 }
 0x1b6   :  { %v5557_v38 = vcombine.high %v832_v27, %v836_v5  ;;  %v5556_v50 = vcombine.low %v832_v27, %v836_v5 }
 0x1b8   :  { %3606 = vmatpush1.bf16.msra.mxu0 %v5506_v45  ;;  %3770 = vmatpush1.bf16.msra.mxu1 %v5508_v46  ;;  %v843_v45 = vld [vmem:[#allocation2 + $0xfe0] sm:$0xff]  ;;  %v840_v46 = vld [vmem:[#allocation2 + $0xfc8] sm:$0xff] }
 0x1b9   :  { %3607 = vmatprep.subr.bf16.mxu0 %v5515_v47  ;;  %3771 = vmatprep.subr.bf16.mxu1 %v5517_v49  ;;  %v844_v47 = vld [vmem:[#allocation2 + $0xfe8] sm:$0xff]  ;;  %v5554_v49 = vcombine.low %v831_v25, %v835_v41  ;;  %v5563_v53 = vcombine.high %v839_v39, %v843_v45  ;;  %v5562_v31 = vcombine.low %v839_v39, %v843_v45  ;;  %v366_v25 = vld [vmem:[#allocation2 + $0xf8] sm:$0xff] }
 0x1ba   :  { %v5565_v55 = vcombine.high %v840_v46, %v844_v47  ;;  %v5564_v1 = vcombine.low %v840_v46, %v844_v47  ;;  %v374_v39 = vld [vmem:[#allocation2 + $0x138] sm:$0xff] }
 0x1bc   :  { %3608 = vmatpush1.bf16.msra.mxu0 %v5514_v59  ;;  %3772 = vmatpush1.bf16.msra.mxu1 %v5516_v61  ;;  %v313_v59 = vadd.f32 %v6132_v48, %v98_v43  ;;  %v851_v61 = vld [vmem:[#allocation2 + $0x1020] sm:$0xff] }
 0x1bd   :  { %3609 = vmatprep.subr.bf16.mxu0 %v5523_v62  ;;  %3773 = vmatprep.subr.bf16.mxu1 %v5525_v63  ;;  %v848_v62 = vld [vmem:[#allocation2 + $0x1008] sm:$0xff]  ;;  %v5571_v2 = vcombine.high %v847_v57, %v851_v61  ;;  %v5570_v48 = vcombine.low %v847_v57, %v851_v61 }
 0x1be   :  { %v852_v63 = vld [vmem:[#allocation2 + $0x1028] sm:$0xff]  ;;  %vm325_vm8 = vcmp.ge.f32.partialorder %v313_v59, 0.0 }
 0x1bf   :  { %v5573_v3 = vcombine.high %v848_v62, %v852_v63  ;;  %v5572_v11 = vcombine.low %v848_v62, %v852_v63  ;;  %v385_v62 = vld [vmem:[#allocation2 + $0x190] sm:$0xff] }
 0x1c0   :  { %3610 = vmatpush1.bf16.msra.mxu0 %v5522_v7  ;;  %3774 = vmatpush1.bf16.msra.mxu1 %v5524_v8  ;;  %v333_v7 = vmul.f32 0.01, %v313_v59  ;;  %v349_v8 = vld [vmem:[#allocation2 + $0x70] sm:$0xff] }
 0x1c1   :  { %3611 = vmatprep.subr.bf16.mxu0 %v5531_v9  ;;  %3775 = vmatprep.subr.bf16.mxu1 %v5533_v10  ;;  %v346_v9 = vld [vmem:[#allocation2 + $0x58] sm:$0xff]  ;;  %v5071_v12 = vcombine.high %v345_v6, %v349_v8  ;;  %v5070_v18 = vcombine.low %v345_v6, %v349_v8  ;;  %v389_v63 = vld [vmem:[#allocation2 + $0x1b0] sm:$0xff] }
 0x1c2   :  { %v350_v10 = vld [vmem:[#allocation2 + $0x78] sm:$0xff]  ;;  %v341_v14 = vsel %vm325_vm8, %v313_v59, %v333_v7  ;;  %v5111_v6 = vcombine.high %v385_v62, %v389_v63  ;;  %v393_v8 = vld [vmem:[#allocation2 + $0x1d0] sm:$0xff] }
 0x1c3   :  { %v5073_v13 = vcombine.high %v346_v9, %v350_v10  ;;  %v6177_v19 = vpack.c.bf16 %v341_v14, %v341_v14  ;;  %v5072_v52 = vcombine.low %v346_v9, %v350_v10  ;;  %v397_v9 = vld [vmem:[#allocation2 + $0x1f0] sm:$0xff]  ;;  %v394_v10 = vld [vmem:[#allocation2 + $0x1d8] sm:$0xff] }
 0x1c4   :  { %3612 = vmatpush1.bf16.msra.mxu0 %v5530_v15  ;;  %3776 = vmatpush1.bf16.msra.mxu1 %v5532_v16  ;;  %v353_v15 = vld [vmem:[#allocation2 + $0x90] sm:$0xff] }
 0x1c5   :  { %3613 = vmatprep.subr.bf16.mxu0 %v5539_v17  ;;  %3777 = vmatprep.subr.bf16.mxu1 %v5541_v0  ;;  %v357_v16 = vld [vmem:[#allocation2 + $0xb0] sm:$0xff]  ;;  %v354_v17 = vld [vmem:[#allocation2 + $0x98] sm:$0xff] }
 0x1c6   :  { %v358_v0 = vld [vmem:[#allocation2 + $0xb8] sm:$0xff]  ;;  %v5079_v20 = vcombine.high %v353_v15, %v357_v16  ;;  %v5078_v41 = vcombine.low %v353_v15, %v357_v16  ;;  %v401_v15 = vld [vmem:[#allocation2 + $0x210] sm:$0xff] }
 0x1c7   :  { %v5080_v27 = vcombine.low %v354_v17, %v358_v0  ;;  %v405_v16 = vld [vmem:[#allocation2 + $0x230] sm:$0xff] }
 0x1c8   :  { %3614 = vmatpush1.bf16.msra.mxu0 %v5538_v21  ;;  %3778 = vmatpush1.bf16.msra.mxu1 %v5540_v22  ;;  %v5081_v21 = vcombine.high %v354_v17, %v358_v0  ;;  %v361_v22 = vld [vmem:[#allocation2 + $0xd0] sm:$0xff]  ;;  %v402_v17 = vld [vmem:[#allocation2 + $0x218] sm:$0xff] }
 0x1c9   :  { %3615 = vmatprep.subr.bf16.mxu0 %v5547_v23  ;;  %3779 = vmatprep.subr.bf16.mxu1 %v5549_v24  ;;  %v365_v23 = vld [vmem:[#allocation2 + $0xf0] sm:$0xff]  ;;  %v362_v24 = vld [vmem:[#allocation2 + $0xd8] sm:$0xff] }
 0x1ca   :  { %v5087_v5 = vcombine.high %v361_v22, %v365_v23  ;;  %v5086_v43 = vcombine.low %v361_v22, %v365_v23  ;;  %v5088_v45 = vcombine.low %v362_v24, %v366_v25  ;;  %v406_v0 = vld [vmem:[#allocation2 + $0x238] sm:$0xff]  ;;  %v409_v22 = vld [vmem:[#allocation2 + $0x250] sm:$0xff] }
 0x1cb   :  { %v413_v23 = vld [vmem:[#allocation2 + $0x270] sm:$0xff] }
 0x1cc   :  { %3616 = vmatpush1.bf16.msra.mxu0 %v5546_v30  ;;  %3780 = vmatpush1.bf16.msra.mxu1 %v5548_v35  ;;  %v5089_v30 = vcombine.high %v362_v24, %v366_v25  ;;  %v369_v35 = vld [vmem:[#allocation2 + $0x110] sm:$0xff]  ;;  %v410_v24 = vld [vmem:[#allocation2 + $0x258] sm:$0xff] }
 0x1cd   :  { %3617 = vmatprep.subr.bf16.mxu0 %v5555_v37  ;;  %3781 = vmatprep.subr.bf16.mxu1 %v5557_v38  ;;  %v373_v37 = vld [vmem:[#allocation2 + $0x130] sm:$0xff]  ;;  %v370_v38 = vld [vmem:[#allocation2 + $0x118] sm:$0xff] }
 0x1ce   :  { %v5095_v46 = vcombine.high %v369_v35, %v373_v37  ;;  %v5097_v47 = vcombine.high %v370_v38, %v374_v39  ;;  %v5096_v57 = vcombine.low %v370_v38, %v374_v39  ;;  %v414_v25 = vld [vmem:[#allocation2 + $0x278] sm:$0xff] }
 0x1cf   :  { %v418_v38 = vld [vmem:[#allocation2 + $0x298] sm:$0xff] }
 0x1d0   :  { %3618 = vmatpush1.bf16.msra.mxu0 %v5554_v49  ;;  %3782 = vmatpush1.bf16.msra.mxu1 %v5556_v50  ;;  %v377_v49 = vld [vmem:[#allocation2 + $0x150] sm:$0xff]  ;;  %v422_v39 = vld [vmem:[#allocation2 + $0x2b8] sm:$0xff] }
 0x1d1   :  { %3619 = vmatprep.subr.bf16.mxu0 %v5563_v53  ;;  %3783 = vmatprep.subr.bf16.mxu1 %v5565_v55  ;;  %v381_v50 = vld [vmem:[#allocation2 + $0x170] sm:$0xff]  ;;  %v382_v53 = vld [vmem:[#allocation2 + $0x178] sm:$0xff]  ;;  %v5094_v55 = vcombine.low %v369_v35, %v373_v37 }
 0x1d2   :  { %v5103_v59 = vcombine.high %v377_v49, %v381_v50  ;;  %v417_v35 = vld [vmem:[#allocation2 + $0x290] sm:$0xff] }
 0x1d3   :  { %v421_v37 = vld [vmem:[#allocation2 + $0x2b0] sm:$0xff] }
 0x1d4   :  { %3620 = vmatpush1.bf16.msra.mxu0 %v5562_v31  ;;  %3784 = vmatpush1.bf16.msra.mxu1 %v5564_v1  ;;  %v386_v31 = vld [vmem:[#allocation2 + $0x198] sm:$0xff] }
 0x1d5   :  { %3621 = vmatprep.subr.bf16.mxu0 %v5571_v2  ;;  %3785 = vmatprep.subr.bf16.mxu1 %v5573_v3  ;;  %v390_v1 = vld [vmem:[#allocation2 + $0x1b8] sm:$0xff]  ;;  %v5102_v2 = vcombine.low %v377_v49, %v381_v50  ;;  %v425_v49 = vld [vmem:[#allocation2 + $0x2d0] sm:$0xff] }
 0x1d6   :  { %v5113_v7 = vcombine.high %v386_v31, %v390_v1  ;;  %v429_v50 = vld [vmem:[#allocation2 + $0x2f0] sm:$0xff] }
 0x1d8   :  { %3622 = vmatpush1.bf16.msra.mxu0 %v5570_v48  ;;  %3786 = vmatpush1.bf16.msra.mxu1 %v5572_v11  ;;  %v398_v48 = vld [vmem:[#allocation2 + $0x1f8] sm:$0xff]  ;;  %v5110_v11 = vcombine.low %v385_v62, %v389_v63  ;;  %v433_v62 = vld [vmem:[#allocation2 + $0x310] sm:$0xff] }
 0x1d9   :  { %3796 = vmatprep.subr.bf16.mxu0 %v5071_v12  ;;  %3960 = vmatprep.subr.bf16.mxu1 %v5073_v13  ;;  %v5112_v12 = vcombine.low %v386_v31, %v390_v1  ;;  %v5119_v13 = vcombine.high %v393_v8, %v397_v9  ;;  %v5121_v14 = vcombine.high %v394_v10, %v398_v48  ;;  %v437_v63 = vld [vmem:[#allocation2 + $0x330] sm:$0xff]  ;;  %v434_v31 = vld [vmem:[#allocation2 + $0x318] sm:$0xff] }
 0x1da   :  { %v438_v1 = vld [vmem:[#allocation2 + $0x338] sm:$0xff] }
 0x1db   :  { %3624 = vmatmul.mubr.bf16.vlgmr.msra.gmra.mrb[8].mxu0 %v6177_v19  ;;  %3788 = vmatmul.mubr.bf16.vlgmr.msra.gmra.mrb[8].mxu1 %v6177_v19 }
 0x1dc   :  { %3797 = vmatpush1.bf16.msra.mxu0 %v5070_v18  ;;  %3828 = vmatprep.mubr.bf16.mxu0 %v6116_v58  ;;  %v5118_v18 = vcombine.low %v393_v8, %v397_v9  ;;  %v441_v8 = vld [vmem:[#allocation2 + $0x350] sm:$0xff] }
 0x1dd   :  { %3961 = vmatpush1.bf16.msra.mxu1 %v5072_v52  ;;  %3992 = vmatprep.mubr.bf16.mxu1 %v6116_v58  ;;  %v378_v58 = vld [vmem:[#allocation2 + $0x158] sm:$0xff]  ;;  %v5120_v52 = vcombine.low %v394_v10, %v398_v48  ;;  %v445_v9 = vld [vmem:[#allocation2 + $0x370] sm:$0xff] }
 0x1de   :  { %3798 = vmatprep.subr.bf16.mxu0 %v5079_v20  ;;  %3962 = vmatprep.subr.bf16.mxu1 %v5081_v21  ;;  %v5105_v61 = vcombine.high %v378_v58, %v382_v53  ;;  %v5104_v3 = vcombine.low %v378_v58, %v382_v53  ;;  %v5127_v20 = vcombine.high %v401_v15, %v405_v16  ;;  %v426_v58 = vld [vmem:[#allocation2 + $0x2d8] sm:$0xff] }
 0x1df   :  { %v5129_v21 = vcombine.high %v402_v17, %v406_v0  ;;  %v430_v53 = vld [vmem:[#allocation2 + $0x2f8] sm:$0xff] }
 0x1e0   :  { %3799 = vmatpush1.bf16.msra.mxu0 %v5078_v41  ;;  %v5126_v41 = vcombine.low %v401_v15, %v405_v16  ;;  %v442_v10 = vld [vmem:[#allocation2 + $0x358] sm:$0xff]  ;;  %v449_v15 = vld [vmem:[#allocation2 + $0x390] sm:$0xff] }
 0x1e1   :  { %3963 = vmatpush1.bf16.msra.mxu1 %v5080_v27  ;;  %3800 = vmatprep.subr.bf16.mxu0 %v5087_v5  ;;  %v5128_v27 = vcombine.low %v402_v17, %v406_v0  ;;  %v5135_v5 = vcombine.high %v409_v22, %v413_v23  ;;  %v446_v48 = vld [vmem:[#allocation2 + $0x378] sm:$0xff]  ;;  %v453_v16 = vld [vmem:[#allocation2 + $0x3b0] sm:$0xff] }
 0x1e2   :  { %3964 = vmatprep.subr.bf16.mxu1 %v5089_v30  ;;  %v5137_v30 = vcombine.high %v410_v24, %v414_v25  ;;  %v450_v17 = vld [vmem:[#allocation2 + $0x398] sm:$0xff] }
 0x1e3   :  { %v454_v0 = vld [vmem:[#allocation2 + $0x3b8] sm:$0xff] }
 0x1e4   :  { %3801 = vmatpush1.bf16.msra.mxu0 %v5086_v43  ;;  %v5134_v43 = vcombine.low %v409_v22, %v413_v23  ;;  %v457_v22 = vld [vmem:[#allocation2 + $0x3d0] sm:$0xff] }
 0x1e5   :  { %3965 = vmatpush1.bf16.msra.mxu1 %v5088_v45  ;;  %3802 = vmatprep.subr.bf16.mxu0 %v5095_v46  ;;  %v5136_v45 = vcombine.low %v410_v24, %v414_v25  ;;  %v5143_v46 = vcombine.high %v417_v35, %v421_v37  ;;  %v461_v23 = vld [vmem:[#allocation2 + $0x3f0] sm:$0xff]  ;;  %v458_v24 = vld [vmem:[#allocation2 + $0x3d8] sm:$0xff] }
 0x1e6   :  { %3966 = vmatprep.subr.bf16.mxu1 %v5097_v47  ;;  %v5145_v47 = vcombine.high %v418_v38, %v422_v39  ;;  %v462_v25 = vld [vmem:[#allocation2 + $0x3f8] sm:$0xff] }
 0x1e8   :  { %3803 = vmatpush1.bf16.msra.mxu0 %v5094_v55  ;;  %v5142_v55 = vcombine.low %v417_v35, %v421_v37  ;;  %v465_v35 = vld [vmem:[#allocation2 + $0x410] sm:$0xff] }
 0x1e9   :  { %3967 = vmatpush1.bf16.msra.mxu1 %v5096_v57  ;;  %3804 = vmatprep.subr.bf16.mxu0 %v5103_v59  ;;  %v5144_v57 = vcombine.low %v418_v38, %v422_v39  ;;  %v5151_v59 = vcombine.high %v425_v49, %v429_v50  ;;  %v469_v37 = vld [vmem:[#allocation2 + $0x430] sm:$0xff]  ;;  %v466_v38 = vld [vmem:[#allocation2 + $0x418] sm:$0xff] }
 0x1ea   :  { %3968 = vmatprep.subr.bf16.mxu1 %v5105_v61  ;;  %v5153_v61 = vcombine.high %v426_v58, %v430_v53  ;;  %v470_v39 = vld [vmem:[#allocation2 + $0x438] sm:$0xff] }
 0x1ec   :  { %3805 = vmatpush1.bf16.msra.mxu0 %v5102_v2  ;;  %v5150_v2 = vcombine.low %v425_v49, %v429_v50  ;;  %v473_v49 = vld [vmem:[#allocation2 + $0x450] sm:$0xff] }
 0x1ed   :  { %3969 = vmatpush1.bf16.msra.mxu1 %v5104_v3  ;;  %3806 = vmatprep.subr.bf16.mxu0 %v5111_v6  ;;  %v5152_v3 = vcombine.low %v426_v58, %v430_v53  ;;  %v5159_v6 = vcombine.high %v433_v62, %v437_v63  ;;  %v477_v50 = vld [vmem:[#allocation2 + $0x470] sm:$0xff]  ;;  %v474_v58 = vld [vmem:[#allocation2 + $0x458] sm:$0xff] }
 0x1ee   :  { %3970 = vmatprep.subr.bf16.mxu1 %v5113_v7  ;;  %v5161_v7 = vcombine.high %v434_v31, %v438_v1  ;;  %v478_v53 = vld [vmem:[#allocation2 + $0x478] sm:$0xff] }
 0x1f0   :  { %3807 = vmatpush1.bf16.msra.mxu0 %v5110_v11  ;;  %v5158_v11 = vcombine.low %v433_v62, %v437_v63  ;;  %v481_v62 = vld [vmem:[#allocation2 + $0x490] sm:$0xff] }
 0x1f1   :  { %3971 = vmatpush1.bf16.msra.mxu1 %v5112_v12  ;;  %3808 = vmatprep.subr.bf16.mxu0 %v5119_v13  ;;  %v5160_v12 = vcombine.low %v434_v31, %v438_v1  ;;  %v5167_v13 = vcombine.high %v441_v8, %v445_v9  ;;  %v485_v63 = vld [vmem:[#allocation2 + $0x4b0] sm:$0xff]  ;;  %v5198_v31 = vcombine.low %v473_v49, %v477_v50  ;;  %v482_v1 = vld [vmem:[#allocation2 + $0x498] sm:$0xff] }
 0x1f2   :  { %3972 = vmatprep.subr.bf16.mxu1 %v5121_v14  ;;  %v5169_v14 = vcombine.high %v442_v10, %v446_v48 }
 0x1f4   :  { %3809 = vmatpush1.bf16.msra.mxu0 %v5118_v18  ;;  %v5166_v18 = vcombine.low %v441_v8, %v445_v9  ;;  %v493_v8 = vld [vmem:[#allocation2 + $0x4f0] sm:$0xff] }
 0x1f5   :  { %3973 = vmatpush1.bf16.msra.mxu1 %v5120_v52  ;;  %3810 = vmatprep.subr.bf16.mxu0 %v5127_v20  ;;  %v5168_v52 = vcombine.low %v442_v10, %v446_v48  ;;  %v5175_v20 = vcombine.high %v449_v15, %v453_v16  ;;  %v490_v10 = vld [vmem:[#allocation2 + $0x4d8] sm:$0xff] }
 0x1f6   :  { %3974 = vmatprep.subr.bf16.mxu1 %v5129_v21  ;;  %v5177_v21 = vcombine.high %v450_v17, %v454_v0  ;;  %v494_v48 = vld [vmem:[#allocation2 + $0x4f8] sm:$0xff] }
 0x1f8   :  { %3811 = vmatpush1.bf16.msra.mxu0 %v5126_v41  ;;  %v5174_v41 = vcombine.low %v449_v15, %v453_v16  ;;  %v497_v15 = vld [vmem:[#allocation2 + $0x510] sm:$0xff] }
 0x1f9   :  { %3975 = vmatpush1.bf16.msra.mxu1 %v5128_v27  ;;  %3812 = vmatprep.subr.bf16.mxu0 %v5135_v5  ;;  %v5176_v27 = vcombine.low %v450_v17, %v454_v0  ;;  %v5183_v5 = vcombine.high %v457_v22, %v461_v23  ;;  %v501_v16 = vld [vmem:[#allocation2 + $0x530] sm:$0xff]  ;;  %v498_v17 = vld [vmem:[#allocation2 + $0x518] sm:$0xff] }
 0x1fa   :  { %3976 = vmatprep.subr.bf16.mxu1 %v5137_v30  ;;  %v5185_v30 = vcombine.high %v458_v24, %v462_v25  ;;  %v502_v0 = vld [vmem:[#allocation2 + $0x538] sm:$0xff] }
 0x1fc   :  { %3813 = vmatpush1.bf16.msra.mxu0 %v5134_v43  ;;  %v5182_v43 = vcombine.low %v457_v22, %v461_v23  ;;  %v509_v22 = vld [vmem:[#allocation2 + $0x570] sm:$0xff]  ;;  %v506_v23 = vld [vmem:[#allocation2 + $0x558] sm:$0xff] }
 0x1fd   :  { %3977 = vmatpush1.bf16.msra.mxu1 %v5136_v45  ;;  %3814 = vmatprep.subr.bf16.mxu0 %v5143_v46  ;;  %v5184_v45 = vcombine.low %v458_v24, %v462_v25  ;;  %v5191_v46 = vcombine.high %v465_v35, %v469_v37  ;;  %v510_v24 = vld [vmem:[#allocation2 + $0x578] sm:$0xff]  ;;  %v5224_v25 = vcombine.low %v498_v17, %v502_v0 }
 0x1fe   :  { %3978 = vmatprep.subr.bf16.mxu1 %v5145_v47  ;;  %v5193_v47 = vcombine.high %v466_v38, %v470_v39 }
 0x200   :  { %3815 = vmatpush1.bf16.msra.mxu0 %v5142_v55  ;;  %v5190_v55 = vcombine.low %v465_v35, %v469_v37  ;;  %v514_v35 = vld [vmem:[#allocation2 + $0x598] sm:$0xff] }
 0x201   :  { %3979 = vmatpush1.bf16.msra.mxu1 %v5144_v57  ;;  %3816 = vmatprep.subr.bf16.mxu0 %v5151_v59  ;;  %v5192_v57 = vcombine.low %v466_v38, %v470_v39  ;;  %v5199_v59 = vcombine.high %v473_v49, %v477_v50  ;;  %v518_v37 = vld [vmem:[#allocation2 + $0x5b8] sm:$0xff]  ;;  %v5232_v39 = vcombine.low %v506_v23, %v510_v24 }
 0x202   :  { %3980 = vmatprep.subr.bf16.mxu1 %v5153_v61  ;;  %v5201_v61 = vcombine.high %v474_v58, %v478_v53  ;;  %v522_v49 = vld [vmem:[#allocation2 + $0x5d8] sm:$0xff] }
 0x203   :  { %v526_v50 = vld [vmem:[#allocation2 + $0x5f8] sm:$0xff] }
 0x204   :  { %3817 = vmatpush1.bf16.msra.mxu0 %v5150_v2  ;;  %v486_v2 = vld [vmem:[#allocation2 + $0x4b8] sm:$0xff] }
 0x205   :  { %3981 = vmatpush1.bf16.msra.mxu1 %v5152_v3  ;;  %3818 = vmatprep.subr.bf16.mxu0 %v5159_v6  ;;  %v5200_v3 = vcombine.low %v474_v58, %v478_v53  ;;  %v5207_v6 = vcombine.high %v481_v62, %v485_v63  ;;  %v5209_v9 = vcombine.high %v482_v1, %v486_v2 }
 0x206   :  { %3982 = vmatprep.subr.bf16.mxu1 %v5161_v7  ;;  %v489_v7 = vld [vmem:[#allocation2 + $0x4d0] sm:$0xff]  ;;  %v5240_v53 = vcombine.low %v514_v35, %v518_v37 }
 0x208   :  { %3819 = vmatpush1.bf16.msra.mxu0 %v5158_v11  ;;  %v5206_v11 = vcombine.low %v481_v62, %v485_v63  ;;  %v530_v62 = vld [vmem:[#allocation2 + $0x618] sm:$0xff] }
 0x209   :  { %3983 = vmatpush1.bf16.msra.mxu1 %v5160_v12  ;;  %3820 = vmatprep.subr.bf16.mxu0 %v5167_v13  ;;  %v5208_v12 = vcombine.low %v482_v1, %v486_v2  ;;  %v5215_v13 = vcombine.high %v489_v7, %v493_v8  ;;  %v534_v63 = vld [vmem:[#allocation2 + $0x638] sm:$0xff]  ;;  %v5248_v1 = vcombine.low %v522_v49, %v526_v50 }
 0x20a   :  { %3984 = vmatprep.subr.bf16.mxu1 %v5169_v14  ;;  %v5217_v14 = vcombine.high %v490_v10, %v494_v48 }
 0x20c   :  { %3821 = vmatpush1.bf16.msra.mxu0 %v5166_v18  ;;  %v5214_v18 = vcombine.low %v489_v7, %v493_v8  ;;  %v541_v7 = vld [vmem:[#allocation2 + $0x670] sm:$0xff]  ;;  %v538_v8 = vld [vmem:[#allocation2 + $0x658] sm:$0xff] }
 0x20d   :  { %3985 = vmatpush1.bf16.msra.mxu1 %v5168_v52  ;;  %3822 = vmatprep.subr.bf16.mxu0 %v5175_v20  ;;  %v5223_v52 = vcombine.high %v497_v15, %v501_v16  ;;  %v5225_v20 = vcombine.high %v498_v17, %v502_v0 }
 0x20e   :  { %3986 = vmatprep.subr.bf16.mxu1 %v5177_v21  ;;  %v505_v21 = vld [vmem:[#allocation2 + $0x550] sm:$0xff] }
 0x20f   :  { %v5230_v38 = vcombine.low %v505_v21, %v509_v22 }
 0x210   :  { %3823 = vmatpush1.bf16.msra.mxu0 %v5174_v41  ;;  %v5231_v41 = vcombine.high %v505_v21, %v509_v22  ;;  %v554_v21 = vld [vmem:[#allocation2 + $0x6d8] sm:$0xff] }
 0x211   :  { %3987 = vmatpush1.bf16.msra.mxu1 %v5176_v27  ;;  %3824 = vmatprep.subr.bf16.mxu0 %v5183_v5  ;;  %v5233_v27 = vcombine.high %v506_v23, %v510_v24  ;;  %v513_v5 = vld [vmem:[#allocation2 + $0x590] sm:$0xff]  ;;  %v558_v22 = vld [vmem:[#allocation2 + $0x6f8] sm:$0xff] }
 0x212   :  { %3988 = vmatprep.subr.bf16.mxu1 %v5185_v30  ;;  %v517_v30 = vld [vmem:[#allocation2 + $0x5b0] sm:$0xff] }
 0x213   :  { %v5238_v58 = vcombine.low %v513_v5, %v517_v30 }
 0x214   :  { %3825 = vmatpush1.bf16.msra.mxu0 %v5182_v43  ;;  %v5239_v43 = vcombine.high %v513_v5, %v517_v30  ;;  %v562_v5 = vld [vmem:[#allocation2 + $0x718] sm:$0xff] }
 0x215   :  { %3989 = vmatpush1.bf16.msra.mxu1 %v5184_v45  ;;  %3826 = vmatprep.subr.bf16.mxu0 %v5191_v46  ;;  %v5241_v45 = vcombine.high %v514_v35, %v518_v37  ;;  %v521_v46 = vld [vmem:[#allocation2 + $0x5d0] sm:$0xff]  ;;  %v566_v30 = vld [vmem:[#allocation2 + $0x738] sm:$0xff]  ;;  %v5280_v37 = vcombine.low %v554_v21, %v558_v22 }
 0x216   :  { %3990 = vmatprep.subr.bf16.mxu1 %v5193_v47  ;;  %v525_v47 = vld [vmem:[#allocation2 + $0x5f0] sm:$0xff] }
 0x218   :  { %3827 = vmatpush1.bf16.msra.mxu0 %v5190_v55  ;;  %v5247_v55 = vcombine.high %v521_v46, %v525_v47 }
 0x219   :  { %3991 = vmatpush1.bf16.msra.mxu1 %v5192_v57  ;;  %3837 = vmatprep.subr.bf16.mxu0 %v5199_v59  ;;  %v5249_v57 = vcombine.high %v522_v49, %v526_v50  ;;  %v529_v59 = vld [vmem:[#allocation2 + $0x610] sm:$0xff]  ;;  %v5288_v50 = vcombine.low %v562_v5, %v566_v30 }
 0x21a   :  { %4001 = vmatprep.subr.bf16.mxu1 %v5201_v61  ;;  %v533_v61 = vld [vmem:[#allocation2 + $0x630] sm:$0xff] }
 0x21b   :  { %3829 = vmatmul.mubr.bf16.vlgmr.msra.gmra.mrb[12].mxu0 %v6118_v60  ;;  %v5255_v2 = vcombine.high %v529_v59, %v533_v61 }
 0x21c   :  { %3993 = vmatmul.mubr.bf16.vlgmr.msra.gmra.mrb[12].mxu1 %v6118_v60  ;;  %3838 = vmatpush1.bf16.msra.mxu0 %v5198_v31  ;;  %v5216_v60 = vcombine.low %v490_v10, %v494_v48  ;;  %v5246_v31 = vcombine.low %v521_v46, %v525_v47  ;;  %v5254_v10 = vcombine.low %v529_v59, %v533_v61  ;;  %v570_v46 = vld [vmem:[#allocation2 + $0x758] sm:$0xff] }
 0x21d   :  { %3869 = vmatprep.mubr.bf16.mxu0 %v6124_v4  ;;  %4002 = vmatpush1.bf16.msra.mxu1 %v5200_v3  ;;  %v5257_v3 = vcombine.high %v530_v62, %v534_v63  ;;  %v5256_v48 = vcombine.low %v530_v62, %v534_v63  ;;  %v574_v47 = vld [vmem:[#allocation2 + $0x778] sm:$0xff] }
 0x21e   :  { %4033 = vmatprep.mubr.bf16.mxu1 %v6124_v4  ;;  %3839 = vmatprep.subr.bf16.mxu0 %v5207_v6  ;;  %v5222_v4 = vcombine.low %v497_v15, %v501_v16  ;;  %v537_v6 = vld [vmem:[#allocation2 + $0x650] sm:$0xff]  ;;  %v546_v15 = vld [vmem:[#allocation2 + $0x698] sm:$0xff]  ;;  %v5296_v63 = vcombine.low %v570_v46, %v574_v47 }
 0x21f   :  { %4003 = vmatprep.subr.bf16.mxu1 %v5209_v9  ;;  %v542_v9 = vld [vmem:[#allocation2 + $0x678] sm:$0xff]  ;;  %v5262_v17 = vcombine.low %v537_v6, %v541_v7 }
 0x220   :  { %3840 = vmatpush1.bf16.msra.mxu0 %v5206_v11  ;;  %v5263_v11 = vcombine.high %v537_v6, %v541_v7  ;;  %v550_v16 = vld [vmem:[#allocation2 + $0x6b8] sm:$0xff]  ;;  %v5264_v0 = vcombine.low %v538_v8, %v542_v9 }
 0x221   :  { %4004 = vmatpush1.bf16.msra.mxu1 %v5208_v12  ;;  %3841 = vmatprep.subr.bf16.mxu0 %v5215_v13  ;;  %v5265_v12 = vcombine.high %v538_v8, %v542_v9  ;;  %v545_v13 = vld [vmem:[#allocation2 + $0x690] sm:$0xff]  ;;  %v5272_v24 = vcombine.low %v546_v15, %v550_v16  ;;  %v578_v59 = vld [vmem:[#allocation2 + $0x798] sm:$0xff] }
 0x222   :  { %4005 = vmatprep.subr.bf16.mxu1 %v5217_v14  ;;  %v549_v14 = vld [vmem:[#allocation2 + $0x6b0] sm:$0xff]  ;;  %v582_v61 = vld [vmem:[#allocation2 + $0x7b8] sm:$0xff] }
 0x223   :  { %v5270_v23 = vcombine.low %v545_v13, %v549_v14  ;;  %v586_v6 = vld [vmem:[#allocation2 + $0x7d8] sm:$0xff]  ;;  %v5304_v9 = vcombine.low %v578_v59, %v582_v61 }
 0x224   :  { %3842 = vmatpush1.bf16.msra.mxu0 %v5214_v18  ;;  %v5271_v18 = vcombine.high %v545_v13, %v549_v14  ;;  %v590_v7 = vld [vmem:[#allocation2 + $0x7f8] sm:$0xff] }
 0x225   :  { %4006 = vmatpush1.bf16.msra.mxu1 %v5216_v60  ;;  %3843 = vmatprep.subr.bf16.mxu0 %v5223_v52  ;;  %v5273_v60 = vcombine.high %v546_v15, %v550_v16  ;;  %v553_v52 = vld [vmem:[#allocation2 + $0x6d0] sm:$0xff]  ;;  %v594_v13 = vld [vmem:[#allocation2 + $0x818] sm:$0xff]  ;;  %v5312_v16 = vcombine.low %v586_v6, %v590_v7 }
 0x226   :  { %4007 = vmatprep.subr.bf16.mxu1 %v5225_v20  ;;  %v557_v20 = vld [vmem:[#allocation2 + $0x6f0] sm:$0xff]  ;;  %v598_v14 = vld [vmem:[#allocation2 + $0x838] sm:$0xff] }
 0x227   :  { %v5278_v35 = vcombine.low %v553_v52, %v557_v20 }
 0x228   :  { %3844 = vmatpush1.bf16.msra.mxu0 %v5222_v4  ;;  %v5279_v4 = vcombine.high %v553_v52, %v557_v20  ;;  %v602_v52 = vld [vmem:[#allocation2 + $0x858] sm:$0xff] }
 0x229   :  { %4008 = vmatpush1.bf16.msra.mxu1 %v5224_v25  ;;  %3845 = vmatprep.subr.bf16.mxu0 %v5231_v41  ;;  %v5281_v25 = vcombine.high %v554_v21, %v558_v22  ;;  %v561_v41 = vld [vmem:[#allocation2 + $0x710] sm:$0xff]  ;;  %v606_v20 = vld [vmem:[#allocation2 + $0x878] sm:$0xff]  ;;  %v5320_v22 = vcombine.low %v594_v13, %v598_v14 }
 0x22a   :  { %4009 = vmatprep.subr.bf16.mxu1 %v5233_v27  ;;  %v565_v27 = vld [vmem:[#allocation2 + $0x730] sm:$0xff] }
 0x22b   :  { %v5286_v49 = vcombine.low %v561_v41, %v565_v27 }
 0x22c   :  { %3846 = vmatpush1.bf16.msra.mxu0 %v5230_v38  ;;  %v5287_v38 = vcombine.high %v561_v41, %v565_v27  ;;  %v610_v27 = vld [vmem:[#allocation2 + $0x898] sm:$0xff] }
 0x22d   :  { %4010 = vmatpush1.bf16.msra.mxu1 %v5232_v39  ;;  %3847 = vmatprep.subr.bf16.mxu0 %v5239_v43  ;;  %v5289_v39 = vcombine.high %v562_v5, %v566_v30  ;;  %v569_v43 = vld [vmem:[#allocation2 + $0x750] sm:$0xff]  ;;  %v614_v5 = vld [vmem:[#allocation2 + $0x8b8] sm:$0xff]  ;;  %v5328_v30 = vcombine.low %v602_v52, %v606_v20 }
 0x22e   :  { %4011 = vmatprep.subr.bf16.mxu1 %v5241_v45  ;;  %v573_v45 = vld [vmem:[#allocation2 + $0x770] sm:$0xff] }
 0x22f   :  { %v5294_v62 = vcombine.low %v569_v43, %v573_v45 }
 0x230   :  { %3848 = vmatpush1.bf16.msra.mxu0 %v5238_v58  ;;  %v5295_v58 = vcombine.high %v569_v43, %v573_v45  ;;  %v618_v43 = vld [vmem:[#allocation2 + $0x8d8] sm:$0xff] }
 0x231   :  { %4012 = vmatpush1.bf16.msra.mxu1 %v5240_v53  ;;  %3849 = vmatprep.subr.bf16.mxu0 %v5247_v55  ;;  %v5297_v53 = vcombine.high %v570_v46, %v574_v47  ;;  %v577_v55 = vld [vmem:[#allocation2 + $0x790] sm:$0xff]  ;;  %v622_v45 = vld [vmem:[#allocation2 + $0x8f8] sm:$0xff]  ;;  %v5336_v47 = vcombine.low %v610_v27, %v614_v5 }
 0x232   :  { %4013 = vmatprep.subr.bf16.mxu1 %v5249_v57  ;;  %v581_v57 = vld [vmem:[#allocation2 + $0x7b0] sm:$0xff] }
 0x233   :  { %v5302_v8 = vcombine.low %v577_v55, %v581_v57 }
 0x234   :  { %3850 = vmatpush1.bf16.msra.mxu0 %v5246_v31  ;;  %v5303_v31 = vcombine.high %v577_v55, %v581_v57  ;;  %v626_v55 = vld [vmem:[#allocation2 + $0x918] sm:$0xff] }
 0x235   :  { %4014 = vmatpush1.bf16.msra.mxu1 %v5248_v1  ;;  %3851 = vmatprep.subr.bf16.mxu0 %v5255_v2  ;;  %v5305_v1 = vcombine.high %v578_v59, %v582_v61  ;;  %v585_v2 = vld [vmem:[#allocation2 + $0x7d0] sm:$0xff]  ;;  %v630_v57 = vld [vmem:[#allocation2 + $0x938] sm:$0xff] }
 0x236   :  { %4015 = vmatprep.subr.bf16.mxu1 %v5257_v3  ;;  %v589_v3 = vld [vmem:[#allocation2 + $0x7f0] sm:$0xff] }
 0x237   :  { %v5310_v15 = vcombine.low %v585_v2, %v589_v3 }
 0x238   :  { %3852 = vmatpush1.bf16.msra.mxu0 %v5254_v10  ;;  %v5311_v10 = vcombine.high %v585_v2, %v589_v3  ;;  %v638_v2 = vld [vmem:[#allocation2 + $0x978] sm:$0xff]  ;;  %v5352_v3 = vcombine.low %v626_v55, %v630_v57 }
 0x239   :  { %4016 = vmatpush1.bf16.msra.mxu1 %v5256_v48  ;;  %3853 = vmatprep.subr.bf16.mxu0 %v5263_v11  ;;  %v5313_v48 = vcombine.high %v586_v6, %v590_v7  ;;  %v593_v11 = vld [vmem:[#allocation2 + $0x810] sm:$0xff] }
 0x23a   :  { %4017 = vmatprep.subr.bf16.mxu1 %v5265_v12  ;;  %v597_v12 = vld [vmem:[#allocation2 + $0x830] sm:$0xff] }
 0x23b   :  { %v5318_v21 = vcombine.low %v593_v11, %v597_v12 }
 0x23c   :  { %3854 = vmatpush1.bf16.msra.mxu0 %v5262_v17  ;;  %v5319_v17 = vcombine.high %v593_v11, %v597_v12 }
 0x23d   :  { %4018 = vmatpush1.bf16.msra.mxu1 %v5264_v0  ;;  %3855 = vmatprep.subr.bf16.mxu0 %v5271_v18  ;;  %v5321_v0 = vcombine.high %v594_v13, %v598_v14  ;;  %v601_v18 = vld [vmem:[#allocation2 + $0x850] sm:$0xff] }
 0x23e   :  { %4019 = vmatprep.subr.bf16.mxu1 %v5273_v60  ;;  %v605_v60 = vld [vmem:[#allocation2 + $0x870] sm:$0xff] }
 0x23f   :  { %v5326_v41 = vcombine.low %v601_v18, %v605_v60 }
 0x240   :  { %3856 = vmatpush1.bf16.msra.mxu0 %v5270_v23  ;;  %v5327_v23 = vcombine.high %v601_v18, %v605_v60 }
 0x241   :  { %4020 = vmatpush1.bf16.msra.mxu1 %v5272_v24  ;;  %3857 = vmatprep.subr.bf16.mxu0 %v5279_v4  ;;  %v5329_v24 = vcombine.high %v602_v52, %v606_v20  ;;  %v609_v4 = vld [vmem:[#allocation2 + $0x890] sm:$0xff] }
 0x242   :  { %4021 = vmatprep.subr.bf16.mxu1 %v5281_v25  ;;  %v613_v25 = vld [vmem:[#allocation2 + $0x8b0] sm:$0xff] }
 0x243   :  { %v5334_v46 = vcombine.low %v609_v4, %v613_v25 }
 0x244   :  { %3858 = vmatpush1.bf16.msra.mxu0 %v5278_v35  ;;  %v5335_v35 = vcombine.high %v609_v4, %v613_v25 }
 0x245   :  { %4022 = vmatpush1.bf16.msra.mxu1 %v5280_v37  ;;  %3859 = vmatprep.subr.bf16.mxu0 %v5287_v38  ;;  %v617_v37 = vld [vmem:[#allocation2 + $0x8d0] sm:$0xff] }
 0x246   :  { %4023 = vmatprep.subr.bf16.mxu1 %v5289_v39  ;;  %v621_v38 = vld [vmem:[#allocation2 + $0x8f0] sm:$0xff]  ;;  %v5337_v39 = vcombine.high %v610_v27, %v614_v5 }
 0x247   :  { %v5342_v59 = vcombine.low %v617_v37, %v621_v38  ;;  %v665_v5 = vld [vmem:[#allocation2 + $0xa50] sm:$0xff] }
 0x248   :  { %3860 = vmatpush1.bf16.msra.mxu0 %v5286_v49  ;;  %v5343_v49 = vcombine.high %v617_v37, %v621_v38  ;;  %v670_v37 = vld [vmem:[#allocation2 + $0xa78] sm:$0xff] }
 0x249   :  { %4024 = vmatpush1.bf16.msra.mxu1 %v5288_v50  ;;  %3861 = vmatprep.subr.bf16.mxu0 %v5295_v58  ;;  %v5345_v50 = vcombine.high %v618_v43, %v622_v45  ;;  %v625_v58 = vld [vmem:[#allocation2 + $0x910] sm:$0xff] }
 0x24a   :  { %4025 = vmatprep.subr.bf16.mxu1 %v5297_v53  ;;  %v629_v53 = vld [vmem:[#allocation2 + $0x930] sm:$0xff] }
 0x24b   :  { %v5351_v61 = vcombine.high %v625_v58, %v629_v53 }
 0x24c   :  { %3862 = vmatpush1.bf16.msra.mxu0 %v5294_v62  ;;  %v5353_v62 = vcombine.high %v626_v55, %v630_v57 }
 0x24d   :  { %4026 = vmatpush1.bf16.msra.mxu1 %v5296_v63  ;;  %3863 = vmatprep.subr.bf16.mxu0 %v5303_v31  ;;  %v633_v63 = vld [vmem:[#allocation2 + $0x950] sm:$0xff] }
 0x24e   :  { %4027 = vmatprep.subr.bf16.mxu1 %v5305_v1  ;;  %v637_v31 = vld [vmem:[#allocation2 + $0x970] sm:$0xff]  ;;  %v634_v1 = vld [vmem:[#allocation2 + $0x958] sm:$0xff] }
 0x24f   :  { %v5359_v6 = vcombine.high %v633_v63, %v637_v31  ;;  %v5361_v7 = vcombine.high %v634_v1, %v638_v2  ;;  %v5358_v11 = vcombine.low %v633_v63, %v637_v31  ;;  %v5360_v12 = vcombine.low %v634_v1, %v638_v2 }
 0x250   :  { %3864 = vmatpush1.bf16.msra.mxu0 %v5302_v8  ;;  %v641_v8 = vld [vmem:[#allocation2 + $0x990] sm:$0xff] }
 0x251   :  { %4028 = vmatpush1.bf16.msra.mxu1 %v5304_v9  ;;  %3865 = vmatprep.subr.bf16.mxu0 %v5311_v10  ;;  %v645_v9 = vld [vmem:[#allocation2 + $0x9b0] sm:$0xff]  ;;  %v642_v10 = vld [vmem:[#allocation2 + $0x998] sm:$0xff] }
 0x252   :  { %4029 = vmatprep.subr.bf16.mxu1 %v5313_v48  ;;  %v646_v48 = vld [vmem:[#allocation2 + $0x9b8] sm:$0xff]  ;;  %v5367_v13 = vcombine.high %v641_v8, %v645_v9  ;;  %v5366_v18 = vcombine.low %v641_v8, %v645_v9 }
 0x253   :  { %v5369_v14 = vcombine.high %v642_v10, %v646_v48  ;;  %v5368_v60 = vcombine.low %v642_v10, %v646_v48 }
 0x254   :  { %3866 = vmatpush1.bf16.msra.mxu0 %v5310_v15  ;;  %v649_v15 = vld [vmem:[#allocation2 + $0x9d0] sm:$0xff] }
 0x255   :  { %4030 = vmatpush1.bf16.msra.mxu1 %v5312_v16  ;;  %3867 = vmatprep.subr.bf16.mxu0 %v5319_v17  ;;  %v653_v16 = vld [vmem:[#allocation2 + $0x9f0] sm:$0xff]  ;;  %v650_v17 = vld [vmem:[#allocation2 + $0x9d8] sm:$0xff] }
 0x256   :  { %4031 = vmatprep.subr.bf16.mxu1 %v5321_v0  ;;  %v654_v0 = vld [vmem:[#allocation2 + $0x9f8] sm:$0xff]  ;;  %v5375_v52 = vcombine.high %v649_v15, %v653_v16  ;;  %v5374_v4 = vcombine.low %v649_v15, %v653_v16 }
 0x257   :  { %v5377_v20 = vcombine.high %v650_v17, %v654_v0  ;;  %v5376_v25 = vcombine.low %v650_v17, %v654_v0 }
 0x258   :  { %3868 = vmatpush1.bf16.msra.mxu0 %v5318_v21  ;;  %v657_v21 = vld [vmem:[#allocation2 + $0xa10] sm:$0xff] }
 0x259   :  { %4032 = vmatpush1.bf16.msra.mxu1 %v5320_v22  ;;  %3878 = vmatprep.subr.bf16.mxu0 %v5327_v23  ;;  %v661_v22 = vld [vmem:[#allocation2 + $0xa30] sm:$0xff]  ;;  %v658_v23 = vld [vmem:[#allocation2 + $0xa18] sm:$0xff] }
 0x25a   :  { %4042 = vmatprep.subr.bf16.mxu1 %v5329_v24  ;;  %v662_v24 = vld [vmem:[#allocation2 + $0xa38] sm:$0xff]  ;;  %v5382_v38 = vcombine.low %v657_v21, %v661_v22 }
 0x25b   :  { %3870 = vmatmul.mubr.bf16.vlgmr.msra.gmra.mrb[12].mxu0 %v6146_v44  ;;  %v5385_v27 = vcombine.high %v658_v23, %v662_v24 }
 0x25c   :  { %4034 = vmatmul.mubr.bf16.vlgmr.msra.gmra.mrb[12].mxu1 %v6146_v44  ;;  %3879 = vmatpush1.bf16.msra.mxu0 %v5326_v41  ;;  %v5344_v44 = vcombine.low %v618_v43, %v622_v45  ;;  %v5383_v41 = vcombine.high %v657_v21, %v661_v22 }
 0x25d   :  { %3910 = vmatprep.mubr.bf16.mxu0 %v6148_v54  ;;  %4043 = vmatpush1.bf16.msra.mxu1 %v5328_v30  ;;  %v669_v30 = vld [vmem:[#allocation2 + $0xa70] sm:$0xff] }
 0x25e   :  { %4074 = vmatprep.mubr.bf16.mxu1 %v6148_v54  ;;  %3880 = vmatprep.subr.bf16.mxu0 %v5335_v35  ;;  %v5350_v54 = vcombine.low %v625_v58, %v629_v53  ;;  %v666_v35 = vld [vmem:[#allocation2 + $0xa58] sm:$0xff]  ;;  %v5391_v43 = vcombine.high %v665_v5, %v669_v30  ;;  %v5390_v58 = vcombine.low %v665_v5, %v669_v30 }
 0x25f   :  { %4044 = vmatprep.subr.bf16.mxu1 %v5337_v39  ;;  %v5384_v39 = vcombine.low %v658_v23, %v662_v24  ;;  %v5393_v45 = vcombine.high %v666_v35, %v670_v37  ;;  %v5392_v53 = vcombine.low %v666_v35, %v670_v37 }
 0x260   :  { %3881 = vmatpush1.bf16.msra.mxu0 %v5334_v46  ;;  %v673_v46 = vld [vmem:[#allocation2 + $0xa90] sm:$0xff] }
 0x261   :  { %4045 = vmatpush1.bf16.msra.mxu1 %v5336_v47  ;;  %3882 = vmatprep.subr.bf16.mxu0 %v5343_v49  ;;  %v677_v47 = vld [vmem:[#allocation2 + $0xab0] sm:$0xff]  ;;  %v674_v49 = vld [vmem:[#allocation2 + $0xa98] sm:$0xff] }
 0x262   :  { %4046 = vmatprep.subr.bf16.mxu1 %v5345_v50  ;;  %v678_v50 = vld [vmem:[#allocation2 + $0xab8] sm:$0xff]  ;;  %v5399_v55 = vcombine.high %v673_v46, %v677_v47  ;;  %v5398_v63 = vcombine.low %v673_v46, %v677_v47 }
 0x263   :  { %v5401_v57 = vcombine.high %v674_v49, %v678_v50  ;;  %v5400_v31 = vcombine.low %v674_v49, %v678_v50 }
 0x264   :  { %3883 = vmatpush1.bf16.msra.mxu0 %v5342_v59  ;;  %v681_v59 = vld [vmem:[#allocation2 + $0xad0] sm:$0xff] }
 0x265   :  { %4047 = vmatpush1.bf16.msra.mxu1 %v5344_v44  ;;  %3884 = vmatprep.subr.bf16.mxu0 %v5351_v61  ;;  %v685_v44 = vld [vmem:[#allocation2 + $0xaf0] sm:$0xff]  ;;  %v682_v61 = vld [vmem:[#allocation2 + $0xad8] sm:$0xff] }
 0x266   :  { %4048 = vmatprep.subr.bf16.mxu1 %v5353_v62  ;;  %v686_v62 = vld [vmem:[#allocation2 + $0xaf8] sm:$0xff]  ;;  %v5407_v1 = vcombine.high %v681_v59, %v685_v44  ;;  %v5406_v8 = vcombine.low %v681_v59, %v685_v44 }
 0x267   :  { %v5409_v2 = vcombine.high %v682_v61, %v686_v62  ;;  %v5408_v9 = vcombine.low %v682_v61, %v686_v62 }
 0x268   :  { %3885 = vmatpush1.bf16.msra.mxu0 %v5350_v54  ;;  %v689_v54 = vld [vmem:[#allocation2 + $0xb10] sm:$0xff] }
 0x269   :  { %4049 = vmatpush1.bf16.msra.mxu1 %v5352_v3  ;;  %3886 = vmatprep.subr.bf16.mxu0 %v5359_v6  ;;  %v693_v3 = vld [vmem:[#allocation2 + $0xb30] sm:$0xff]  ;;  %v690_v6 = vld [vmem:[#allocation2 + $0xb18] sm:$0xff] }
 0x26a   :  { %4050 = vmatprep.subr.bf16.mxu1 %v5361_v7  ;;  %v694_v7 = vld [vmem:[#allocation2 + $0xb38] sm:$0xff]  ;;  %v5415_v10 = vcombine.high %v689_v54, %v693_v3  ;;  %v5414_v15 = vcombine.low %v689_v54, %v693_v3 }
 0x26b   :  { %v5417_v48 = vcombine.high %v690_v6, %v694_v7  ;;  %v5416_v16 = vcombine.low %v690_v6, %v694_v7  ;;  %v742_v54 = vld [vmem:[#allocation2 + $0xcb8] sm:$0xff]  ;;  %v745_v7 = vld [vmem:[#allocation2 + $0xcd0] sm:$0xff] }
 0x26c   :  { %3887 = vmatpush1.bf16.msra.mxu0 %v5358_v11  ;;  %v697_v11 = vld [vmem:[#allocation2 + $0xb50] sm:$0xff] }
 0x26d   :  { %4051 = vmatpush1.bf16.msra.mxu1 %v5360_v12  ;;  %3888 = vmatprep.subr.bf16.mxu0 %v5367_v13  ;;  %v701_v12 = vld [vmem:[#allocation2 + $0xb70] sm:$0xff]  ;;  %v698_v13 = vld [vmem:[#allocation2 + $0xb58] sm:$0xff] }
 0x26e   :  { %4052 = vmatprep.subr.bf16.mxu1 %v5369_v14  ;;  %v702_v14 = vld [vmem:[#allocation2 + $0xb78] sm:$0xff]  ;;  %v5423_v17 = vcombine.high %v697_v11, %v701_v12  ;;  %v5422_v21 = vcombine.low %v697_v11, %v701_v12 }
 0x26f   :  { %v5425_v0 = vcombine.high %v698_v13, %v702_v14  ;;  %v5424_v22 = vcombine.low %v698_v13, %v702_v14 }
 0x270   :  { %3889 = vmatpush1.bf16.msra.mxu0 %v5366_v18  ;;  %v705_v18 = vld [vmem:[#allocation2 + $0xb90] sm:$0xff] }
 0x271   :  { %4053 = vmatpush1.bf16.msra.mxu1 %v5368_v60  ;;  %3890 = vmatprep.subr.bf16.mxu0 %v5375_v52  ;;  %v709_v60 = vld [vmem:[#allocation2 + $0xbb0] sm:$0xff]  ;;  %v706_v52 = vld [vmem:[#allocation2 + $0xb98] sm:$0xff] }
 0x272   :  { %4054 = vmatprep.subr.bf16.mxu1 %v5377_v20  ;;  %v710_v20 = vld [vmem:[#allocation2 + $0xbb8] sm:$0xff]  ;;  %v5431_v23 = vcombine.high %v705_v18, %v709_v60  ;;  %v5430_v5 = vcombine.low %v705_v18, %v709_v60 }
 0x273   :  { %v5433_v24 = vcombine.high %v706_v52, %v710_v20  ;;  %v5432_v30 = vcombine.low %v706_v52, %v710_v20  ;;  %v761_v20 = vld [vmem:[#allocation2 + $0xd50] sm:$0xff] }
 0x274   :  { %3891 = vmatpush1.bf16.msra.mxu0 %v5374_v4  ;;  %v713_v4 = vld [vmem:[#allocation2 + $0xbd0] sm:$0xff] }
 0x275   :  { %4055 = vmatpush1.bf16.msra.mxu1 %v5376_v25  ;;  %3892 = vmatprep.subr.bf16.mxu0 %v5383_v41  ;;  %v717_v25 = vld [vmem:[#allocation2 + $0xbf0] sm:$0xff]  ;;  %v714_v41 = vld [vmem:[#allocation2 + $0xbd8] sm:$0xff] }
 0x276   :  { %4056 = vmatprep.subr.bf16.mxu1 %v5385_v27  ;;  %v718_v27 = vld [vmem:[#allocation2 + $0xbf8] sm:$0xff]  ;;  %v5439_v35 = vcombine.high %v713_v4, %v717_v25  ;;  %v5438_v46 = vcombine.low %v713_v4, %v717_v25 }
 0x277   :  { %v5441_v37 = vcombine.high %v714_v41, %v718_v27  ;;  %v5440_v47 = vcombine.low %v714_v41, %v718_v27  ;;  %v769_v41 = vld [vmem:[#allocation2 + $0xd90] sm:$0xff] }
 0x278   :  { %3893 = vmatpush1.bf16.msra.mxu0 %v5382_v38  ;;  %v721_v38 = vld [vmem:[#allocation2 + $0xc10] sm:$0xff] }
 0x279   :  { %4057 = vmatpush1.bf16.msra.mxu1 %v5384_v39  ;;  %3894 = vmatprep.subr.bf16.mxu0 %v5391_v43  ;;  %v725_v39 = vld [vmem:[#allocation2 + $0xc30] sm:$0xff]  ;;  %v722_v43 = vld [vmem:[#allocation2 + $0xc18] sm:$0xff] }
 0x27a   :  { %4058 = vmatprep.subr.bf16.mxu1 %v5393_v45  ;;  %v726_v45 = vld [vmem:[#allocation2 + $0xc38] sm:$0xff]  ;;  %v5447_v49 = vcombine.high %v721_v38, %v725_v39  ;;  %v5446_v59 = vcombine.low %v721_v38, %v725_v39  ;;  %v773_v27 = vld [vmem:[#allocation2 + $0xdb0] sm:$0xff] }
 0x27b   :  { %v5449_v50 = vcombine.high %v722_v43, %v726_v45  ;;  %v5448_v44 = vcombine.low %v722_v43, %v726_v45  ;;  %v5495_v38 = vcombine.high %v769_v41, %v773_v27  ;;  %v777_v43 = vld [vmem:[#allocation2 + $0xdd0] sm:$0xff] }
 0x27c   :  { %3895 = vmatpush1.bf16.msra.mxu0 %v5390_v58  ;;  %v729_v58 = vld [vmem:[#allocation2 + $0xc50] sm:$0xff] }
 0x27d   :  { %4059 = vmatpush1.bf16.msra.mxu1 %v5392_v53  ;;  %3896 = vmatprep.subr.bf16.mxu0 %v5399_v55  ;;  %v733_v53 = vld [vmem:[#allocation2 + $0xc70] sm:$0xff]  ;;  %v730_v55 = vld [vmem:[#allocation2 + $0xc58] sm:$0xff] }
 0x27e   :  { %4060 = vmatprep.subr.bf16.mxu1 %v5401_v57  ;;  %v734_v57 = vld [vmem:[#allocation2 + $0xc78] sm:$0xff]  ;;  %v5455_v61 = vcombine.high %v729_v58, %v733_v53  ;;  %v781_v45 = vld [vmem:[#allocation2 + $0xdf0] sm:$0xff] }
 0x27f   :  { %v5457_v62 = vcombine.high %v730_v55, %v734_v57  ;;  %v5456_v3 = vcombine.low %v730_v55, %v734_v57 }
 0x280   :  { %3897 = vmatpush1.bf16.msra.mxu0 %v5398_v63  ;;  %v737_v63 = vld [vmem:[#allocation2 + $0xc90] sm:$0xff] }
 0x281   :  { %4061 = vmatpush1.bf16.msra.mxu1 %v5400_v31  ;;  %3898 = vmatprep.subr.bf16.mxu0 %v5407_v1  ;;  %v741_v31 = vld [vmem:[#allocation2 + $0xcb0] sm:$0xff]  ;;  %v5454_v1 = vcombine.low %v729_v58, %v733_v53  ;;  %v5503_v58 = vcombine.high %v777_v43, %v781_v45 }
 0x282   :  { %4062 = vmatprep.subr.bf16.mxu1 %v5409_v2  ;;  %v738_v2 = vld [vmem:[#allocation2 + $0xc98] sm:$0xff]  ;;  %v5463_v6 = vcombine.high %v737_v63, %v741_v31  ;;  %v5462_v11 = vcombine.low %v737_v63, %v741_v31 }
 0x283   :  { %v5464_v12 = vcombine.low %v738_v2, %v742_v54  ;;  %v786_v63 = vld [vmem:[#allocation2 + $0xe18] sm:$0xff] }
 0x284   :  { %3899 = vmatpush1.bf16.msra.mxu0 %v5406_v8  ;;  %v749_v8 = vld [vmem:[#allocation2 + $0xcf0] sm:$0xff]  ;;  %v790_v31 = vld [vmem:[#allocation2 + $0xe38] sm:$0xff] }
 0x285   :  { %4063 = vmatpush1.bf16.msra.mxu1 %v5408_v9  ;;  %3900 = vmatprep.subr.bf16.mxu0 %v5415_v10  ;;  %v5465_v9 = vcombine.high %v738_v2, %v742_v54  ;;  %v746_v10 = vld [vmem:[#allocation2 + $0xcd8] sm:$0xff]  ;;  %v5471_v13 = vcombine.high %v745_v7, %v749_v8  ;;  %v5470_v18 = vcombine.low %v745_v7, %v749_v8  ;;  %v793_v8 = vld [vmem:[#allocation2 + $0xe50] sm:$0xff] }
 0x286   :  { %4064 = vmatprep.subr.bf16.mxu1 %v5417_v48  ;;  %v750_v48 = vld [vmem:[#allocation2 + $0xcf8] sm:$0xff]  ;;  %v5502_v54 = vcombine.low %v777_v43, %v781_v45  ;;  %v5513_v7 = vcombine.high %v786_v63, %v790_v31 }
 0x287   :  { %v5473_v14 = vcombine.high %v746_v10, %v750_v48 }
 0x288   :  { %3901 = vmatpush1.bf16.msra.mxu0 %v5414_v15  ;;  %v753_v15 = vld [vmem:[#allocation2 + $0xd10] sm:$0xff] }
 0x289   :  { %4065 = vmatpush1.bf16.msra.mxu1 %v5416_v16  ;;  %3902 = vmatprep.subr.bf16.mxu0 %v5423_v17  ;;  %v757_v16 = vld [vmem:[#allocation2 + $0xd30] sm:$0xff]  ;;  %v754_v17 = vld [vmem:[#allocation2 + $0xd18] sm:$0xff] }
 0x28a   :  { %4066 = vmatprep.subr.bf16.mxu1 %v5425_v0  ;;  %v758_v0 = vld [vmem:[#allocation2 + $0xd38] sm:$0xff]  ;;  %v5479_v60 = vcombine.high %v753_v15, %v757_v16 }
 0x28b   :  { %v5481_v52 = vcombine.high %v754_v17, %v758_v0 }
 0x28c   :  { %3903 = vmatpush1.bf16.msra.mxu0 %v5422_v21  ;;  %v765_v21 = vld [vmem:[#allocation2 + $0xd70] sm:$0xff] }
 0x28d   :  { %4067 = vmatpush1.bf16.msra.mxu1 %v5424_v22  ;;  %3904 = vmatprep.subr.bf16.mxu0 %v5431_v23  ;;  %v762_v22 = vld [vmem:[#allocation2 + $0xd58] sm:$0xff]  ;;  %v5487_v4 = vcombine.high %v761_v20, %v765_v21 }
 0x28e   :  { %4068 = vmatprep.subr.bf16.mxu1 %v5433_v24  ;;  %v766_v23 = vld [vmem:[#allocation2 + $0xd78] sm:$0xff]  ;;  %v5480_v24 = vcombine.low %v754_v17, %v758_v0  ;;  %v801_v17 = vld [vmem:[#allocation2 + $0xe90] sm:$0xff] }
 0x28f   :  { %v5489_v25 = vcombine.high %v762_v22, %v766_v23  ;;  %v805_v0 = vld [vmem:[#allocation2 + $0xeb0] sm:$0xff] }
 0x290   :  { %3905 = vmatpush1.bf16.msra.mxu0 %v5430_v5  ;;  %v770_v5 = vld [vmem:[#allocation2 + $0xd98] sm:$0xff] }
 0x291   :  { %4069 = vmatpush1.bf16.msra.mxu1 %v5432_v30  ;;  %3906 = vmatprep.subr.bf16.mxu0 %v5439_v35  ;;  %v774_v30 = vld [vmem:[#allocation2 + $0xdb8] sm:$0xff]  ;;  %v5486_v35 = vcombine.low %v761_v20, %v765_v21  ;;  %v5527_v20 = vcombine.high %v801_v17, %v805_v0 }
 0x292   :  { %4070 = vmatprep.subr.bf16.mxu1 %v5441_v37  ;;  %v5488_v37 = vcombine.low %v762_v22, %v766_v23  ;;  %v5497_v39 = vcombine.high %v770_v5, %v774_v30  ;;  %v809_v22 = vld [vmem:[#allocation2 + $0xed0] sm:$0xff] }
 0x293   :  { %v813_v23 = vld [vmem:[#allocation2 + $0xef0] sm:$0xff] }
 0x294   :  { %3907 = vmatpush1.bf16.msra.mxu0 %v5438_v46  ;;  %v778_v46 = vld [vmem:[#allocation2 + $0xdd8] sm:$0xff] }
 0x295   :  { %4071 = vmatpush1.bf16.msra.mxu1 %v5440_v47  ;;  %3908 = vmatprep.subr.bf16.mxu0 %v5447_v49  ;;  %v782_v47 = vld [vmem:[#allocation2 + $0xdf8] sm:$0xff]  ;;  %v5494_v49 = vcombine.low %v769_v41, %v773_v27  ;;  %v5535_v41 = vcombine.high %v809_v22, %v813_v23 }
 0x296   :  { %4072 = vmatprep.subr.bf16.mxu1 %v5449_v50  ;;  %v5496_v50 = vcombine.low %v770_v5, %v774_v30  ;;  %v5505_v57 = vcombine.high %v778_v46, %v782_v47  ;;  %v817_v5 = vld [vmem:[#allocation2 + $0xf10] sm:$0xff] }
 0x297   :  { %v821_v30 = vld [vmem:[#allocation2 + $0xf30] sm:$0xff] }
 0x298   :  { %3909 = vmatpush1.bf16.msra.mxu0 %v5446_v59  ;;  %v785_v59 = vld [vmem:[#allocation2 + $0xe10] sm:$0xff]  ;;  %v5543_v43 = vcombine.high %v817_v5, %v821_v30 }
 0x299   :  { %4073 = vmatpush1.bf16.msra.mxu1 %v5448_v44  ;;  %3919 = vmatprep.subr.bf16.mxu0 %v5455_v61  ;;  %v789_v44 = vld [vmem:[#allocation2 + $0xe30] sm:$0xff] }
 0x29a   :  { %4083 = vmatprep.subr.bf16.mxu1 %v5457_v62 }
 0x29b   :  { %3911 = vmatmul.mubr.bf16.vlgmr.msra.gmra.mrb[12].mxu0 %v6164_v29 }
 0x29c   :  { %4075 = vmatmul.mubr.bf16.vlgmr.msra.gmra.mrb[12].mxu1 %v6164_v29  ;;  %3920 = vmatpush1.bf16.msra.mxu0 %v5454_v1  ;;  %v5472_v29 = vcombine.low %v746_v10, %v750_v48 }
 0x29d   :  { %3951 = vmatprep.mubr.bf16.mxu0 %v6166_v42  ;;  %4084 = vmatpush1.bf16.msra.mxu1 %v5456_v3  ;;  %v5504_v3 = vcombine.low %v778_v46, %v782_v47  ;;  %v825_v46 = vld [vmem:[#allocation2 + $0xf50] sm:$0xff] }
 0x29e   :  { %4115 = vmatprep.mubr.bf16.mxu1 %v6166_v42  ;;  %3921 = vmatprep.subr.bf16.mxu0 %v5463_v6  ;;  %v5478_v42 = vcombine.low %v753_v15, %v757_v16  ;;  %v5511_v6 = vcombine.high %v785_v59, %v789_v44  ;;  %v829_v47 = vld [vmem:[#allocation2 + $0xf70] sm:$0xff] }
 0x29f   :  { %4085 = vmatprep.subr.bf16.mxu1 %v5465_v9  ;;  %v797_v9 = vld [vmem:[#allocation2 + $0xe70] sm:$0xff] }
 0x2a0   :  { %3922 = vmatpush1.bf16.msra.mxu0 %v5462_v11  ;;  %v794_v11 = vld [vmem:[#allocation2 + $0xe58] sm:$0xff]  ;;  %v5519_v15 = vcombine.high %v793_v8, %v797_v9 }
 0x2a1   :  { %4086 = vmatpush1.bf16.msra.mxu1 %v5464_v12  ;;  %3923 = vmatprep.subr.bf16.mxu0 %v5471_v13  ;;  %v798_v12 = vld [vmem:[#allocation2 + $0xe78] sm:$0xff]  ;;  %v5510_v13 = vcombine.low %v785_v59, %v789_v44 }
 0x2a2   :  { %4087 = vmatprep.subr.bf16.mxu1 %v5473_v14  ;;  %v5512_v14 = vcombine.low %v786_v63, %v790_v31  ;;  %v5521_v16 = vcombine.high %v794_v11, %v798_v12  ;;  %v857_v59 = vld [vmem:[#allocation6 + $0x1] ss:$8 sm:$0xf0]  ;;  %v5551_v63 = vcombine.high %v825_v46, %v829_v47 }
 0x2a4   :  { %3924 = vmatpush1.bf16.msra.mxu0 %v5470_v18  ;;  %v802_v18 = vld [vmem:[#allocation2 + $0xe98] sm:$0xff] }
 0x2a5   :  { %4088 = vmatpush1.bf16.msra.mxu1 %v5472_v29  ;;  %3925 = vmatprep.subr.bf16.mxu0 %v5479_v60  ;;  %v806_v29 = vld [vmem:[#allocation2 + $0xeb8] sm:$0xff]  ;;  %v5518_v60 = vcombine.low %v793_v8, %v797_v9 }
 0x2a6   :  { %4089 = vmatprep.subr.bf16.mxu1 %v5481_v52  ;;  %v5520_v52 = vcombine.low %v794_v11, %v798_v12  ;;  %v5529_v21 = vcombine.high %v802_v18, %v806_v29  ;;  %v845_v11 = vld [vmem:[#allocation2 + $0xff0] sm:$0xff]  ;;  %v842_v12 = vld [vmem:[#allocation2 + $0xfd8] sm:$0xff] }
 0x2a8   :  { %3926 = vmatpush1.bf16.msra.mxu0 %v5478_v42  ;;  %v810_v42 = vld [vmem:[#allocation2 + $0xed8] sm:$0xff] }
 0x2a9   :  { %4090 = vmatpush1.bf16.msra.mxu1 %v5480_v24  ;;  %3927 = vmatprep.subr.bf16.mxu0 %v5487_v4  ;;  %v814_v24 = vld [vmem:[#allocation2 + $0xef8] sm:$0xff]  ;;  %v5526_v4 = vcombine.low %v801_v17, %v805_v0 }
 0x2aa   :  { %4091 = vmatprep.subr.bf16.mxu1 %v5489_v25  ;;  %v5528_v25 = vcombine.low %v802_v18, %v806_v29  ;;  %v5537_v27 = vcombine.high %v810_v42, %v814_v24  ;;  %v849_v29 = vld [vmem:[#allocation2 + $0x1010] sm:$0xff] }
 0x2ac   :  { %3928 = vmatpush1.bf16.msra.mxu0 %v5486_v35  ;;  %v818_v35 = vld [vmem:[#allocation2 + $0xf18] sm:$0xff] }
 0x2ad   :  { %4092 = vmatpush1.bf16.msra.mxu1 %v5488_v37  ;;  %3929 = vmatprep.subr.bf16.mxu0 %v5495_v38  ;;  %v822_v37 = vld [vmem:[#allocation2 + $0xf38] sm:$0xff]  ;;  %v5534_v38 = vcombine.low %v809_v22, %v813_v23 }
 0x2ae   :  { %v6195_v53 = vpop.f32.mrb[8].mxu0  ;;  %v6197_v55 = vpop.f32.mrb[8].mxu1  ;;  %4093 = vmatprep.subr.bf16.mxu1 %v5497_v39  ;;  %v5536_v39 = vcombine.low %v810_v42, %v814_v24  ;;  %v5545_v45 = vcombine.high %v818_v35, %v822_v37  ;;  %v5544_v44 = vcombine.low %v818_v35, %v822_v37  ;;  %v5874_v37 = vld [vmem:[#allocation4 + $0x48] sm:$0xff]  }
 0x2af   :  { %v6199_v61 = vpop.f32.mrb[9].mxu0  ;;  %v6201_v62 = vpop.f32.mrb[9].mxu1 }
 0x2b0   :  { %v3629_v1 = vpop.f32.mrb[10].mxu0  ;;  %v3793_v2 = vpop.f32.mrb[10].mxu1  ;;  %3930 = vmatpush1.bf16.msra.mxu0 %v5494_v49  ;;  %v826_v49 = vld [vmem:[#allocation2 + $0xf58] sm:$0xff] }
 0x2b1   :  { %4094 = vmatpush1.bf16.msra.mxu1 %v5496_v50  ;;  %3931 = vmatprep.subr.bf16.mxu0 %v5503_v58  ;;  %v3630_v10 = vpop.f32.mrb[11].mxu0  ;;  %v3794_v48 = vpop.f32.mrb[11].mxu1  ;;  %v830_v50 = vld [vmem:[#allocation2 + $0xf78] sm:$0xff]  ;;  %v5542_v58 = vcombine.low %v817_v5, %v821_v30  ;;  %v833_v1 = vld [vmem:[#allocation2 + $0xf90] sm:$0xff]  ;;  %v5873_v30 = vld [vmem:[#allocation4 + $0x80] sm:$0xff]  }
 0x2b2   :  { %4095 = vmatprep.subr.bf16.mxu1 %v5505_v57  ;;  %v856_v57 = vld [vmem:[#allocation6 + $0x1] ss:$8 sm:$0xf]  ;;  %v5553_v31 = vcombine.high %v826_v49, %v830_v50  ;;  %v5552_v8 = vcombine.low %v826_v49, %v830_v50 }
 0x2b3   :  { %v837_v2 = vld [vmem:[#allocation2 + $0xfb0] sm:$0xff] }
 0x2b4   :  { %3932 = vmatpush1.bf16.msra.mxu0 %v5502_v54  ;;  %v834_v54 = vld [vmem:[#allocation2 + $0xf98] sm:$0xff]  ;;  %v5559_v9 = vcombine.high %v833_v1, %v837_v2  ;;  %v841_v48 = vld [vmem:[#allocation2 + $0xfd0] sm:$0xff] }
 0x2b5   :  { %4096 = vmatpush1.bf16.msra.mxu1 %v5504_v3  ;;  %3933 = vmatprep.subr.bf16.mxu0 %v5511_v6  ;;  %v838_v3 = vld [vmem:[#allocation2 + $0xfb8] sm:$0xff]  ;;  %v6203_v6 = vor.u32 %v857_v59, %v856_v57  ;;  %v5567_v0 = vcombine.high %v841_v48, %v845_v11  ;;  %v5879_v49 = vld [vmem:[#allocation4 + $0xd0] sm:$0xff]  }
 0x2b6   :  { %4097 = vmatprep.subr.bf16.mxu1 %v5513_v7  ;;  %v5550_v7 = vcombine.low %v825_v46, %v829_v47  ;;  %v5561_v10 = vcombine.high %v834_v54, %v838_v3  ;;  %v5560_v17 = vcombine.low %v834_v54, %v838_v3  ;;  %v5877_v46 = vld [vmem:[#allocation4 + $0x88] sm:$0xff]   ;;  %v5878_v47 = vld [vmem:[#allocation4 + $0x50] sm:$0xff]   ;;  %v5882_v57 = vld [vmem:[#allocation4 + $0x58] sm:$0xff]  }
 0x2b7   :  { %v5880_v50 = vld [vmem:[#allocation4 + $0x10] sm:$0xff]   ;;  %v5883_v59 = vld [vmem:[#allocation4 + $0xd8] sm:$0xff]   ;;  %v5890_v54 = vld [vmem:[#allocation4 + $0x68] sm:$0xff]   ;;  %v871_v3 = vrot.slane %v6203_v6, %v73_v32 }
 0x2b8   :  { %3934 = vmatpush1.bf16.msra.mxu0 %v5510_v13  ;;  %v846_v13 = vld [vmem:[#allocation2 + $0xff8] sm:$0xff]  ;;  %v5896_v32 = vld [vmem:[#allocation4 + $0x30] sm:$0xff]  }
 0x2b9   :  { %4098 = vmatpush1.bf16.msra.mxu1 %v5512_v14  ;;  %3935 = vmatprep.subr.bf16.mxu0 %v5519_v15  ;;  %v875_v14 = vrot.slane %v6203_v6, %v77_v33  ;;  %v5558_v15 = vcombine.low %v833_v1, %v837_v2  ;;  %v5569_v18 = vcombine.high %v842_v12, %v846_v13  ;;  %v5888_v1 = vld [vmem:[#allocation4 + $0x20] sm:$0xff]  }
 0x2ba   :  { %4099 = vmatprep.subr.bf16.mxu1 %v5521_v16  ;;  %v883_v16 = vrot.slane %v6203_v6, %v85_v34  ;;  %v5566_v33 = vcombine.low %v841_v48, %v845_v11  ;;  %v5568_v23 = vcombine.low %v842_v12, %v846_v13  ;;  %v5889_v2 = vld [vmem:[#allocation4 + $0xa0] sm:$0xff]   ;;  %v5894_v48 = vld [vmem:[#allocation4 + $0x70] sm:$0xff]   ;;  %v5804_v11 = vadd.f32 %v6195_v53, %v871_v3  ;;  %v5901_v53 = vld [vmem:[#allocation4 + $0xb8] sm:$0xff]  }
 0x2bb   :  { %v5895_v12 = vld [vmem:[#allocation4 + $0xf0] sm:$0xff]  }
 0x2bc   :  { %3936 = vmatpush1.bf16.msra.mxu0 %v5518_v60  ;;  %v853_v60 = vld [vmem:[#allocation2 + $0x1030] sm:$0xff]  ;;  %v5807_v22 = vadd.f32 %v6201_v62, %v883_v16  ;;  %v5872_v62 = vld [vmem:[#allocation4] sm:$0xff]   ;;  %v4132_v16 = vmul.f32 0.01, %v5804_v11  ;;  %vm4124_vm11 = vcmp.ge.f32.partialorder %v5804_v11, 0.0 }
 0x2bd   :  { %4100 = vmatpush1.bf16.msra.mxu1 %v5520_v52  ;;  %3937 = vmatprep.subr.bf16.mxu0 %v5527_v20  ;;  %v850_v52 = vld [vmem:[#allocation2 + $0x1018] sm:$0xff]  ;;  %v5575_v34 = vcombine.high %v849_v29, %v853_v60 }
 0x2be   :  { %4101 = vmatprep.subr.bf16.mxu1 %v5529_v21  ;;  %v854_v20 = vld [vmem:[#allocation2 + $0x1038] sm:$0xff]  ;;  %v5805_v21 = vadd.f32 %v6199_v61, %v875_v14  ;;  %vm4127_vm10 = vcmp.ge.f32.partialorder %v5807_v22, 0.0  ;;  %v5871_v61 = vld [vmem:[#allocation4 + $0xc0] sm:$0xff]   ;;  %v5897_v14 = vld [vmem:[#allocation4 + $0xb0] sm:$0xff]  }
 0x2bf   :  { %v5577_v42 = vcombine.high %v850_v52, %v854_v20 }
 0x2c0   :  { %3938 = vmatpush1.bf16.msra.mxu0 %v5526_v4  ;;  %v4133_v24 = vmul.f32 0.01, %v5805_v21  ;;  %v5574_v4 = vcombine.low %v849_v29, %v853_v60  ;;  %vm4125_vm9 = vcmp.ge.f32.partialorder %v5805_v21, 0.0  ;;  %v4140_v29 = vsel %vm4124_vm11, %v5804_v11, %v4132_v16 }
 0x2c1   :  { %4102 = vmatpush1.bf16.msra.mxu1 %v5528_v25  ;;  %3939 = vmatprep.subr.bf16.mxu0 %v5535_v41  ;;  %v4135_v25 = vmul.f32 0.01, %v5807_v22  ;;  %v5576_v41 = vcombine.low %v850_v52, %v854_v20  ;;  %v5904_v52 = vld [vmem:[#allocation4 + $0x100] sm:$0xff]   ;;  %v4277_v20 = vpack.c.bf16 %v4140_v29, %v4140_v29 }
 0x2c2   :  { %4103 = vmatprep.subr.bf16.mxu1 %v5537_v27  ;;  %v5870_v27 = vld [vmem:[#allocation4 + $0x40] sm:$0xff]   ;;  %v4141_v5 = vsel %vm4125_vm9, %v5805_v21, %v4133_v24  ;;  %v5910_v24 = vld [vmem:[#allocation4 + $0x150] sm:$0xff]  }
 0x2c3   :  { %v4143_v35 = vsel %vm4127_vm10, %v5807_v22, %v4135_v25  ;;  %v5905_v21 = vld [vmem:[#allocation4 + $0x180] sm:$0xff]   ;;  %v5912_v25 = vld [vmem:[#allocation4 + $0x110] sm:$0xff]  }
 0x2c4   :  { %3940 = vmatpush1.bf16.msra.mxu0 %v5534_v38  ;;  %v4278_v38 = vpack.c.bf16 %v4141_v5, %v4141_v5  ;;  %v5917_v5 = vld [vmem:[#allocation4 + $0x198] sm:$0xff]  }
 0x2c5   :  { %4104 = vmatpush1.bf16.msra.mxu1 %v5536_v39  ;;  %3941 = vmatprep.subr.bf16.mxu0 %v5543_v43  ;;  %v5875_v39 = vld [vmem:[#allocation4 + $0xc8] sm:$0xff]   ;;  %v4280_v43 = vpack.c.bf16 %v4143_v35, %v4143_v35  ;;  %v5919_v35 = vld [vmem:[#allocation4 + $0x1e0] sm:$0xff]  }
 0x2c6   :  { %4105 = vmatprep.subr.bf16.mxu1 %v5545_v45  ;;  %v5876_v45 = vld [vmem:[#allocation4 + $0x8] sm:$0xff]  }
 0x2c8   :  { %3942 = vmatpush1.bf16.msra.mxu0 %v5542_v58  ;;  %v5881_v58 = vld [vmem:[#allocation4 + $0x90] sm:$0xff]  }
 0x2c9   :  { %4106 = vmatpush1.bf16.msra.mxu1 %v5544_v44  ;;  %3943 = vmatprep.subr.bf16.mxu0 %v5551_v63  ;;  %v5885_v44 = vld [vmem:[#allocation4 + $0x98] sm:$0xff]   ;;  %v5886_v63 = vld [vmem:[#allocation4 + $0x60] sm:$0xff]  }
 0x2ca   :  { %4107 = vmatprep.subr.bf16.mxu1 %v5553_v31  ;;  %v5887_v31 = vld [vmem:[#allocation4 + $0xe0] sm:$0xff]  }
 0x2cc   :  { %3944 = vmatpush1.bf16.msra.mxu0 %v5550_v7  ;;  %v5891_v7 = vld [vmem:[#allocation4 + $0xe8] sm:$0xff]  }
 0x2cd   :  { %4108 = vmatpush1.bf16.msra.mxu1 %v5552_v8  ;;  %3945 = vmatprep.subr.bf16.mxu0 %v5559_v9  ;;  %v879_v8 = vrot.slane %v6203_v6, %v81_v51  ;;  %v5892_v9 = vld [vmem:[#allocation4 + $0x28] sm:$0xff]   ;;  %v5899_v51 = vld [vmem:[#allocation4 + $0xf8] sm:$0xff]  }
 0x2ce   :  { %4109 = vmatprep.subr.bf16.mxu1 %v5561_v10  ;;  %v5893_v10 = vld [vmem:[#allocation4 + $0xa8] sm:$0xff]  }
 0x2cf   :  { %v5806_v13 = vadd.f32 %v6197_v55, %v879_v8  ;;  %v5903_v55 = vld [vmem:[#allocation4 + $0x1c0] sm:$0xff]  }
 0x2d0   :  { %3946 = vmatpush1.bf16.msra.mxu0 %v5558_v15  ;;  %v5898_v15 = vld [vmem:[#allocation4 + $0x78] sm:$0xff]  }
 0x2d1   :  { %4110 = vmatpush1.bf16.msra.mxu1 %v5560_v17  ;;  %3947 = vmatprep.subr.bf16.mxu0 %v5567_v0  ;;  %v4134_v17 = vmul.f32 0.01, %v5806_v13  ;;  %vm4126_vm12 = vcmp.ge.f32.partialorder %v5806_v13, 0.0  ;;  %v5900_v0 = vld [vmem:[#allocation4 + $0x38] sm:$0xff]  }
 0x2d2   :  { %4111 = vmatprep.subr.bf16.mxu1 %v5569_v18  ;;  %v5902_v18 = vld [vmem:[#allocation4 + $0x140] sm:$0xff]  }
 0x2d3   :  { %v4142_v60 = vsel %vm4126_vm12, %v5806_v13, %v4134_v17 }
 0x2d4   :  { %3948 = vmatpush1.bf16.msra.mxu0 %v5566_v33  ;;  %v5906_v33 = vld [vmem:[#allocation4 + $0x148] sm:$0xff]   ;;  %v4279_v22 = vpack.c.bf16 %v4142_v60, %v4142_v60  ;;  %v5936_v60 = vld [vmem:[#allocation4 + $0x210] sm:$0xff]  }
 0x2d5   :  { %4112 = vmatpush1.bf16.msra.mxu1 %v5568_v23  ;;  %3949 = vmatprep.subr.bf16.mxu0 %v5575_v34  ;;  %v5907_v23 = vld [vmem:[#allocation4 + $0x1c8] sm:$0xff]  }
 0x2d6   :  { %4113 = vmatprep.subr.bf16.mxu1 %v5577_v42  ;;  %v5908_v34 = vld [vmem:[#allocation4 + $0x108] sm:$0xff]  }
 0x2d7   :  { %v5909_v42 = vld [vmem:[#allocation4 + $0x188] sm:$0xff]  }
 0x2d8   :  { %3950 = vmatpush1.bf16.msra.mxu0 %v5574_v4  ;;  %v5911_v4 = vld [vmem:[#allocation4 + $0x1d0] sm:$0xff]  }
 0x2d9   :  { %4114 = vmatpush1.bf16.msra.mxu1 %v5576_v41  ;;  %5658 = vmatprep.subr.bf16.mxu0 %v5870_v27  ;;  %v5913_v41 = vld [vmem:[#allocation4 + $0x190] sm:$0xff]   ;;  %v5914_v27 = vld [vmem:[#allocation4 + $0x158] sm:$0xff]  }
 0x2da   :  { %5680 = vmatprep.subr.bf16.mxu1 %v5871_v61  ;;  %v5915_v61 = vld [vmem:[#allocation4 + $0x1d8] sm:$0xff]  }
 0x2db   :  { %3952 = vmatmul.mubr.bf16.vlgmr.msra.gmra.mrb[12].mxu0 %v6177_v19 }
 0x2dc   :  { %4116 = vmatmul.mubr.bf16.vlgmr.msra.gmra.mrb[12].mxu1 %v6177_v19  ;;  %5659 = vmatpush3.bf16.msra.mxu0 %v5872_v62  ;;  %v5884_v19 = vld [vmem:[#allocation4 + $0x18] sm:$0xff]  }
 0x2dd   :  { %4701 = vmatprep.mubr.bf16.mxu0 %v4278_v38  ;;  %5681 = vmatpush3.bf16.msra.mxu1 %v5873_v30  ;;  %v5916_v62 = vld [vmem:[#allocation4 + $0x118] sm:$0xff]   ;;  %v5918_v30 = vld [vmem:[#allocation4 + $0x160] sm:$0xff]  }
 0x2de   :  { %4741 = vmatprep.mubr.bf16.mxu1 %v4280_v43  ;;  %5660 = vmatprep.subr.bf16.mxu0 %v5874_v37  ;;  %v5920_v37 = vld [vmem:[#allocation4 + $0x120] sm:$0xff]   ;;  %v5923_v43 = vld [vmem:[#allocation4 + $0x1e8] sm:$0xff]  }
 0x2df   :  { %5682 = vmatprep.subr.bf16.mxu1 %v5875_v39  ;;  %v5921_v38 = vld [vmem:[#allocation4 + $0x1a0] sm:$0xff]   ;;  %v5922_v39 = vld [vmem:[#allocation4 + $0x168] sm:$0xff]  }
 0x2e0   :  { %5661 = vmatpush3.bf16.msra.mxu0 %v5876_v45  ;;  %v5924_v45 = vld [vmem:[#allocation4 + $0x128] sm:$0xff]  }
 0x2e1   :  { %5683 = vmatpush3.bf16.msra.mxu1 %v5877_v46  ;;  %5662 = vmatprep.subr.bf16.mxu0 %v5878_v47  ;;  %v5925_v46 = vld [vmem:[#allocation4 + $0x1a8] sm:$0xff]   ;;  %v5926_v47 = vld [vmem:[#allocation4 + $0x170] sm:$0xff]  }
 0x2e2   :  { %5684 = vmatprep.subr.bf16.mxu1 %v5879_v49  ;;  %v5927_v49 = vld [vmem:[#allocation4 + $0x1f0] sm:$0xff]  }
 0x2e4   :  { %5663 = vmatpush3.bf16.msra.mxu0 %v5880_v50  ;;  %v5928_v50 = vld [vmem:[#allocation4 + $0x130] sm:$0xff]  }
 0x2e5   :  { %5685 = vmatpush3.bf16.msra.mxu1 %v5881_v58  ;;  %5664 = vmatprep.subr.bf16.mxu0 %v5882_v57  ;;  %v5929_v58 = vld [vmem:[#allocation4 + $0x1b0] sm:$0xff]   ;;  %v5930_v57 = vld [vmem:[#allocation4 + $0x178] sm:$0xff]  }
 0x2e6   :  { %5686 = vmatprep.subr.bf16.mxu1 %v5883_v59  ;;  %v5931_v59 = vld [vmem:[#allocation4 + $0x1f8] sm:$0xff]  }
 0x2e8   :  { %5665 = vmatpush3.bf16.msra.mxu0 %v5884_v19  ;;  %v5932_v19 = vld [vmem:[#allocation4 + $0x138] sm:$0xff]  }
 0x2e9   :  { %5687 = vmatpush3.bf16.msra.mxu1 %v5885_v44  ;;  %5666 = vmatprep.subr.bf16.mxu0 %v5886_v63  ;;  %v5933_v44 = vld [vmem:[#allocation4 + $0x1b8] sm:$0xff]   ;;  %v6028_v63 = vmov 0.0  }
 0x2ea   :  { %5688 = vmatprep.subr.bf16.mxu1 %v5887_v31  ;;  %v887_v31 = vrot.slane %v6203_v6, %v89_v36 }
 0x2ec   :  { %5667 = vmatpush3.bf16.msra.mxu0 %v5888_v1  ;;  %v895_v1 = vrot.slane %v6203_v6, %v97_v26 }
 0x2ed   :  { %5689 = vmatpush3.bf16.msra.mxu1 %v5889_v2  ;;  %5668 = vmatprep.subr.bf16.mxu0 %v5890_v54  ;;  %v891_v2 = vrot.slane %v6203_v6, %v93_v56  ;;  %v899_v54 = vrot.slane %v6203_v6, %v101_v40 }
 0x2ee   :  { %5690 = vmatprep.subr.bf16.mxu1 %v5891_v7 }
 0x2f0   :  { %5669 = vmatpush3.bf16.msra.mxu0 %v5892_v9 }
 0x2f1   :  { %5691 = vmatpush3.bf16.msra.mxu1 %v5893_v10  ;;  %5670 = vmatprep.subr.bf16.mxu0 %v5894_v48 }
 0x2f2   :  { %5692 = vmatprep.subr.bf16.mxu1 %v5895_v12 }
 0x2f4   :  { %5671 = vmatpush3.bf16.msra.mxu0 %v5896_v32 }
 0x2f5   :  { %5693 = vmatpush3.bf16.msra.mxu1 %v5897_v14  ;;  %5672 = vmatprep.subr.bf16.mxu0 %v5898_v15 }
 0x2f6   :  { %5694 = vmatprep.subr.bf16.mxu1 %v5899_v51 }
 0x2f8   :  { %5673 = vmatpush3.bf16.msra.mxu0 %v5900_v0  ;;  %v5934_v0 = vld [vmem:[#allocation4 + $0x200] sm:$0xff]  }
 0x2f9   :  { %5695 = vmatpush3.bf16.msra.mxu1 %v5901_v53  ;;  %5702 = vmatprep.subr.bf16.mxu0 %v5902_v18 }
 0x2fa   :  { %5724 = vmatprep.subr.bf16.mxu1 %v5903_v55  ;;  %v5935_v55 = vld [vmem:[#allocation4 + $0x208] sm:$0xff]  }
 0x2fb   :  { %4702 = vmatmul.mubr.bf16.vlgmr.msra.gmra.mrb[16].mxu0 %v4277_v20  ;;  %v5938_v20 = vld [vmem:[#allocation4 + $0x220] sm:$0xff]  }
 0x2fc   :  { %4742 = vmatmul.mubr.bf16.vlgmr.msra.gmra.mrb[16].mxu1 %v4279_v22  ;;  %5703 = vmatpush3.bf16.msra.mxu0 %v5904_v52  ;;  %v5937_v52 = vld [vmem:[#allocation4 + $0x218] sm:$0xff]   ;;  %v4276_v22 = vld [vmem:[#allocation6 + $0x2] ss:$0 sm:$0xff] }
 0x2fd   :  { %5725 = vmatpush3.bf16.msra.mxu1 %v5905_v21  ;;  %5704 = vmatprep.subr.bf16.mxu0 %v5906_v33 }
 0x2fe   :  { %5726 = vmatprep.subr.bf16.mxu1 %v5907_v23 }
 0x300   :  { %5705 = vmatpush3.bf16.msra.mxu0 %v5908_v34 }
 0x301   :  { %5727 = vmatpush3.bf16.msra.mxu1 %v5909_v42  ;;  %5706 = vmatprep.subr.bf16.mxu0 %v5910_v24 }
 0x302   :  { %5728 = vmatprep.subr.bf16.mxu1 %v5911_v4 }
 0x304   :  { %5707 = vmatpush3.bf16.msra.mxu0 %v5912_v25 }
 0x305   :  { %5729 = vmatpush3.bf16.msra.mxu1 %v5913_v41  ;;  %5708 = vmatprep.subr.bf16.mxu0 %v5914_v27 }
 0x306   :  { %5730 = vmatprep.subr.bf16.mxu1 %v5915_v61 }
 0x308   :  { %5709 = vmatpush3.bf16.msra.mxu0 %v5916_v62 }
 0x309   :  { %5731 = vmatpush3.bf16.msra.mxu1 %v5917_v5  ;;  %5710 = vmatprep.subr.bf16.mxu0 %v5918_v30  ;;  %v5939_v5 = vld [vmem:[#allocation4 + $0x228] sm:$0xff]   ;;  %v5940_v30 = vld [vmem:[#allocation4 + $0x230] sm:$0xff]  }
 0x30a   :  { %5732 = vmatprep.subr.bf16.mxu1 %v5919_v35  ;;  %v5941_v35 = vld [vmem:[#allocation4 + $0x238] sm:$0xff]  }
 0x30c   :  { %5711 = vmatpush3.bf16.msra.mxu0 %v5920_v37  ;;  %v5942_v37 = vld [vmem:[#allocation4 + $0x240] sm:$0xff]  }
 0x30d   :  { %5733 = vmatpush3.bf16.msra.mxu1 %v5921_v38  ;;  %5712 = vmatprep.subr.bf16.mxu0 %v5922_v39  ;;  %v5943_v38 = vld [vmem:[#allocation4 + $0x248] sm:$0xff]   ;;  %v5944_v39 = vld [vmem:[#allocation4 + $0x250] sm:$0xff]  }
 0x30e   :  { %5734 = vmatprep.subr.bf16.mxu1 %v5923_v43  ;;  %v5945_v43 = vld [vmem:[#allocation4 + $0x258] sm:$0xff]  }
 0x310   :  { %5713 = vmatpush3.bf16.msra.mxu0 %v5924_v45  ;;  %v5946_v45 = vld [vmem:[#allocation4 + $0x260] sm:$0xff]  }
 0x311   :  { %5735 = vmatpush3.bf16.msra.mxu1 %v5925_v46  ;;  %5714 = vmatprep.subr.bf16.mxu0 %v5926_v47  ;;  %v5947_v46 = vld [vmem:[#allocation4 + $0x268] sm:$0xff]  }
 0x312   :  { %5736 = vmatprep.subr.bf16.mxu1 %v5927_v49 }
 0x314   :  { %5715 = vmatpush3.bf16.msra.mxu0 %v5928_v50 }
 0x315   :  { %5737 = vmatpush3.bf16.msra.mxu1 %v5929_v58  ;;  %5716 = vmatprep.subr.bf16.mxu0 %v5930_v57 }
 0x316   :  { %5738 = vmatprep.subr.bf16.mxu1 %v5931_v59 }
 0x318   :  { %5717 = vmatpush3.bf16.msra.mxu0 %v5932_v19 }
 0x319   :  { %5739 = vmatpush3.bf16.msra.mxu1 %v5933_v44  ;;  %5764 = vmatprep.subr.bf16.mxu0 %v6028_v63 }
 0x31a   :  { %5784 = vmatprep.subr.bf16.mxu1 %v6028_v63 }
 0x3ae   :  { %v3953_v3 = vpop.f32.mrb[12].mxu0 }
 0x3af   :  { %v5808_v7 = vadd.f32 %v3953_v3, %v887_v31  ;;  %v4117_v8 = vpop.f32.mrb[12].mxu1  ;;  %v3955_v9 = vpop.f32.mrb[13].mxu0 }
 0x3b0   :  { %v5810_v10 = vadd.f32 %v4117_v8, %v895_v1  ;;  %v5809_v48 = vadd.f32 %v3955_v9, %v891_v2  ;;  %v4119_v11 = vpop.f32.mrb[13].mxu1  ;;  %v3957_v36 = vpop.f32.mrb[14].mxu0  ;;  %v5948_v9 = vld [vmem:[#allocation4 + $0x270] sm:$0xff]  }
 0x3b1   :  { %vm4128_vm13 = vcmp.ge.f32.partialorder %v5808_v7, 0.0  ;;  %v4136_v12 = vmul.f32 0.01, %v5808_v7  ;;  %v5811_v13 = vadd.f32 %v4119_v11, %v899_v54  ;;  %v4121_v26 = vpop.f32.mrb[14].mxu1  ;;  %v3958_v32 = vpop.f32.mrb[15].mxu0 }
 0x3b2   :  { %vm4130_vm14 = vcmp.ge.f32.partialorder %v5810_v10, 0.0  ;;  %v4138_v14 = vmul.f32 0.01, %v5810_v10  ;;  %vm4129_vm15 = vcmp.ge.f32.partialorder %v5809_v48, 0.0  ;;  %v4137_v56 = vmul.f32 0.01, %v5809_v48 }
 0x3b3   :  { %v4144_v28 = vsel %vm4128_vm13, %v5808_v7, %v4136_v12  ;;  %vm4131_vm0 = vcmp.ge.f32.partialorder %v5811_v13, 0.0  ;;  %v4139_v40 = vmul.f32 0.01, %v5811_v13  ;;  %v4122_v6 = vpop.f32.mrb[15].mxu1 }
 0x3b4   :  { %v4146_v15 = vsel %vm4130_vm14, %v5810_v10, %v4138_v14  ;;  %v4145_v16 = vsel %vm4129_vm15, %v5809_v48, %v4137_v56  ;;  %v4281_v53 = vpack.c.bf16 %v4144_v28, %v4144_v28  ;;  %v5949_v10 = vld [vmem:[#allocation4 + $0x278] sm:$0xff]   ;;  %v4848_v48 = vld [vmem:[#allocation6 + $0x3] ss:$0 sm:$0xff]  ;;  %v4957_v28 = vld [vmem:[#allocation6 + $0x4] ss:$0 sm:$0xff] }
 0x3b5   :  { %v4282_v51 = vpack.c.bf16 %v4145_v16, %v4145_v16  ;;  %v4147_v17 = vsel %vm4131_vm0, %v5811_v13, %v4139_v40  ;;  %v4283_v29 = vpack.c.bf16 %v4146_v15, %v4146_v15 }
 0x3b6   :  { %v4284_v18 = vpack.c.bf16 %v4147_v17, %v4147_v17 }
 0x3b7   :  { %4781 = vmatprep.mubr.bf16.mxu0 %v4282_v51 }
 0x3b8   :  { %4821 = vmatprep.mubr.bf16.mxu1 %v4284_v18  ;;  %4782 = vmatmul.mubr.bf16.vlgmr.msra.gmra.mrb[20].mxu0 %v4281_v53 }
 0x3b9   :  { %4822 = vmatmul.mubr.bf16.vlgmr.msra.gmra.mrb[20].mxu1 %v4283_v29  ;;  %5765 = vmatpush3.bf16.msra.mxu0 %v5934_v0 }
 0x3ba   :  { %5766 = vmatprep.subr.bf16.mxu0 %v6028_v63  ;;  %5780 = vmatprep.mubr.msk.bf16.mxu0 %vm6029_vm1, %v6028_v63 }
 0x3bb   :  { %5800 = vmatprep.mubr.msk.bf16.mxu1 %vm6029_vm1, %v6028_v63  ;;  %5785 = vmatpush3.bf16.msra.mxu1 %v5942_v37 }
 0x3bc   :  { %5786 = vmatprep.subr.bf16.mxu1 %v6028_v63 }
 0x3bd   :  { %5767 = vmatpush3.bf16.msra.mxu0 %v5935_v55 }
 0x3be   :  { %5768 = vmatprep.subr.bf16.mxu0 %v6028_v63 }
 0x3bf   :  { %5787 = vmatpush3.bf16.msra.mxu1 %v5943_v38 }
 0x3c0   :  { %5788 = vmatprep.subr.bf16.mxu1 %v6028_v63 }
 0x3c1   :  { %5769 = vmatpush3.bf16.msra.mxu0 %v5936_v60 }
 0x3c2   :  { %5770 = vmatprep.subr.bf16.mxu0 %v6028_v63 }
 0x3c3   :  { %5789 = vmatpush3.bf16.msra.mxu1 %v5944_v39 }
 0x3c4   :  { %5790 = vmatprep.subr.bf16.mxu1 %v6028_v63 }
 0x3c5   :  { %5771 = vmatpush3.bf16.msra.mxu0 %v5937_v52 }
 0x3c6   :  { %5772 = vmatprep.subr.bf16.mxu0 %v6028_v63 }
 0x3c7   :  { %5791 = vmatpush3.bf16.msra.mxu1 %v5945_v43 }
 0x3c8   :  { %5792 = vmatprep.subr.bf16.mxu1 %v6028_v63 }
 0x3c9   :  { %5773 = vmatpush3.bf16.msra.mxu0 %v5938_v20 }
 0x3ca   :  { %5774 = vmatprep.subr.bf16.mxu0 %v6028_v63 }
 0x3cb   :  { %5793 = vmatpush3.bf16.msra.mxu1 %v5946_v45 }
 0x3cc   :  { %5794 = vmatprep.subr.bf16.mxu1 %v6028_v63 }
 0x3cd   :  { %5775 = vmatpush3.bf16.msra.mxu0 %v5939_v5 }
 0x3ce   :  { %v5674_v21 = vpop.f32.mrb[16].mxu0  ;;  %5776 = vmatprep.subr.bf16.mxu0 %v6028_v63 }
 0x3cf   :  { %v5696_v33 = vpop.f32.mrb[16].mxu1  ;;  %v5675_v23 = vpop.f32.mrb[17].mxu0  ;;  %5795 = vmatpush3.bf16.msra.mxu1 %v5947_v46 }
 0x3d0   :  { %v5676_v34 = vadd.f32 %v5675_v23, %v5674_v21  ;;  %v5697_v42 = vpop.f32.mrb[17].mxu1  ;;  %v5677_v24 = vpop.f32.mrb[18].mxu0  ;;  %5796 = vmatprep.subr.bf16.mxu1 %v6028_v63 }
 0x3d1   :  { %v5698_v4 = vadd.f32 %v5697_v42, %v5696_v33  ;;  %v5699_v25 = vpop.f32.mrb[18].mxu1  ;;  %v5678_v41 = vpop.f32.mrb[19].mxu0  ;;  %5777 = vmatpush3.bf16.msra.mxu0 %v5940_v30 }
 0x3d2   :  { %v4704_v27 = vadd.f32 %v5676_v34, %v4276_v22  ;;  %v5700_v61 = vpop.f32.mrb[19].mxu1  ;;  %5778 = vmatprep.subr.bf16.mxu0 %v6028_v63 }
 0x3d3   :  { %5797 = vmatpush3.bf16.msra.mxu1 %v5948_v9 }
 0x3d4   :  { %v4744_v62 = vadd.f32 %v5698_v4, %v4704_v27  ;;  %5798 = vmatprep.subr.bf16.mxu1 %v6028_v63 }
 0x3d5   :  { %5779 = vmatpush3.bf16.msra.mxu0 %v5941_v35 }
 0x3d7   :  { %5799 = vmatpush3.bf16.msra.mxu1 %v5949_v10 }
 0x48b   :  { %v5718_v47 = vpop.f32.mrb[20].mxu0 }
 0x48c   :  { %v5740_v49 = vpop.f32.mrb[20].mxu1  ;;  %v5719_v50 = vpop.f32.mrb[21].mxu0 }
 0x48d   :  { %v5720_v58 = vadd.f32 %v5719_v50, %v5718_v47  ;;  %v5741_v57 = vpop.f32.mrb[21].mxu1  ;;  %v5721_v59 = vpop.f32.mrb[22].mxu0 }
 0x48e   :  { %v5742_v19 = vadd.f32 %v5741_v57, %v5740_v49  ;;  %v5743_v44 = vpop.f32.mrb[22].mxu1  ;;  %v5722_v31 = vpop.f32.mrb[23].mxu0 }
 0x48f   :  { %v4784_v1 = vadd.f32 %v5720_v58, %v4744_v62  ;;  %v5744_v2 = vpop.f32.mrb[23].mxu1 }
 0x491   :  { %v4824_v54 = vadd.f32 %v5742_v19, %v4784_v1 }
 0x493   :  { %vm4829_vm2 = vcmp.ge.f32.partialorder %v4824_v54, 0.0  ;;  %v4830_v3 = vmul.f32 0.01, %v4824_v54 }
 0x495   :  { %v4831_v7 = vsel %vm4829_vm2, %v4824_v54, %v4830_v3 }
 0x496   :  { %v4849_v8 = vpack.c.bf16 %v4831_v7, %v4831_v7 }
 0x498   :  { %5781 = vmatmul.mubr.bf16.vlgmr.msra.gmra.mrb[24].mxu0 %v4849_v8 }
 0x56b   :  { %v4932_v11 = vpop.f32.mrb[24].mxu0 }
 0x56c   :  { %v4933_v36 = vadd.f32 %v4932_v11, %v4848_v48  ;;  %v5782_v12 = vpop.f32.mrb[25].mxu0 }
 0x56d   :  { %v4935_v13 = vpop.f32.mrb[26].mxu0 }
 0x56e   :  { %vm4938_vm3 = vcmp.ge.f32.partialorder %v4933_v36, 0.0  ;;  %v4939_v26 = vmul.f32 0.01, %v4933_v36  ;;  %v5783_v32 = vpop.f32.mrb[27].mxu0 }
 0x570   :  { %v4940_v14 = vsel %vm4938_vm3, %v4933_v36, %v4939_v26 }
 0x571   :  { %v4958_v56 = vpack.c.bf16 %v4940_v14, %v4940_v14 }
 0x573   :  { %5801 = vmatmul.mubr.bf16.vlgmr.msra.gmra.mrb[24].mxu1 %v4958_v56 }
 0x646   :  { %v5041_v40 = vpop.f32.mrb[24].mxu1 }
 0x647   :  { %v5042_v6 = vadd.f32 %v5041_v40, %v4957_v28  ;;  %v5802_v15 = vpop.f32.mrb[25].mxu1 }
 0x648   :  { %v5044_v16 = vpop.f32.mrb[26].mxu1 }
 0x649   :  { %5047 = vst [vmem:[%s6260_s4] sm:$0xff] %v5042_v6  ;;  %v5803_v63 = vpop.f32.mrb[27].mxu1 }
 0x64a   :  { %5052 = vsyncpa [#allocation3], 1 }
 0x64b   :  { %5053 = vsyncpa [#allocation5], 1 }

</bundles_post_ra>
